<compile_context>
chip_gen: v6e
topology: v6e:2x2x1
jax: 0.10.0
libtpu: 0.0.40
codegen_flags: <defaults>
</compile_context>

<pallas_src>
import functools
import math

import jax
import jax.numpy as jnp
from jax.experimental import pallas as pl
from jax.experimental.pallas import tpu as pltpu


def _round_up(x, m):
    return ((x + m - 1) // m) * m


def _pick_tile(m, tile_max, align=8):
    """Row-tile size: <= tile_max, 8-aligned, and >= 2 grid steps whenever m > align."""
    ma = _round_up(max(m, 1), align)
    if ma <= align:
        return ma
    half = _round_up((ma + 1) // 2, align)
    return min(tile_max, half)


def _vmem_limit_bytes():
    # Per-generation VMEM budget: ~3/4 of physical, capped at 100 MiB (v5e/v6e 128 MiB -> 96 MiB,
    # v7x 64 MiB -> 48 MiB).  Falls back to 48 MiB if the query is unavailable.
    try:
        info = pltpu.get_tpu_info()
        cap = int(getattr(info, "vmem_capacity_bytes", 64 * 1024 * 1024))
    except Exception:
        cap = 64 * 1024 * 1024
    return max(32 * 1024 * 1024, min(cap * 3 // 4, 100 * 1024 * 1024))


_VMEM_LIMIT = _vmem_limit_bytes()


# ----------------------------- Pallas kernels -----------------------------

def _mm_bias_act_kernel(x_ref, w_ref, b_ref, o_ref, *, act, split):
    y = jnp.dot(x_ref[...], w_ref[...], preferred_element_type=jnp.float32)
    y = y + b_ref[...]
    if act == "relu":
        y = jnp.maximum(y, 0.0)
    elif act == "tanh":
        y = jnp.tanh(y)
    elif act == "tanh_relu":
        # `split` is 128-aligned: tanh on the hidden lane group, relu on the context lane group.
        y = jnp.concatenate([jnp.tanh(y[:, :split]), jnp.maximum(y[:, split:], 0.0)], axis=1)
    o_ref[...] = y.astype(o_ref.dtype)


def mm_bias_act(x, w, b, act="none", split=0, tile_m=1024):
    """(M, K) @ (K, N) + b with optional fused activation, tiled over M with row padding."""
    M, K = x.shape
    N = w.shape[1]
    tm = _pick_tile(M, tile_m)
    Mp = _round_up(M, tm)
    if Mp != M:
        x = jnp.pad(x, ((0, Mp - M), (0, 0)))
    out = pl.pallas_call(
        functools.partial(_mm_bias_act_kernel, act=act, split=split),
        out_shape=jax.ShapeDtypeStruct((Mp, N), jnp.float32),
        grid_spec=pltpu.PrefetchScalarGridSpec(
            num_scalar_prefetch=0,
            grid=(Mp // tm,),
            in_specs=[
                pl.BlockSpec((tm, K), lambda i: (i, 0)),
                pl.BlockSpec((K, N), lambda i: (0, 0)),
                pl.BlockSpec((1, N), lambda i: (0, 0)),
            ],
            out_specs=pl.BlockSpec((tm, N), lambda i: (i, 0)),
        ),
        compiler_params=pltpu.CompilerParams(
            dimension_semantics=("parallel",), vmem_limit_bytes=_VMEM_LIMIT),
    )(x, w, b)
    return out[:M] if Mp != M else out


def _corr_kernel(f1_ref, f2t_ref, o_ref):
    # (ti, C) @ (C, tj): straight MXU matmul on bf16 operands, f32 accumulate, bf16 store.
    o_ref[0] = jnp.dot(f1_ref[0], f2t_ref[0],
                       preferred_element_type=jnp.float32).astype(o_ref.dtype)


def corr_volume(f1, f2t, tile=512):
    """All-pairs correlation per (target, batch): (G, HW, C) x (G, C, HW) -> bf16 (G, HW, HW)."""
    G, HW, C = f1.shape
    if HW <= tile:
        ti = tj = HW
        HWp = HW
    else:
        ti = tj = tile
        HWp = _round_up(HW, tile)
        if HWp != HW:
            f1 = jnp.pad(f1, ((0, 0), (0, HWp - HW), (0, 0)))
            f2t = jnp.pad(f2t, ((0, 0), (0, 0), (0, HWp - HW)))
    out = pl.pallas_call(
        _corr_kernel,
        out_shape=jax.ShapeDtypeStruct((G, HWp, HWp), jnp.bfloat16),
        grid_spec=pltpu.PrefetchScalarGridSpec(
            num_scalar_prefetch=0,
            grid=(G, HWp // ti, HWp // tj),
            in_specs=[
                pl.BlockSpec((1, ti, C), lambda g, i, j: (g, i, 0)),
                pl.BlockSpec((1, C, tj), lambda g, i, j: (g, 0, j)),
            ],
            out_specs=pl.BlockSpec((1, ti, tj), lambda g, i, j: (g, i, j)),
        ),
        compiler_params=pltpu.CompilerParams(
            dimension_semantics=("parallel", "parallel", "parallel"),
            vmem_limit_bytes=_VMEM_LIMIT),
    )(f1, f2t)
    return out[:, :HW, :HW] if HWp != HW else out


# Fused per-iteration update block: motion encoder + ConvGRU + bezier/mask heads in ONE kernel.
# Inputs:  x   (tm, d_in)  = [corr_feat | bez | inp | 0-pad]   (one lane-dense slab)
#          h   (tm, 128)   = hidden state padded to 128 (zeros past hdim)
# Output:  out (tm, head_cols + 128) = [delta_bez | 0.25*mask | 0-pad | h_new]
_UPD_KEYS = ("w_me", "b_me", "w_mot", "b_mot", "wx_x", "wx_m",
             "wh_zr", "b_zr", "wh_q", "b_q", "w_h1", "b_h1", "w_h2", "b_h2")


def _update_kernel(x_ref, h_ref,
                   w_me, b_me, w_mot, b_mot, wx_x, wx_m,
                   wh_zr, b_zr, wh_q, b_q, w_h1, b_h1, w_h2, b_h2,
                   out_ref, *, head_cols):
    def dot(a, b):
        return jnp.dot(a, b, preferred_element_type=jnp.float32)

    x = x_ref[...]
    h = h_ref[...]

    # Motion encoder: one matmul over the full input slab (zero rows select corr/bez fields).
    me = jnp.maximum(dot(x, w_me[...]) + b_me[...], 0.0)          # (tm, 128), 96 real
    mot = jnp.maximum(dot(me, w_mot[...]) + b_mot[...], 0.0)      # (tm, 128), 60 real

    # ConvGRU x-side shared across z/r/q gates: columns [z|r|q], each 128-aligned.
    x_all = dot(x, wx_x[...]) + dot(mot, wx_m[...])               # (tm, 384)

    zr = jax.nn.sigmoid(dot(h, wh_zr[...]) + x_all[:, :256] + b_zr[...])
    z = zr[:, :128]
    r = zr[:, 128:256]
    q = jnp.tanh(dot(r * h, wh_q[...]) + x_all[:, 256:384] + b_q[...])
    h_new = (1.0 - z) * h + z * q                                 # padding columns stay zero

    # Heads: relu([bez1 | mask1]) then block-diagonal [bez2 | 0.25*mask2].
    hid = jnp.maximum(dot(h_new, w_h1[...]) + b_h1[...], 0.0)
    out_ref[:, :head_cols] = dot(hid, w_h2[...]) + b_h2[...]      # 128-aligned dense store
    out_ref[:, head_cols:] = h_new                                # 128-aligned dense store


def update_block_step(x, net, upd, tile_m=1024):
    """One fused BasicUpdateBlock step over all B*P rows; weights stay resident in VMEM."""
    M, d_in = x.shape
    tm = _pick_tile(M, tile_m)
    Mp = _round_up(M, tm)
    if Mp != M:
        x = jnp.pad(x, ((0, Mp - M), (0, 0)))
        net = jnp.pad(net, ((0, Mp - M), (0, 0)))

    weights = [upd[k] for k in _UPD_KEYS]
    head_cols = upd["w_h2"].shape[1]
    out_w = head_cols + 128

    in_specs = [pl.BlockSpec((tm, d_in), lambda i: (i, 0)),
                pl.BlockSpec((tm, 128), lambda i: (i, 0))]
    in_specs += [pl.BlockSpec(w.shape, lambda i: (0, 0)) for w in weights]

    out = pl.pallas_call(
        functools.partial(_update_kernel, head_cols=head_cols),
        out_shape=jax.ShapeDtypeStruct((Mp, out_w), jnp.float32),
        grid_spec=pltpu.PrefetchScalarGridSpec(
            num_scalar_prefetch=0, grid=(Mp // tm,),
            in_specs=in_specs,
            out_specs=pl.BlockSpec((tm, out_w), lambda i: (i, 0))),
        compiler_params=pltpu.CompilerParams(
            dimension_semantics=("parallel",), vmem_limit_bytes=_VMEM_LIMIT),
    )(x, net, *weights)
    return out[:M] if Mp != M else out


def _upsample_kernel(mask_ref, nbr_ref, o_ref, *, C):
    # mask: (tn, 576) logits laid out [neighbor k major, 64-subpixel minor]
    # nbr:  (tn, 9*C)  values laid out [neighbor k major, channel minor]
    # out:  (tn, C*64) [channel major, subpixel minor] — single dense store.
    m = mask_ref[...]
    v = nbr_ref[...]
    mx = m[:, 0:64]
    for k in range(1, 9):
        mx = jnp.maximum(mx, m[:, k * 64:(k + 1) * 64])
    den = jnp.zeros_like(mx)
    accs = [jnp.zeros_like(mx) for _ in range(C)]
    for k in range(9):
        e = jnp.exp(m[:, k * 64:(k + 1) * 64] - mx)
        den = den + e
        for c in range(C):
            accs[c] = accs[c] + e * v[:, k * C + c:k * C + c + 1]
    inv = pl.reciprocal(den, approx=True)
    o_ref[...] = jnp.concatenate([a * inv for a in accs], axis=1)


def convex_upsample_combine(mask, nbr, C, tile_n=1024):
    """mask: (N, 576); nbr: (N, 9*C) -> (N, C*64) lane-dense, ordered [c, dy, dx]."""
    N = mask.shape[0]
    tn = _pick_tile(N, tile_n)
    Np = _round_up(N, tn)
    if Np != N:
        mask = jnp.pad(mask, ((0, Np - N), (0, 0)))
        nbr = jnp.pad(nbr, ((0, Np - N), (0, 0)))
    out = pl.pallas_call(
        functools.partial(_upsample_kernel, C=C),
        out_shape=jax.ShapeDtypeStruct((Np, 64 * C), jnp.float32),
        grid_spec=pltpu.PrefetchScalarGridSpec(
            num_scalar_prefetch=0, grid=(Np // tn,),
            in_specs=[
                pl.BlockSpec((tn, 9 * 64), lambda i: (i, 0)),
                pl.BlockSpec((tn, 9 * C), lambda i: (i, 0)),
            ],
            out_specs=pl.BlockSpec((tn, 64 * C), lambda i: (i, 0)),
        ),
        compiler_params=pltpu.CompilerParams(
            dimension_semantics=("parallel",), vmem_limit_bytes=_VMEM_LIMIT),
    )(mask, nbr)
    return out[:N] if Np != N else out


# ----------------------------- JAX glue -----------------------------

def extract_patches_8x8(x):
    """NHWC image -> (B*H/8*W/8, 64*C) non-overlapping 8x8 patches (stride-8 conv im2col)."""
    B, H, W, C = x.shape
    p = x.reshape(B, H // 8, 8, W // 8, 8, C)
    p = jnp.transpose(p, (0, 1, 3, 2, 4, 5))
    return p.reshape(B * (H // 8) * (W // 8), 8 * 8 * C)


def corr_lookup(corr, coords1, radius, H8, W8):
    """Bilinear lookup of the correlation volume in a (2r+1)^2 window per source pixel.

    corr:    (T, B, P, H8, W8) bf16   coords1: (T, B, P, 2) as (x, y)
    returns: (B*P, T*(2r+1)^2) f32
    """
    # TODO(synk): the data-dependent bilinear gather (grid_sample equivalent) stays in XLA; a
    # scalar-prefetch / manual-DMA Pallas gather kernel would be needed to move it on-chip.
    T, B, P = corr.shape[:3]
    r = radius
    d = jnp.arange(-r, r + 1, dtype=jnp.float32)
    dyg, dxg = jnp.meshgrid(d, d, indexing="ij")
    dx = dxg.reshape(-1)
    dy = dyg.reshape(-1)
    sx = coords1[..., 0:1] + dx                       # (T, B, P, 81)
    sy = coords1[..., 1:2] + dy
    x0 = jnp.floor(sx)
    y0 = jnp.floor(sy)
    wx = sx - x0
    wy = sy - y0
    flat = corr.reshape(T, B, P, H8 * W8)

    # Single fused gather for all four bilinear corners.
    xs_all = jnp.concatenate([x0, x0 + 1.0, x0, x0 + 1.0], axis=-1)   # (T, B, P, 4*81)
    ys_all = jnp.concatenate([y0, y0, y0 + 1.0, y0 + 1.0], axis=-1)
    valid = (ys_all >= 0) & (ys_all <= H8 - 1) & (xs_all >= 0) & (xs_all <= W8 - 1)
    idx = (jnp.clip(ys_all, 0, H8 - 1) * W8 + jnp.clip(xs_all, 0, W8 - 1)).astype(jnp.int32)
    vals = jnp.take_along_axis(flat, idx, axis=-1).astype(jnp.float32)
    vals = jnp.where(valid, vals, 0.0)
    v00, v01, v10, v11 = jnp.split(vals, 4, axis=-1)

    out = (v00 * (1 - wy) * (1 - wx) + v01 * (1 - wy) * wx
           + v10 * wy * (1 - wx) + v11 * wy * wx)      # (T, B, P, 81)
    out = jnp.moveaxis(out, 0, 2)                      # (B, P, T, 81)
    return out.reshape(B * P, T * (2 * r + 1) ** 2)


def convex_upsample(bez_flat, up_mask, B, H8, W8, dpar):
    """RAFT-style convex 8x upsampling of the bezier parameters. Returns NCHW."""
    N = B * H8 * W8
    p = (8.0 * bez_flat).reshape(B, H8, W8, dpar)
    pad = jnp.pad(p, ((0, 0), (1, 1), (1, 1), (0, 0)))
    nbrs = [pad[:, dyy:dyy + H8, dxx:dxx + W8, :] for dyy in range(3) for dxx in range(3)]
    nbr = jnp.stack(nbrs, axis=3).reshape(N, 9 * dpar)      # flat [k major, c minor]
    comb = convex_upsample_combine(up_mask, nbr, dpar)      # (N, dpar*64), [c, dy, dx]
    comb = comb.reshape(B, H8, W8, dpar, 8, 8)
    comb = jnp.transpose(comb, (0, 3, 1, 4, 2, 5))          # (B, C, H8, 8, W8, 8)
    return comb.reshape(B, dpar, H8 * 8, W8 * 8)            # NCHW like PyTorch


# ----------------------------- parameters -----------------------------

def init_model_params(key, cfg):
    hdim, cdim, fdim = cfg["hdim"], cfg["cdim"], cfg["feature_dim"]
    nb_corr, nb_ctx = cfg["nbins_corr"], cfg["nbins_context"]
    deg = cfg["bezier_degree"]
    T = len(cfg["ev_corr_target_indices"])
    corr_dim = T * (2 * cfg["radius"] + 1) ** 2

    keys = jax.random.split(key, 16)

    def dense(k, i, o, scale=0.05):
        kw, kb = jax.random.split(k)
        return (jax.random.normal(kw, (i, o), jnp.float32) * scale,
                jax.random.normal(kb, (1, o), jnp.float32) * scale)

    params = {}
    # TODO(synk): BasicEncoder (residual conv stack + norms, /8 downsample) approximated by a
    # single stride-8 patch-embed linear projection (same input/output resolution & dims).
    params["fnet_w"], params["fnet_b"] = dense(keys[0], 64 * nb_corr, fdim)
    params["cnet_w"], params["cnet_b"] = dense(keys[1], 64 * nb_ctx, hdim + cdim)
    # BasicUpdateBlock pieces (motion encoder 1x1 convs, GRU, bezier & mask heads)
    params["convc1_w"], params["convc1_b"] = dense(keys[2], corr_dim, 64)
    params["convf1_w"], params["convf1_b"] = dense(keys[3], 2 * deg, 32)
    params["conv_w"], params["conv_b"] = dense(keys[4], 64 + 32, 64 - 2 * deg)
    params["bez1_w"], params["bez1_b"] = dense(keys[5], hdim, 64)
    params["bez2_w"], params["bez2_b"] = dense(keys[6], 64, 2 * deg)
    params["mask1_w"], params["mask1_b"] = dense(keys[7], hdim, 64)
    params["mask2_w"], params["mask2_b"] = dense(keys[8], 64, 64 * 9)

    xdim = cdim + 64
    gru = {}
    for name, k in zip(("z", "r", "q"), (keys[9], keys[10], keys[11])):
        kh, kx = jax.random.split(k)
        gru[f"w{name}h"] = jax.random.normal(kh, (hdim, hdim), jnp.float32) * 0.05
        gru[f"w{name}x"] = jax.random.normal(kx, (xdim, hdim), jnp.float32) * 0.05
        gru[f"b{name}"] = jnp.zeros((1, hdim), jnp.float32)
    params["gru"] = gru
    return params


def build_update_weights(params, cfg):
    """Repack the update-block weights into the fused, lane-aligned layout used by _update_kernel.

    Input slab X columns: [corr(corr_dim) | bez(dpar) | inp(cdim) | 0-pad] -> d_in (128-multiple).
    Hidden state padded to 128 columns (zeros past hdim)."""
    deg = cfg["bezier_degree"]
    cdim = cfg["cdim"]
    hdim = cfg["hdim"]
    dpar = 2 * deg
    f32 = jnp.float32
    assert hdim <= 128 and cdim <= 128

    convc1_w, convc1_b = params["convc1_w"], params["convc1_b"]   # (corr_dim, 64)
    convf1_w, convf1_b = params["convf1_w"], params["convf1_b"]   # (dpar, 32)
    conv_w, conv_b = params["conv_w"], params["conv_b"]           # (96, 60)
    corr_dim = convc1_w.shape[0]
    mot_hidden = conv_w.shape[1]                                  # 64 - dpar
    me_dim = convc1_w.shape[1] + convf1_w.shape[1]                # 96

    off_bez = corr_dim
    off_inp = corr_dim + dpar
    d_real = corr_dim + dpar + cdim
    d_in = _round_up(d_real, 128)

    # Motion encoder: me = relu(X @ w_me + b_me), 128-wide (96 real)
    w_me = jnp.zeros((d_in, 128), f32)
    w_me = w_me.at[:corr_dim, :64].set(convc1_w)
    w_me = w_me.at[off_bez:off_bez + dpar, 64:96].set(convf1_w)
    b_me = jnp.zeros((1, 128), f32).at[:, :64].set(convc1_b).at[:, 64:96].set(convf1_b)

    # mot = relu(me @ w_mot + b_mot), 128-wide (mot_hidden real)
    w_mot = jnp.zeros((128, 128), f32).at[:me_dim, :mot_hidden].set(conv_w)
    b_mot = jnp.zeros((1, 128), f32).at[:, :mot_hidden].set(conv_b)

    # GRU x-side shared across gates: columns [z | r | q], each 128-wide.
    gru = params["gru"]
    wx_x = jnp.zeros((d_in, 384), f32)
    wx_m = jnp.zeros((128, 384), f32)
    for gi, g in enumerate(("z", "r", "q")):
        w = gru[f"w{g}x"]                     # (cdim + 64, hdim): rows [inp | mot | bez]
        c0 = gi * 128
        wx_x = wx_x.at[off_inp:off_inp + cdim, c0:c0 + hdim].set(w[:cdim])
        wx_m = wx_m.at[:mot_hidden, c0:c0 + hdim].set(w[cdim:cdim + mot_hidden])
        wx_x = wx_x.at[off_bez:off_bez + dpar, c0:c0 + hdim].set(w[cdim + mot_hidden:])

    # h-side: zr (128 -> 256, z at [0,128), r at [128,256)), q (128 -> 128)
    wh_zr = jnp.zeros((128, 256), f32)
    wh_zr = wh_zr.at[:hdim, :hdim].set(gru["wzh"]).at[:hdim, 128:128 + hdim].set(gru["wrh"])
    b_zr = jnp.zeros((1, 256), f32).at[:, :hdim].set(gru["bz"]).at[:, 128:128 + hdim].set(gru["br"])
    wh_q = jnp.zeros((128, 128), f32).at[:hdim, :hdim].set(gru["wqh"])
    b_q = jnp.zeros((1, 128), f32).at[:, :hdim].set(gru["bq"])

    # Heads: relu([bez1 | mask1]) then block-diagonal [bez2 | 0.25*mask2] -> lane-dense output.
    w_h1 = jnp.zeros((128, 128), f32)
    w_h1 = w_h1.at[:hdim, :64].set(params["bez1_w"]).at[:hdim, 64:128].set(params["mask1_w"])
    b_h1 = jnp.zeros((1, 128), f32).at[:, :64].set(params["bez1_b"]).at[:, 64:128].set(params["mask1_b"])

    d_mask = params["mask2_w"].shape[1]           # 576
    head_cols = _round_up(dpar + d_mask, 128)     # 640 for deg=2
    w_h2 = jnp.zeros((128, head_cols), f32)
    w_h2 = w_h2.at[:64, :dpar].set(params["bez2_w"])
    w_h2 = w_h2.at[64:128, dpar:dpar + d_mask].set(0.25 * params["mask2_w"])  # fold 0.25 scale
    b_h2 = jnp.zeros((1, head_cols), f32)
    b_h2 = b_h2.at[:, :dpar].set(params["bez2_b"]).at[:, dpar:dpar + d_mask].set(0.25 * params["mask2_b"])

    return dict(w_me=w_me, b_me=b_me, w_mot=w_mot, b_mot=b_mot,
                wx_x=wx_x, wx_m=wx_m,
                wh_zr=wh_zr, b_zr=b_zr, wh_q=wh_q, b_q=b_q,
                w_h1=w_h1, b_h1=b_h1, w_h2=w_h2, b_h2=b_h2)


# ----------------------------- forward pass -----------------------------

def raft_spline_forward(voxel_grid_nchw, params, cfg, iters=12):
    assert iters == 12  # mirrors the PyTorch assert
    B, Cvg, H, W = voxel_grid_nchw.shape
    nb_ctx, nb_corr = cfg["nbins_context"], cfg["nbins_corr"]
    assert nb_ctx + nb_corr - 1 == Cvg
    deg = cfg["bezier_degree"]
    dpar = 2 * deg
    targets = cfg["ev_corr_target_indices"]
    T = len(targets)
    hdim, cdim = cfg["hdim"], cfg["cdim"]
    radius = cfg["radius"]
    H8, W8 = H // 8, W // 8
    P = H8 * W8
    M = B * P
    d_mask = 64 * 9

    vg = jnp.transpose(voxel_grid_nchw.astype(jnp.float32), (0, 2, 3, 1))  # NHWC

    # gen_voxel_grids
    idxs = [0] + list(targets)
    corr_grids = [vg[..., i:i + nb_corr] for i in idxs]
    context_grid = vg[..., Cvg - nb_ctx:]

    # event feature network: all corr grids batched into one bf16 matmul (f32 accumulate)
    patches = jnp.concatenate([extract_patches_8x8(g) for g in corr_grids], axis=0)
    fall = mm_bias_act(patches.astype(jnp.bfloat16),
                       params["fnet_w"].astype(jnp.bfloat16),
                       params["fnet_b"], act="relu")
    F = fall.shape[-1]
    fall = fall.reshape(1 + T, B, P, F)
    fmap1 = (fall[0] * (1.0 / math.sqrt(F))).astype(jnp.bfloat16)  # fold 1/sqrt(C) scale
    fmap2 = fall[1:].astype(jnp.bfloat16)                          # (T, B, P, F)

    f1 = jnp.broadcast_to(fmap1[None], (T, B, P, F)).reshape(T * B, P, F)
    f2t = jnp.transpose(fmap2.reshape(T * B, P, F), (0, 2, 1))     # pre-transposed RHS
    corr = corr_volume(f1, f2t).reshape(T, B, P, H8, W8)           # bf16 volume
    # TODO(synk): only 1 correlation pyramid level (ev_corr_levels = (1, 1)); avg-pool pyramid
    # for levels > 1 not built.

    # context network -> lane-aligned [hidden(tanh) | pad | context(relu) | pad] 256-wide output
    w_ctx = jnp.zeros((params["cnet_w"].shape[0], 256), jnp.float32)
    w_ctx = w_ctx.at[:, :hdim].set(params["cnet_w"][:, :hdim])
    w_ctx = w_ctx.at[:, 128:128 + cdim].set(params["cnet_w"][:, hdim:])
    b_ctx = jnp.zeros((1, 256), jnp.float32)
    b_ctx = b_ctx.at[:, :hdim].set(params["cnet_b"][:, :hdim])
    b_ctx = b_ctx.at[:, 128:128 + cdim].set(params["cnet_b"][:, hdim:])
    ctx_patches = extract_patches_8x8(context_grid).astype(jnp.bfloat16)
    ctx = mm_bias_act(ctx_patches, w_ctx.astype(jnp.bfloat16), b_ctx,
                      act="tanh_relu", split=128)                  # (B*P, 256)
    net = ctx[:, :128]                  # 128-padded hidden state (zeros past hdim)
    inp = ctx[:, 128:128 + cdim]

    upd = build_update_weights(params, cfg)
    d_in = upd["w_me"].shape[0]
    head_cols = upd["w_h2"].shape[1]
    corr_dim = params["convc1_w"].shape[0]
    d_real = corr_dim + dpar + cdim
    x_pad = jnp.zeros((M, d_in - d_real), jnp.float32) if d_in > d_real else None

    # initialize_flow
    ys, xs = jnp.meshgrid(jnp.arange(H8, dtype=jnp.float32),
                          jnp.arange(W8, dtype=jnp.float32), indexing="ij")
    coords0 = jnp.stack([xs, ys], axis=-1).reshape(1, P, 2)        # (x, y)
    bez_params = jnp.zeros((B, P, deg, 2), jnp.float32)            # bezier control points (P_0=0)

    dt = 1.0 / (nb_ctx - 1)
    times = [dt * ti for ti in targets]
    basis = jnp.array(
        [[math.comb(deg, k) * (t ** k) * ((1.0 - t) ** (deg - k)) for k in range(1, deg + 1)]
         for t in times], dtype=jnp.float32)                       # (T, deg)

    predictions = []
    for _ in range(iters):
        # TODO(synk): detach_bezier is an autograd no-op in this forward-only port.
        flows = jnp.einsum("tk,bpkc->tbpc", basis, bez_params)     # (T, B, P, 2)
        coords1 = coords0[None] + flows                            # (T, B, P, 2)

        corr_feat = corr_lookup(corr, coords1, radius, H8, W8)     # (B*P, T*81) f32
        bez_flat = bez_params.reshape(M, dpar)

        pieces = [corr_feat, bez_flat, inp]
        if x_pad is not None:
            pieces.append(x_pad)
        x = jnp.concatenate(pieces, axis=1)                        # one lane-dense input slab

        out = update_block_step(x, net, upd)                       # fused ME + GRU + heads
        delta = out[:, :dpar]
        up_mask = out[:, dpar:dpar + d_mask]
        net = out[:, head_cols:]                                   # 128-padded hidden state

        bez_params = bez_params + delta.reshape(B, P, deg, 2)      # delta_update_params
        bez_up = convex_upsample(bez_params.reshape(M, dpar), up_mask, B, H8, W8, dpar)
        predictions.append(bez_up)

    return predictions  # list of (B, 2*deg, H, W) upsampled bezier-parameter predictions


# ----------------------------- main -----------------------------

if __name__ == "__main__":
    cfg = dict(
        nbins_context=5,
        nbins_corr=4,
        bezier_degree=2,
        ev_corr_target_indices=(2, 4),
        ev_corr_levels=(1, 1),
        radius=4,          # self.ev_corr_radius = 4 in the module
        hdim=32,
        cdim=32,
        feature_dim=32,
    )
    key = jax.random.PRNGKey(0)
    kp, kx = jax.random.split(key)
    params = init_model_params(kp, cfg)

    B, H, W = 2, 32, 32
    C = cfg["nbins_context"] + cfg["nbins_corr"] - 1   # 8
    voxel_grid = jax.random.normal(kx, (B, C, H, W), jnp.float32)  # NCHW, like PyTorch input

    fwd = jax.jit(functools.partial(raft_spline_forward, cfg=cfg, iters=12))
    preds = fwd(voxel_grid, params)
    final = jax.block_until_ready(preds[-1])

    assert len(preds) == 12
    assert final.shape == (B, 2 * cfg["bezier_degree"], H, W)
    assert bool(jnp.all(jnp.isfinite(final)))
    print("KERNEL_OK")
</pallas_src>

<mosaic_0001>
module attributes {stable_mosaic.version = 11 : i64} {
  func.func @_mm_bias_act_kernel(%arg0: i32, %arg1: memref<48x256xbf16, #tpu.memory_space<vmem>>, %arg2: memref<256x32xbf16, #tpu.memory_space<vmem>>, %arg3: memref<1x32xf32, #tpu.memory_space<vmem>>, %arg4: memref<48x32xf32, #tpu.memory_space<vmem>>) attributes {dimension_semantics = [#tpu.dimension_semantics<parallel>], iteration_bounds = array<i64: 2>, scalar_prefetch = 0 : i64, scratch_operands = 0 : i64, tpu.core_type = #tpu.core_type<tc>, window_params = [{transform_indices = @transform_0, window_bounds = array<i64: 48, 256>}, {pipeline_mode = #tpu.pipeline_mode<synchronous>, transform_indices = @transform_1, window_bounds = array<i64: 256, 32>}, {pipeline_mode = #tpu.pipeline_mode<synchronous>, transform_indices = @transform_2, window_bounds = array<i64: 1, 32>}, {transform_indices = @transform_3, window_bounds = array<i64: 48, 32>}]} {
    %c0 = arith.constant 0 : index
    %c0_0 = arith.constant 0 : index
    %0 = vector.load %arg1[%c0, %c0_0] : memref<48x256xbf16, #tpu.memory_space<vmem>>, vector<48x256xbf16>
    %c0_1 = arith.constant 0 : index
    %c0_2 = arith.constant 0 : index
    %1 = vector.load %arg2[%c0_1, %c0_2] : memref<256x32xbf16, #tpu.memory_space<vmem>>, vector<256x32xbf16>
    %cst = arith.constant dense<0.000000e+00> : vector<48x32xf32>
    %2 = tpu.matmul %0, %1, %cst {dimension_numbers = #tpu.dot_dimension_numbers<[1], [0], [0], [1], [0, 0, 1, 1], [], []>} : vector<48x256xbf16>, vector<256x32xbf16>, vector<48x32xf32> -> vector<48x32xf32>
    %c0_3 = arith.constant 0 : index
    %c0_4 = arith.constant 0 : index
    %3 = vector.load %arg3[%c0_3, %c0_4] : memref<1x32xf32, #tpu.memory_space<vmem>>, vector<1x32xf32>
    %4 = vector.broadcast %3 : vector<1x32xf32> to vector<48x32xf32>
    %5 = arith.addf %2, %4 : vector<48x32xf32>
    %cst_5 = arith.constant 0.000000e+00 : f32
    %6 = vector.broadcast %cst_5 : f32 to vector<48x32xf32>
    %7 = arith.maximumf %5, %6 : vector<48x32xf32>
    %c0_6 = arith.constant 0 : index
    %c0_7 = arith.constant 0 : index
    %8 = vector.load %arg4[%c0_6, %c0_7] : memref<48x32xf32, #tpu.memory_space<vmem>>, vector<48x32xf32>
    tpu.vector_store %arg4[%c0_6, %c0_7], %7 {strides = array<i32>} : memref<48x32xf32, #tpu.memory_space<vmem>>, vector<48x32xf32>,
    return
  }
  func.func @transform_0(%arg0: i32) -> (i32, i32) {
    %c0_i32 = arith.constant 0 : i32
    %c0_i32_0 = arith.constant 0 : i32
    return %arg0, %c0_i32 : i32, i32
  }
  func.func @transform_1(%arg0: i32) -> (i32, i32) {
    %c0_i32 = arith.constant 0 : i32
    %c0_i32_0 = arith.constant 0 : i32
    %c0_i32_1 = arith.constant 0 : i32
    return %c0_i32, %c0_i32_0 : i32, i32
  }
  func.func @transform_2(%arg0: i32) -> (i32, i32) {
    %c0_i32 = arith.constant 0 : i32
    %c0_i32_0 = arith.constant 0 : i32
    %c0_i32_1 = arith.constant 0 : i32
    return %c0_i32, %c0_i32_0 : i32, i32
  }
  func.func @transform_3(%arg0: i32) -> (i32, i32) {
    %c0_i32 = arith.constant 0 : i32
    %c0_i32_0 = arith.constant 0 : i32
    return %arg0, %c0_i32 : i32, i32
  }
}

module attributes {stable_mosaic.version = 11 : i64} {
  func.func @_corr_kernel(%arg0: i32, %arg1: i32, %arg2: i32, %arg3: memref<1x16x32xbf16, #tpu.memory_space<vmem>>, %arg4: memref<1x32x16xbf16, #tpu.memory_space<vmem>>, %arg5: memref<1x16x16xbf16, #tpu.memory_space<vmem>>) attributes {dimension_semantics = [#tpu.dimension_semantics<parallel>, #tpu.dimension_semantics<parallel>, #tpu.dimension_semantics<parallel>], iteration_bounds = array<i64: 4, 1, 1>, scalar_prefetch = 0 : i64, scratch_operands = 0 : i64, tpu.core_type = #tpu.core_type<tc>, window_params = [{transform_indices = @transform_0, window_bounds = array<i64: 1, 16, 32>}, {transform_indices = @transform_1, window_bounds = array<i64: 1, 32, 16>}, {transform_indices = @transform_2, window_bounds = array<i64: 1, 16, 16>}]} {
    %c0 = arith.constant 0 : index
    %c0_0 = arith.constant 0 : index
    %c0_1 = arith.constant 0 : index
    %0 = vector.load %arg3[%c0, %c0_0, %c0_1] : memref<1x16x32xbf16, #tpu.memory_space<vmem>>, vector<1x16x32xbf16>
    %1 = vector.shape_cast %0 : vector<1x16x32xbf16> to vector<16x32xbf16>
    %c0_2 = arith.constant 0 : index
    %c0_3 = arith.constant 0 : index
    %c0_4 = arith.constant 0 : index
    %2 = vector.load %arg4[%c0_2, %c0_3, %c0_4] : memref<1x32x16xbf16, #tpu.memory_space<vmem>>, vector<1x32x16xbf16>
    %3 = vector.shape_cast %2 : vector<1x32x16xbf16> to vector<32x16xbf16>
    %cst = arith.constant dense<0.000000e+00> : vector<16x16xf32>
    %4 = tpu.matmul %1, %3, %cst {dimension_numbers = #tpu.dot_dimension_numbers<[1], [0], [0], [1], [0, 0, 1, 1], [], []>} : vector<16x32xbf16>, vector<32x16xbf16>, vector<16x16xf32> -> vector<16x16xf32>
    %5 = arith.truncf %4 : vector<16x16xf32> to vector<16x16xbf16>
    %c0_5 = arith.constant 0 : index
    %c0_6 = arith.constant 0 : index
    %c0_7 = arith.constant 0 : index
    %6 = vector.load %arg5[%c0_5, %c0_6, %c0_7] : memref<1x16x16xbf16, #tpu.memory_space<vmem>>, vector<1x16x16xbf16>
    %7 = vector.shape_cast %6 : vector<1x16x16xbf16> to vector<16x16xbf16>
    %8 = vector.shape_cast %5 : vector<16x16xbf16> to vector<1x16x16xbf16>
    tpu.vector_store %arg5[%c0_5, %c0_6, %c0_7], %8 {strides = array<i32>} : memref<1x16x16xbf16, #tpu.memory_space<vmem>>, vector<1x16x16xbf16>,
    return
  }
  func.func @transform_0(%arg0: i32, %arg1: i32, %arg2: i32) -> (i32, i32, i32) {
    %c0_i32 = arith.constant 0 : i32
    %c0_i32_0 = arith.constant 0 : i32
    return %arg0, %arg1, %c0_i32 : i32, i32, i32
  }
  func.func @transform_1(%arg0: i32, %arg1: i32, %arg2: i32) -> (i32, i32, i32) {
    %c0_i32 = arith.constant 0 : i32
    %c0_i32_0 = arith.constant 0 : i32
    return %arg0, %c0_i32, %arg2 : i32, i32, i32
  }
  func.func @transform_2(%arg0: i32, %arg1: i32, %arg2: i32) -> (i32, i32, i32) {
    %c0_i32 = arith.constant 0 : i32
    return %arg0, %arg1, %arg2 : i32, i32, i32
  }
}

module attributes {stable_mosaic.version = 11 : i64} {
  func.func @_mm_bias_act_kernel(%arg0: i32, %arg1: memref<16x320xbf16, #tpu.memory_space<vmem>>, %arg2: memref<320x256xbf16, #tpu.memory_space<vmem>>, %arg3: memref<1x256xf32, #tpu.memory_space<vmem>>, %arg4: memref<16x256xf32, #tpu.memory_space<vmem>>) attributes {dimension_semantics = [#tpu.dimension_semantics<parallel>], iteration_bounds = array<i64: 2>, scalar_prefetch = 0 : i64, scratch_operands = 0 : i64, tpu.core_type = #tpu.core_type<tc>, window_params = [{transform_indices = @transform_0, window_bounds = array<i64: 16, 320>}, {pipeline_mode = #tpu.pipeline_mode<synchronous>, transform_indices = @transform_1, window_bounds = array<i64: 320, 256>}, {pipeline_mode = #tpu.pipeline_mode<synchronous>, transform_indices = @transform_2, window_bounds = array<i64: 1, 256>}, {transform_indices = @transform_3, window_bounds = array<i64: 16, 256>}]} {
    %c0 = arith.constant 0 : index
    %c0_0 = arith.constant 0 : index
    %0 = vector.load %arg1[%c0, %c0_0] : memref<16x320xbf16, #tpu.memory_space<vmem>>, vector<16x320xbf16>
    %c0_1 = arith.constant 0 : index
    %c0_2 = arith.constant 0 : index
    %1 = vector.load %arg2[%c0_1, %c0_2] : memref<320x256xbf16, #tpu.memory_space<vmem>>, vector<320x256xbf16>
    %cst = arith.constant dense<0.000000e+00> : vector<16x256xf32>
    %2 = tpu.matmul %0, %1, %cst {dimension_numbers = #tpu.dot_dimension_numbers<[1], [0], [0], [1], [0, 0, 1, 1], [], []>} : vector<16x320xbf16>, vector<320x256xbf16>, vector<16x256xf32> -> vector<16x256xf32>
    %c0_3 = arith.constant 0 : index
    %c0_4 = arith.constant 0 : index
    %3 = vector.load %arg3[%c0_3, %c0_4] : memref<1x256xf32, #tpu.memory_space<vmem>>, vector<1x256xf32>
    %4 = vector.broadcast %3 : vector<1x256xf32> to vector<16x256xf32>
    %5 = arith.addf %2, %4 : vector<16x256xf32>
    %6 = vector.extract_strided_slice %5 {offsets = [0, 0], sizes = [16, 128], strides = [1, 1]} : vector<16x256xf32> to vector<16x128xf32>
    %7 = math.tanh %6 : vector<16x128xf32>
    %8 = vector.extract_strided_slice %5 {offsets = [0, 128], sizes = [16, 128], strides = [1, 1]} : vector<16x256xf32> to vector<16x128xf32>
    %cst_5 = arith.constant 0.000000e+00 : f32
    %9 = vector.broadcast %cst_5 : f32 to vector<16x128xf32>
    %10 = arith.maximumf %8, %9 : vector<16x128xf32>
    %11 = tpu.concatenate %7, %10 in 1 : vector<16x128xf32>, vector<16x128xf32> -> vector<16x256xf32>
    %c0_6 = arith.constant 0 : index
    %c0_7 = arith.constant 0 : index
    %12 = vector.load %arg4[%c0_6, %c0_7] : memref<16x256xf32, #tpu.memory_space<vmem>>, vector<16x256xf32>
    tpu.vector_store %arg4[%c0_6, %c0_7], %11 {strides = array<i32>} : memref<16x256xf32, #tpu.memory_space<vmem>>, vector<16x256xf32>,
    return
  }
  func.func @transform_0(%arg0: i32) -> (i32, i32) {
    %c0_i32 = arith.constant 0 : i32
    %c0_i32_0 = arith.constant 0 : i32
    return %arg0, %c0_i32 : i32, i32
  }
  func.func @transform_1(%arg0: i32) -> (i32, i32) {
    %c0_i32 = arith.constant 0 : i32
    %c0_i32_0 = arith.constant 0 : i32
    %c0_i32_1 = arith.constant 0 : i32
    return %c0_i32, %c0_i32_0 : i32, i32
  }
  func.func @transform_2(%arg0: i32) -> (i32, i32) {
    %c0_i32 = arith.constant 0 : i32
    %c0_i32_0 = arith.constant 0 : i32
    %c0_i32_1 = arith.constant 0 : i32
    return %c0_i32, %c0_i32_0 : i32, i32
  }
  func.func @transform_3(%arg0: i32) -> (i32, i32) {
    %c0_i32 = arith.constant 0 : i32
    %c0_i32_0 = arith.constant 0 : i32
    return %arg0, %c0_i32 : i32, i32
  }
}

module attributes {stable_mosaic.version = 11 : i64} {
  func.func @_update_kernel(%arg0: i32, %arg1: memref<16x256xf32, #tpu.memory_space<vmem>>, %arg2: memref<16x128xf32, #tpu.memory_space<vmem>>, %arg3: memref<256x128xf32, #tpu.memory_space<vmem>>, %arg4: memref<1x128xf32, #tpu.memory_space<vmem>>, %arg5: memref<128x128xf32, #tpu.memory_space<vmem>>, %arg6: memref<1x128xf32, #tpu.memory_space<vmem>>, %arg7: memref<256x384xf32, #tpu.memory_space<vmem>>, %arg8: memref<128x384xf32, #tpu.memory_space<vmem>>, %arg9: memref<128x256xf32, #tpu.memory_space<vmem>>, %arg10: memref<1x256xf32, #tpu.memory_space<vmem>>, %arg11: memref<128x128xf32, #tpu.memory_space<vmem>>, %arg12: memref<1x128xf32, #tpu.memory_space<vmem>>, %arg13: memref<128x128xf32, #tpu.memory_space<vmem>>, %arg14: memref<1x128xf32, #tpu.memory_space<vmem>>, %arg15: memref<128x640xf32, #tpu.memory_space<vmem>>, %arg16: memref<1x640xf32, #tpu.memory_space<vmem>>, %arg17: memref<16x768xf32, #tpu.memory_space<vmem>>) attributes {dimension_semantics = [#tpu.dimension_semantics<parallel>], iteration_bounds = array<i64: 2>, scalar_prefetch = 0 : i64, scratch_operands = 0 : i64, tpu.core_type = #tpu.core_type<tc>, window_params = [{transform_indices = @transform_0, window_bounds = array<i64: 16, 256>}, {transform_indices = @transform_1, window_bounds = array<i64: 16, 128>}, {pipeline_mode = #tpu.pipeline_mode<synchronous>, transform_indices = @transform_2, window_bounds = array<i64: 256, 128>}, {pipeline_mode = #tpu.pipeline_mode<synchronous>, transform_indices = @transform_3, window_bounds = array<i64: 1, 128>}, {pipeline_mode = #tpu.pipeline_mode<synchronous>, transform_indices = @transform_4, window_bounds = array<i64: 128, 128>}, {pipeline_mode = #tpu.pipeline_mode<synchronous>, transform_indices = @transform_5, window_bounds = array<i64: 1, 128>}, {pipeline_mode = #tpu.pipeline_mode<synchronous>, transform_indices = @transform_6, window_bounds = array<i64: 256, 384>}, {pipeline_mode = #tpu.pipeline_mode<synchronous>, transform_indices = @transform_7, window_bounds = array<i64: 128, 384>}, {pipeline_mode = #tpu.pipeline_mode<synchronous>, transform_indices = @transform_8, window_bounds = array<i64: 128, 256>}, {pipeline_mode = #tpu.pipeline_mode<synchronous>, transform_indices = @transform_9, window_bounds = array<i64: 1, 256>}, {pipeline_mode = #tpu.pipeline_mode<synchronous>, transform_indices = @transform_10, window_bounds = array<i64: 128, 128>}, {pipeline_mode = #tpu.pipeline_mode<synchronous>, transform_indices = @transform_11, window_bounds = array<i64: 1, 128>}, {pipeline_mode = #tpu.pipeline_mode<synchronous>, transform_indices = @transform_12, window_bounds = array<i64: 128, 128>}, {pipeline_mode = #tpu.pipeline_mode<synchronous>, transform_indices = @transform_13, window_bounds = array<i64: 1, 128>}, {pipeline_mode = #tpu.pipeline_mode<synchronous>, transform_indices = @transform_14, window_bounds = array<i64: 128, 640>}, {pipeline_mode = #tpu.pipeline_mode<synchronous>, transform_indices = @transform_15, window_bounds = array<i64: 1, 640>}, {transform_indices = @transform_16, window_bounds = array<i64: 16, 768>}]} {
    %c0 = arith.constant 0 : index
    %c0_0 = arith.constant 0 : index
    %0 = vector.load %arg1[%c0, %c0_0] : memref<16x256xf32, #tpu.memory_space<vmem>>, vector<16x256xf32>
    %c0_1 = arith.constant 0 : index
    %c0_2 = arith.constant 0 : index
    %1 = vector.load %arg2[%c0_1, %c0_2] : memref<16x128xf32, #tpu.memory_space<vmem>>, vector<16x128xf32>
    %c0_3 = arith.constant 0 : index
    %c0_4 = arith.constant 0 : index
    %2 = vector.load %arg3[%c0_3, %c0_4] : memref<256x128xf32, #tpu.memory_space<vmem>>, vector<256x128xf32>
    %cst = arith.constant dense<0.000000e+00> : vector<16x128xf32>
    %3 = tpu.matmul %0, %2, %cst {dimension_numbers = #tpu.dot_dimension_numbers<[1], [0], [0], [1], [0, 0, 1, 1], [], []>} : vector<16x256xf32>, vector<256x128xf32>, vector<16x128xf32> -> vector<16x128xf32>
    %c0_5 = arith.constant 0 : index
    %c0_6 = arith.constant 0 : index
    %4 = vector.load %arg4[%c0_5, %c0_6] : memref<1x128xf32, #tpu.memory_space<vmem>>, vector<1x128xf32>
    %5 = vector.broadcast %4 : vector<1x128xf32> to vector<16x128xf32>
    %6 = arith.addf %3, %5 : vector<16x128xf32>
    %cst_7 = arith.constant 0.000000e+00 : f32
    %7 = vector.broadcast %cst_7 : f32 to vector<16x128xf32>
    %8 = arith.maximumf %6, %7 : vector<16x128xf32>
    %c0_8 = arith.constant 0 : index
    %c0_9 = arith.constant 0 : index
    %9 = vector.load %arg5[%c0_8, %c0_9] : memref<128x128xf32, #tpu.memory_space<vmem>>, vector<128x128xf32>
    %cst_10 = arith.constant dense<0.000000e+00> : vector<16x128xf32>
    %10 = tpu.matmul %8, %9, %cst_10 {dimension_numbers = #tpu.dot_dimension_numbers<[1], [0], [0], [1], [0, 0, 1, 1], [], []>} : vector<16x128xf32>, vector<128x128xf32>, vector<16x128xf32> -> vector<16x128xf32>
    %c0_11 = arith.constant 0 : index
    %c0_12 = arith.constant 0 : index
    %11 = vector.load %arg6[%c0_11, %c0_12] : memref<1x128xf32, #tpu.memory_space<vmem>>, vector<1x128xf32>
    %12 = vector.broadcast %11 : vector<1x128xf32> to vector<16x128xf32>
    %13 = arith.addf %10, %12 : vector<16x128xf32>
    %cst_13 = arith.constant 0.000000e+00 : f32
    %14 = vector.broadcast %cst_13 : f32 to vector<16x128xf32>
    %15 = arith.maximumf %13, %14 : vector<16x128xf32>
    %c0_14 = arith.constant 0 : index
    %c0_15 = arith.constant 0 : index
    %16 = vector.load %arg7[%c0_14, %c0_15] : memref<256x384xf32, #tpu.memory_space<vmem>>, vector<256x384xf32>
    %cst_16 = arith.constant dense<0.000000e+00> : vector<16x384xf32>
    %17 = tpu.matmul %0, %16, %cst_16 {dimension_numbers = #tpu.dot_dimension_numbers<[1], [0], [0], [1], [0, 0, 1, 1], [], []>} : vector<16x256xf32>, vector<256x384xf32>, vector<16x384xf32> -> vector<16x384xf32>
    %c0_17 = arith.constant 0 : index
    %c0_18 = arith.constant 0 : index
    %18 = vector.load %arg8[%c0_17, %c0_18] : memref<128x384xf32, #tpu.memory_space<vmem>>, vector<128x384xf32>
    %cst_19 = arith.constant dense<0.000000e+00> : vector<16x384xf32>
    %19 = tpu.matmul %15, %18, %cst_19 {dimension_numbers = #tpu.dot_dimension_numbers<[1], [0], [0], [1], [0, 0, 1, 1], [], []>} : vector<16x128xf32>, vector<128x384xf32>, vector<16x384xf32> -> vector<16x384xf32>
    %20 = arith.addf %17, %19 : vector<16x384xf32>
    %c0_20 = arith.constant 0 : index
    %c0_21 = arith.constant 0 : index
    %21 = vector.load %arg9[%c0_20, %c0_21] : memref<128x256xf32, #tpu.memory_space<vmem>>, vector<128x256xf32>
    %cst_22 = arith.constant dense<0.000000e+00> : vector<16x256xf32>
    %22 = tpu.matmul %1, %21, %cst_22 {dimension_numbers = #tpu.dot_dimension_numbers<[1], [0], [0], [1], [0, 0, 1, 1], [], []>} : vector<16x128xf32>, vector<128x256xf32>, vector<16x256xf32> -> vector<16x256xf32>
    %23 = vector.extract_strided_slice %20 {offsets = [0, 0], sizes = [16, 256], strides = [1, 1]} : vector<16x384xf32> to vector<16x256xf32>
    %24 = arith.addf %22, %23 : vector<16x256xf32>
    %c0_23 = arith.constant 0 : index
    %c0_24 = arith.constant 0 : index
    %25 = vector.load %arg10[%c0_23, %c0_24] : memref<1x256xf32, #tpu.memory_space<vmem>>, vector<1x256xf32>
    %26 = vector.broadcast %25 : vector<1x256xf32> to vector<16x256xf32>
    %27 = arith.addf %24, %26 : vector<16x256xf32>
    %28 = arith.negf %27 : vector<16x256xf32>
    %29 = math.exp %28 : vector<16x256xf32>
    %cst_25 = arith.constant 1.000000e+00 : f32
    %30 = vector.broadcast %cst_25 : f32 to vector<16x256xf32>
    %31 = arith.addf %30, %29 : vector<16x256xf32>
    %32 = arith.divf %30, %31 : vector<16x256xf32>
    %33 = vector.extract_strided_slice %32 {offsets = [0, 0], sizes = [16, 128], strides = [1, 1]} : vector<16x256xf32> to vector<16x128xf32>
    %34 = vector.extract_strided_slice %32 {offsets = [0, 128], sizes = [16, 128], strides = [1, 1]} : vector<16x256xf32> to vector<16x128xf32>
    %35 = arith.mulf %34, %1 : vector<16x128xf32>
    %c0_26 = arith.constant 0 : index
    %c0_27 = arith.constant 0 : index
    %36 = vector.load %arg11[%c0_26, %c0_27] : memref<128x128xf32, #tpu.memory_space<vmem>>, vector<128x128xf32>
    %cst_28 = arith.constant dense<0.000000e+00> : vector<16x128xf32>
    %37 = tpu.matmul %35, %36, %cst_28 {dimension_numbers = #tpu.dot_dimension_numbers<[1], [0], [0], [1], [0, 0, 1, 1], [], []>} : vector<16x128xf32>, vector<128x128xf32>, vector<16x128xf32> -> vector<16x128xf32>
    %38 = vector.extract_strided_slice %20 {offsets = [0, 256], sizes = [16, 128], strides = [1, 1]} : vector<16x384xf32> to vector<16x128xf32>
    %39 = arith.addf %37, %38 : vector<16x128xf32>
    %c0_29 = arith.constant 0 : index
    %c0_30 = arith.constant 0 : index
    %40 = vector.load %arg12[%c0_29, %c0_30] : memref<1x128xf32, #tpu.memory_space<vmem>>, vector<1x128xf32>
    %41 = vector.broadcast %40 : vector<1x128xf32> to vector<16x128xf32>
    %42 = arith.addf %39, %41 : vector<16x128xf32>
    %43 = math.tanh %42 : vector<16x128xf32>
    %cst_31 = arith.constant 1.000000e+00 : f32
    %44 = vector.broadcast %cst_31 : f32 to vector<16x128xf32>
    %45 = arith.subf %44, %33 : vector<16x128xf32>
    %46 = arith.mulf %45, %1 : vector<16x128xf32>
    %47 = arith.mulf %33, %43 : vector<16x128xf32>
    %48 = arith.addf %46, %47 : vector<16x128xf32>
    %c0_32 = arith.constant 0 : index
    %c0_33 = arith.constant 0 : index
    %49 = vector.load %arg13[%c0_32, %c0_33] : memref<128x128xf32, #tpu.memory_space<vmem>>, vector<128x128xf32>
    %cst_34 = arith.constant dense<0.000000e+00> : vector<16x128xf32>
    %50 = tpu.matmul %48, %49, %cst_34 {dimension_numbers = #tpu.dot_dimension_numbers<[1], [0], [0], [1], [0, 0, 1, 1], [], []>} : vector<16x128xf32>, vector<128x128xf32>, vector<16x128xf32> -> vector<16x128xf32>
    %c0_35 = arith.constant 0 : index
    %c0_36 = arith.constant 0 : index
    %51 = vector.load %arg14[%c0_35, %c0_36] : memref<1x128xf32, #tpu.memory_space<vmem>>, vector<1x128xf32>
    %52 = vector.broadcast %51 : vector<1x128xf32> to vector<16x128xf32>
    %53 = arith.addf %50, %52 : vector<16x128xf32>
    %cst_37 = arith.constant 0.000000e+00 : f32
    %54 = vector.broadcast %cst_37 : f32 to vector<16x128xf32>
    %55 = arith.maximumf %53, %54 : vector<16x128xf32>
    %c0_38 = arith.constant 0 : index
    %c0_39 = arith.constant 0 : index
    %56 = vector.load %arg15[%c0_38, %c0_39] : memref<128x640xf32, #tpu.memory_space<vmem>>, vector<128x640xf32>
    %cst_40 = arith.constant dense<0.000000e+00> : vector<16x640xf32>
    %57 = tpu.matmul %55, %56, %cst_40 {dimension_numbers = #tpu.dot_dimension_numbers<[1], [0], [0], [1], [0, 0, 1, 1], [], []>} : vector<16x128xf32>, vector<128x640xf32>, vector<16x640xf32> -> vector<16x640xf32>
    %c0_41 = arith.constant 0 : index
    %c0_42 = arith.constant 0 : index
    %58 = vector.load %arg16[%c0_41, %c0_42] : memref<1x640xf32, #tpu.memory_space<vmem>>, vector<1x640xf32>
    %59 = vector.broadcast %58 : vector<1x640xf32> to vector<16x640xf32>
    %60 = arith.addf %57, %59 : vector<16x640xf32>
    %c0_43 = arith.constant 0 : index
    %c0_44 = arith.constant 0 : index
    %61 = vector.load %arg17[%c0_43, %c0_44] : memref<16x768xf32, #tpu.memory_space<vmem>>, vector<16x640xf32>
    tpu.vector_store %arg17[%c0_43, %c0_44], %60 {strides = array<i32>} : memref<16x768xf32, #tpu.memory_space<vmem>>, vector<16x640xf32>,
    %c0_45 = arith.constant 0 : index
    %c640 = arith.constant 640 : index
    %62 = vector.load %arg17[%c0_45, %c640] : memref<16x768xf32, #tpu.memory_space<vmem>>, vector<16x128xf32>
    tpu.vector_store %arg17[%c0_45, %c640], %48 {strides = array<i32>} : memref<16x768xf32, #tpu.memory_space<vmem>>, vector<16x128xf32>,
    return
  }
  func.func @transform_0(%arg0: i32) -> (i32, i32) {
    %c0_i32 = arith.constant 0 : i32
    %c0_i32_0 = arith.constant 0 : i32
    return %arg0, %c0_i32 : i32, i32
  }
  func.func @transform_1(%arg0: i32) -> (i32, i32) {
    %c0_i32 = arith.constant 0 : i32
    %c0_i32_0 = arith.constant 0 : i32
    return %arg0, %c0_i32 : i32, i32
  }
  func.func @transform_2(%arg0: i32) -> (i32, i32) {
    %c0_i32 = arith.constant 0 : i32
    %c0_i32_0 = arith.constant 0 : i32
    %c0_i32_1 = arith.constant 0 : i32
    return %c0_i32, %c0_i32_0 : i32, i32
  }
  func.func @transform_3(%arg0: i32) -> (i32, i32) {
    %c0_i32 = arith.constant 0 : i32
    %c0_i32_0 = arith.constant 0 : i32
    %c0_i32_1 = arith.constant 0 : i32
    return %c0_i32, %c0_i32_0 : i32, i32
  }
  func.func @transform_4(%arg0: i32) -> (i32, i32) {
    %c0_i32 = arith.constant 0 : i32
    %c0_i32_0 = arith.constant 0 : i32
    %c0_i32_1 = arith.constant 0 : i32
    return %c0_i32, %c0_i32_0 : i32, i32
  }
  func.func @transform_5(%arg0: i32) -> (i32, i32) {
    %c0_i32 = arith.constant 0 : i32
    %c0_i32_0 = arith.constant 0 : i32
    %c0_i32_1 = arith.constant 0 : i32
    return %c0_i32, %c0_i32_0 : i32, i32
  }
  func.func @transform_6(%arg0: i32) -> (i32, i32) {
    %c0_i32 = arith.constant 0 : i32
    %c0_i32_0 = arith.constant 0 : i32
    %c0_i32_1 = arith.constant 0 : i32
    return %c0_i32, %c0_i32_0 : i32, i32
  }
  func.func @transform_7(%arg0: i32) -> (i32, i32) {
    %c0_i32 = arith.constant 0 : i32
    %c0_i32_0 = arith.constant 0 : i32
    %c0_i32_1 = arith.constant 0 : i32
    return %c0_i32, %c0_i32_0 : i32, i32
  }
  func.func @transform_8(%arg0: i32) -> (i32, i32) {
    %c0_i32 = arith.constant 0 : i32
    %c0_i32_0 = arith.constant 0 : i32
    %c0_i32_1 = arith.constant 0 : i32
    return %c0_i32, %c0_i32_0 : i32, i32
  }
  func.func @transform_9(%arg0: i32) -> (i32, i32) {
    %c0_i32 = arith.constant 0 : i32
    %c0_i32_0 = arith.constant 0 : i32
    %c0_i32_1 = arith.constant 0 : i32
    return %c0_i32, %c0_i32_0 : i32, i32
  }
  func.func @transform_10(%arg0: i32) -> (i32, i32) {
    %c0_i32 = arith.constant 0 : i32
    %c0_i32_0 = arith.constant 0 : i32
    %c0_i32_1 = arith.constant 0 : i32
    return %c0_i32, %c0_i32_0 : i32, i32
  }
  func.func @transform_11(%arg0: i32) -> (i32, i32) {
    %c0_i32 = arith.constant 0 : i32
    %c0_i32_0 = arith.constant 0 : i32
    %c0_i32_1 = arith.constant 0 : i32
    return %c0_i32, %c0_i32_0 : i32, i32
  }
  func.func @transform_12(%arg0: i32) -> (i32, i32) {
    %c0_i32 = arith.constant 0 : i32
    %c0_i32_0 = arith.constant 0 : i32
    %c0_i32_1 = arith.constant 0 : i32
    return %c0_i32, %c0_i32_0 : i32, i32
  }
  func.func @transform_13(%arg0: i32) -> (i32, i32) {
    %c0_i32 = arith.constant 0 : i32
    %c0_i32_0 = arith.constant 0 : i32
    %c0_i32_1 = arith.constant 0 : i32
    return %c0_i32, %c0_i32_0 : i32, i32
  }
  func.func @transform_14(%arg0: i32) -> (i32, i32) {
    %c0_i32 = arith.constant 0 : i32
    %c0_i32_0 = arith.constant 0 : i32
    %c0_i32_1 = arith.constant 0 : i32
    return %c0_i32, %c0_i32_0 : i32, i32
  }
  func.func @transform_15(%arg0: i32) -> (i32, i32) {
    %c0_i32 = arith.constant 0 : i32
    %c0_i32_0 = arith.constant 0 : i32
    %c0_i32_1 = arith.constant 0 : i32
    return %c0_i32, %c0_i32_0 : i32, i32
  }
  func.func @transform_16(%arg0: i32) -> (i32, i32) {
    %c0_i32 = arith.constant 0 : i32
    %c0_i32_0 = arith.constant 0 : i32
    return %arg0, %c0_i32 : i32, i32
  }
}

module attributes {stable_mosaic.version = 11 : i64} {
  func.func @_upsample_kernel(%arg0: i32, %arg1: memref<16x576xf32, #tpu.memory_space<vmem>>, %arg2: memref<16x36xf32, #tpu.memory_space<vmem>>, %arg3: memref<16x256xf32, #tpu.memory_space<vmem>>) attributes {dimension_semantics = [#tpu.dimension_semantics<parallel>], iteration_bounds = array<i64: 2>, scalar_prefetch = 0 : i64, scratch_operands = 0 : i64, tpu.core_type = #tpu.core_type<tc>, window_params = [{transform_indices = @transform_0, window_bounds = array<i64: 16, 576>}, {transform_indices = @transform_1, window_bounds = array<i64: 16, 36>}, {transform_indices = @transform_2, window_bounds = array<i64: 16, 256>}]} {
    %c0 = arith.constant 0 : index
    %c0_0 = arith.constant 0 : index
    %0 = vector.load %arg1[%c0, %c0_0] : memref<16x576xf32, #tpu.memory_space<vmem>>, vector<16x576xf32>
    %c0_1 = arith.constant 0 : index
    %c0_2 = arith.constant 0 : index
    %1 = vector.load %arg2[%c0_1, %c0_2] : memref<16x36xf32, #tpu.memory_space<vmem>>, vector<16x36xf32>
    %2 = vector.extract_strided_slice %0 {offsets = [0, 0], sizes = [16, 64], strides = [1, 1]} : vector<16x576xf32> to vector<16x64xf32>
    %3 = vector.extract_strided_slice %0 {offsets = [0, 64], sizes = [16, 64], strides = [1, 1]} : vector<16x576xf32> to vector<16x64xf32>
    %4 = arith.maximumf %2, %3 : vector<16x64xf32>
    %5 = vector.extract_strided_slice %0 {offsets = [0, 128], sizes = [16, 64], strides = [1, 1]} : vector<16x576xf32> to vector<16x64xf32>
    %6 = arith.maximumf %4, %5 : vector<16x64xf32>
    %7 = vector.extract_strided_slice %0 {offsets = [0, 192], sizes = [16, 64], strides = [1, 1]} : vector<16x576xf32> to vector<16x64xf32>
    %8 = arith.maximumf %6, %7 : vector<16x64xf32>
    %9 = vector.extract_strided_slice %0 {offsets = [0, 256], sizes = [16, 64], strides = [1, 1]} : vector<16x576xf32> to vector<16x64xf32>
    %10 = arith.maximumf %8, %9 : vector<16x64xf32>
    %11 = vector.extract_strided_slice %0 {offsets = [0, 320], sizes = [16, 64], strides = [1, 1]} : vector<16x576xf32> to vector<16x64xf32>
    %12 = arith.maximumf %10, %11 : vector<16x64xf32>
    %13 = vector.extract_strided_slice %0 {offsets = [0, 384], sizes = [16, 64], strides = [1, 1]} : vector<16x576xf32> to vector<16x64xf32>
    %14 = arith.maximumf %12, %13 : vector<16x64xf32>
    %15 = vector.extract_strided_slice %0 {offsets = [0, 448], sizes = [16, 64], strides = [1, 1]} : vector<16x576xf32> to vector<16x64xf32>
    %16 = arith.maximumf %14, %15 : vector<16x64xf32>
    %17 = vector.extract_strided_slice %0 {offsets = [0, 512], sizes = [16, 64], strides = [1, 1]} : vector<16x576xf32> to vector<16x64xf32>
    %18 = arith.maximumf %16, %17 : vector<16x64xf32>
    %cst = arith.constant 0.000000e+00 : f32
    %19 = vector.broadcast %cst : f32 to vector<16x64xf32>
    %cst_3 = arith.constant 0.000000e+00 : f32
    %20 = vector.broadcast %cst_3 : f32 to vector<16x64xf32>
    %cst_4 = arith.constant 0.000000e+00 : f32
    %21 = vector.broadcast %cst_4 : f32 to vector<16x64xf32>
    %cst_5 = arith.constant 0.000000e+00 : f32
    %22 = vector.broadcast %cst_5 : f32 to vector<16x64xf32>
    %cst_6 = arith.constant 0.000000e+00 : f32
    %23 = vector.broadcast %cst_6 : f32 to vector<16x64xf32>
    %24 = vector.extract_strided_slice %0 {offsets = [0, 0], sizes = [16, 64], strides = [1, 1]} : vector<16x576xf32> to vector<16x64xf32>
    %25 = arith.subf %24, %18 : vector<16x64xf32>
    %26 = math.exp %25 : vector<16x64xf32>
    %27 = arith.addf %19, %26 : vector<16x64xf32>
    %28 = vector.extract_strided_slice %1 {offsets = [0, 0], sizes = [16, 1], strides = [1, 1]} : vector<16x36xf32> to vector<16x1xf32>
    %29 = vector.broadcast %28 : vector<16x1xf32> to vector<16x64xf32>
    %30 = arith.mulf %26, %29 : vector<16x64xf32>
    %31 = arith.addf %20, %30 : vector<16x64xf32>
    %32 = vector.extract_strided_slice %1 {offsets = [0, 1], sizes = [16, 1], strides = [1, 1]} : vector<16x36xf32> to vector<16x1xf32>
    %33 = vector.broadcast %32 : vector<16x1xf32> to vector<16x64xf32>
    %34 = arith.mulf %26, %33 : vector<16x64xf32>
    %35 = arith.addf %21, %34 : vector<16x64xf32>
    %36 = vector.extract_strided_slice %1 {offsets = [0, 2], sizes = [16, 1], strides = [1, 1]} : vector<16x36xf32> to vector<16x1xf32>
    %37 = vector.broadcast %36 : vector<16x1xf32> to vector<16x64xf32>
    %38 = arith.mulf %26, %37 : vector<16x64xf32>
    %39 = arith.addf %22, %38 : vector<16x64xf32>
    %40 = vector.extract_strided_slice %1 {offsets = [0, 3], sizes = [16, 1], strides = [1, 1]} : vector<16x36xf32> to vector<16x1xf32>
    %41 = vector.broadcast %40 : vector<16x1xf32> to vector<16x64xf32>
    %42 = arith.mulf %26, %41 : vector<16x64xf32>
    %43 = arith.addf %23, %42 : vector<16x64xf32>
    %44 = vector.extract_strided_slice %0 {offsets = [0, 64], sizes = [16, 64], strides = [1, 1]} : vector<16x576xf32> to vector<16x64xf32>
    %45 = arith.subf %44, %18 : vector<16x64xf32>
    %46 = math.exp %45 : vector<16x64xf32>
    %47 = arith.addf %27, %46 : vector<16x64xf32>
    %48 = vector.extract_strided_slice %1 {offsets = [0, 4], sizes = [16, 1], strides = [1, 1]} : vector<16x36xf32> to vector<16x1xf32>
    %49 = vector.broadcast %48 : vector<16x1xf32> to vector<16x64xf32>
    %50 = arith.mulf %46, %49 : vector<16x64xf32>
    %51 = arith.addf %31, %50 : vector<16x64xf32>
    %52 = vector.extract_strided_slice %1 {offsets = [0, 5], sizes = [16, 1], strides = [1, 1]} : vector<16x36xf32> to vector<16x1xf32>
    %53 = vector.broadcast %52 : vector<16x1xf32> to vector<16x64xf32>
    %54 = arith.mulf %46, %53 : vector<16x64xf32>
    %55 = arith.addf %35, %54 : vector<16x64xf32>
    %56 = vector.extract_strided_slice %1 {offsets = [0, 6], sizes = [16, 1], strides = [1, 1]} : vector<16x36xf32> to vector<16x1xf32>
    %57 = vector.broadcast %56 : vector<16x1xf32> to vector<16x64xf32>
    %58 = arith.mulf %46, %57 : vector<16x64xf32>
    %59 = arith.addf %39, %58 : vector<16x64xf32>
    %60 = vector.extract_strided_slice %1 {offsets = [0, 7], sizes = [16, 1], strides = [1, 1]} : vector<16x36xf32> to vector<16x1xf32>
    %61 = vector.broadcast %60 : vector<16x1xf32> to vector<16x64xf32>
    %62 = arith.mulf %46, %61 : vector<16x64xf32>
    %63 = arith.addf %43, %62 : vector<16x64xf32>
    %64 = vector.extract_strided_slice %0 {offsets = [0, 128], sizes = [16, 64], strides = [1, 1]} : vector<16x576xf32> to vector<16x64xf32>
    %65 = arith.subf %64, %18 : vector<16x64xf32>
    %66 = math.exp %65 : vector<16x64xf32>
    %67 = arith.addf %47, %66 : vector<16x64xf32>
    %68 = vector.extract_strided_slice %1 {offsets = [0, 8], sizes = [16, 1], strides = [1, 1]} : vector<16x36xf32> to vector<16x1xf32>
    %69 = vector.broadcast %68 : vector<16x1xf32> to vector<16x64xf32>
    %70 = arith.mulf %66, %69 : vector<16x64xf32>
    %71 = arith.addf %51, %70 : vector<16x64xf32>
    %72 = vector.extract_strided_slice %1 {offsets = [0, 9], sizes = [16, 1], strides = [1, 1]} : vector<16x36xf32> to vector<16x1xf32>
    %73 = vector.broadcast %72 : vector<16x1xf32> to vector<16x64xf32>
    %74 = arith.mulf %66, %73 : vector<16x64xf32>
    %75 = arith.addf %55, %74 : vector<16x64xf32>
    %76 = vector.extract_strided_slice %1 {offsets = [0, 10], sizes = [16, 1], strides = [1, 1]} : vector<16x36xf32> to vector<16x1xf32>
    %77 = vector.broadcast %76 : vector<16x1xf32> to vector<16x64xf32>
    %78 = arith.mulf %66, %77 : vector<16x64xf32>
    %79 = arith.addf %59, %78 : vector<16x64xf32>
    %80 = vector.extract_strided_slice %1 {offsets = [0, 11], sizes = [16, 1], strides = [1, 1]} : vector<16x36xf32> to vector<16x1xf32>
    %81 = vector.broadcast %80 : vector<16x1xf32> to vector<16x64xf32>
    %82 = arith.mulf %66, %81 : vector<16x64xf32>
    %83 = arith.addf %63, %82 : vector<16x64xf32>
    %84 = vector.extract_strided_slice %0 {offsets = [0, 192], sizes = [16, 64], strides = [1, 1]} : vector<16x576xf32> to vector<16x64xf32>
    %85 = arith.subf %84, %18 : vector<16x64xf32>
    %86 = math.exp %85 : vector<16x64xf32>
    %87 = arith.addf %67, %86 : vector<16x64xf32>
    %88 = vector.extract_strided_slice %1 {offsets = [0, 12], sizes = [16, 1], strides = [1, 1]} : vector<16x36xf32> to vector<16x1xf32>
    %89 = vector.broadcast %88 : vector<16x1xf32> to vector<16x64xf32>
    %90 = arith.mulf %86, %89 : vector<16x64xf32>
    %91 = arith.addf %71, %90 : vector<16x64xf32>
    %92 = vector.extract_strided_slice %1 {offsets = [0, 13], sizes = [16, 1], strides = [1, 1]} : vector<16x36xf32> to vector<16x1xf32>
    %93 = vector.broadcast %92 : vector<16x1xf32> to vector<16x64xf32>
    %94 = arith.mulf %86, %93 : vector<16x64xf32>
    %95 = arith.addf %75, %94 : vector<16x64xf32>
    %96 = vector.extract_strided_slice %1 {offsets = [0, 14], sizes = [16, 1], strides = [1, 1]} : vector<16x36xf32> to vector<16x1xf32>
    %97 = vector.broadcast %96 : vector<16x1xf32> to vector<16x64xf32>
    %98 = arith.mulf %86, %97 : vector<16x64xf32>
    %99 = arith.addf %79, %98 : vector<16x64xf32>
    %100 = vector.extract_strided_slice %1 {offsets = [0, 15], sizes = [16, 1], strides = [1, 1]} : vector<16x36xf32> to vector<16x1xf32>
    %101 = vector.broadcast %100 : vector<16x1xf32> to vector<16x64xf32>
    %102 = arith.mulf %86, %101 : vector<16x64xf32>
    %103 = arith.addf %83, %102 : vector<16x64xf32>
    %104 = vector.extract_strided_slice %0 {offsets = [0, 256], sizes = [16, 64], strides = [1, 1]} : vector<16x576xf32> to vector<16x64xf32>
    %105 = arith.subf %104, %18 : vector<16x64xf32>
    %106 = math.exp %105 : vector<16x64xf32>
    %107 = arith.addf %87, %106 : vector<16x64xf32>
    %108 = vector.extract_strided_slice %1 {offsets = [0, 16], sizes = [16, 1], strides = [1, 1]} : vector<16x36xf32> to vector<16x1xf32>
    %109 = vector.broadcast %108 : vector<16x1xf32> to vector<16x64xf32>
    %110 = arith.mulf %106, %109 : vector<16x64xf32>
    %111 = arith.addf %91, %110 : vector<16x64xf32>
    %112 = vector.extract_strided_slice %1 {offsets = [0, 17], sizes = [16, 1], strides = [1, 1]} : vector<16x36xf32> to vector<16x1xf32>
    %113 = vector.broadcast %112 : vector<16x1xf32> to vector<16x64xf32>
    %114 = arith.mulf %106, %113 : vector<16x64xf32>
    %115 = arith.addf %95, %114 : vector<16x64xf32>
    %116 = vector.extract_strided_slice %1 {offsets = [0, 18], sizes = [16, 1], strides = [1, 1]} : vector<16x36xf32> to vector<16x1xf32>
    %117 = vector.broadcast %116 : vector<16x1xf32> to vector<16x64xf32>
    %118 = arith.mulf %106, %117 : vector<16x64xf32>
    %119 = arith.addf %99, %118 : vector<16x64xf32>
    %120 = vector.extract_strided_slice %1 {offsets = [0, 19], sizes = [16, 1], strides = [1, 1]} : vector<16x36xf32> to vector<16x1xf32>
    %121 = vector.broadcast %120 : vector<16x1xf32> to vector<16x64xf32>
    %122 = arith.mulf %106, %121 : vector<16x64xf32>
    %123 = arith.addf %103, %122 : vector<16x64xf32>
    %124 = vector.extract_strided_slice %0 {offsets = [0, 320], sizes = [16, 64], strides = [1, 1]} : vector<16x576xf32> to vector<16x64xf32>
    %125 = arith.subf %124, %18 : vector<16x64xf32>
    %126 = math.exp %125 : vector<16x64xf32>
    %127 = arith.addf %107, %126 : vector<16x64xf32>
    %128 = vector.extract_strided_slice %1 {offsets = [0, 20], sizes = [16, 1], strides = [1, 1]} : vector<16x36xf32> to vector<16x1xf32>
    %129 = vector.broadcast %128 : vector<16x1xf32> to vector<16x64xf32>
    %130 = arith.mulf %126, %129 : vector<16x64xf32>
    %131 = arith.addf %111, %130 : vector<16x64xf32>
    %132 = vector.extract_strided_slice %1 {offsets = [0, 21], sizes = [16, 1], strides = [1, 1]} : vector<16x36xf32> to vector<16x1xf32>
    %133 = vector.broadcast %132 : vector<16x1xf32> to vector<16x64xf32>
    %134 = arith.mulf %126, %133 : vector<16x64xf32>
    %135 = arith.addf %115, %134 : vector<16x64xf32>
    %136 = vector.extract_strided_slice %1 {offsets = [0, 22], sizes = [16, 1], strides = [1, 1]} : vector<16x36xf32> to vector<16x1xf32>
    %137 = vector.broadcast %136 : vector<16x1xf32> to vector<16x64xf32>
    %138 = arith.mulf %126, %137 : vector<16x64xf32>
    %139 = arith.addf %119, %138 : vector<16x64xf32>
    %140 = vector.extract_strided_slice %1 {offsets = [0, 23], sizes = [16, 1], strides = [1, 1]} : vector<16x36xf32> to vector<16x1xf32>
    %141 = vector.broadcast %140 : vector<16x1xf32> to vector<16x64xf32>
    %142 = arith.mulf %126, %141 : vector<16x64xf32>
    %143 = arith.addf %123, %142 : vector<16x64xf32>
    %144 = vector.extract_strided_slice %0 {offsets = [0, 384], sizes = [16, 64], strides = [1, 1]} : vector<16x576xf32> to vector<16x64xf32>
    %145 = arith.subf %144, %18 : vector<16x64xf32>
    %146 = math.exp %145 : vector<16x64xf32>
    %147 = arith.addf %127, %146 : vector<16x64xf32>
    %148 = vector.extract_strided_slice %1 {offsets = [0, 24], sizes = [16, 1], strides = [1, 1]} : vector<16x36xf32> to vector<16x1xf32>
    %149 = vector.broadcast %148 : vector<16x1xf32> to vector<16x64xf32>
    %150 = arith.mulf %146, %149 : vector<16x64xf32>
    %151 = arith.addf %131, %150 : vector<16x64xf32>
    %152 = vector.extract_strided_slice %1 {offsets = [0, 25], sizes = [16, 1], strides = [1, 1]} : vector<16x36xf32> to vector<16x1xf32>
    %153 = vector.broadcast %152 : vector<16x1xf32> to vector<16x64xf32>
    %154 = arith.mulf %146, %153 : vector<16x64xf32>
    %155 = arith.addf %135, %154 : vector<16x64xf32>
    %156 = vector.extract_strided_slice %1 {offsets = [0, 26], sizes = [16, 1], strides = [1, 1]} : vector<16x36xf32> to vector<16x1xf32>
    %157 = vector.broadcast %156 : vector<16x1xf32> to vector<16x64xf32>
    %158 = arith.mulf %146, %157 : vector<16x64xf32>
    %159 = arith.addf %139, %158 : vector<16x64xf32>
    %160 = vector.extract_strided_slice %1 {offsets = [0, 27], sizes = [16, 1], strides = [1, 1]} : vector<16x36xf32> to vector<16x1xf32>
    %161 = vector.broadcast %160 : vector<16x1xf32> to vector<16x64xf32>
    %162 = arith.mulf %146, %161 : vector<16x64xf32>
    %163 = arith.addf %143, %162 : vector<16x64xf32>
    %164 = vector.extract_strided_slice %0 {offsets = [0, 448], sizes = [16, 64], strides = [1, 1]} : vector<16x576xf32> to vector<16x64xf32>
    %165 = arith.subf %164, %18 : vector<16x64xf32>
    %166 = math.exp %165 : vector<16x64xf32>
    %167 = arith.addf %147, %166 : vector<16x64xf32>
    %168 = vector.extract_strided_slice %1 {offsets = [0, 28], sizes = [16, 1], strides = [1, 1]} : vector<16x36xf32> to vector<16x1xf32>
    %169 = vector.broadcast %168 : vector<16x1xf32> to vector<16x64xf32>
    %170 = arith.mulf %166, %169 : vector<16x64xf32>
    %171 = arith.addf %151, %170 : vector<16x64xf32>
    %172 = vector.extract_strided_slice %1 {offsets = [0, 29], sizes = [16, 1], strides = [1, 1]} : vector<16x36xf32> to vector<16x1xf32>
    %173 = vector.broadcast %172 : vector<16x1xf32> to vector<16x64xf32>
    %174 = arith.mulf %166, %173 : vector<16x64xf32>
    %175 = arith.addf %155, %174 : vector<16x64xf32>
    %176 = vector.extract_strided_slice %1 {offsets = [0, 30], sizes = [16, 1], strides = [1, 1]} : vector<16x36xf32> to vector<16x1xf32>
    %177 = vector.broadcast %176 : vector<16x1xf32> to vector<16x64xf32>
    %178 = arith.mulf %166, %177 : vector<16x64xf32>
    %179 = arith.addf %159, %178 : vector<16x64xf32>
    %180 = vector.extract_strided_slice %1 {offsets = [0, 31], sizes = [16, 1], strides = [1, 1]} : vector<16x36xf32> to vector<16x1xf32>
    %181 = vector.broadcast %180 : vector<16x1xf32> to vector<16x64xf32>
    %182 = arith.mulf %166, %181 : vector<16x64xf32>
    %183 = arith.addf %163, %182 : vector<16x64xf32>
    %184 = vector.extract_strided_slice %0 {offsets = [0, 512], sizes = [16, 64], strides = [1, 1]} : vector<16x576xf32> to vector<16x64xf32>
    %185 = arith.subf %184, %18 : vector<16x64xf32>
    %186 = math.exp %185 : vector<16x64xf32>
    %187 = arith.addf %167, %186 : vector<16x64xf32>
    %188 = vector.extract_strided_slice %1 {offsets = [0, 32], sizes = [16, 1], strides = [1, 1]} : vector<16x36xf32> to vector<16x1xf32>
    %189 = vector.broadcast %188 : vector<16x1xf32> to vector<16x64xf32>
    %190 = arith.mulf %186, %189 : vector<16x64xf32>
    %191 = arith.addf %171, %190 : vector<16x64xf32>
    %192 = vector.extract_strided_slice %1 {offsets = [0, 33], sizes = [16, 1], strides = [1, 1]} : vector<16x36xf32> to vector<16x1xf32>
    %193 = vector.broadcast %192 : vector<16x1xf32> to vector<16x64xf32>
    %194 = arith.mulf %186, %193 : vector<16x64xf32>
    %195 = arith.addf %175, %194 : vector<16x64xf32>
    %196 = vector.extract_strided_slice %1 {offsets = [0, 34], sizes = [16, 1], strides = [1, 1]} : vector<16x36xf32> to vector<16x1xf32>
    %197 = vector.broadcast %196 : vector<16x1xf32> to vector<16x64xf32>
    %198 = arith.mulf %186, %197 : vector<16x64xf32>
    %199 = arith.addf %179, %198 : vector<16x64xf32>
    %200 = vector.extract_strided_slice %1 {offsets = [0, 35], sizes = [16, 1], strides = [1, 1]} : vector<16x36xf32> to vector<16x1xf32>
    %201 = vector.broadcast %200 : vector<16x1xf32> to vector<16x64xf32>
    %202 = arith.mulf %186, %201 : vector<16x64xf32>
    %203 = arith.addf %183, %202 : vector<16x64xf32>
    %204 = tpu.reciprocal %187 {approx = true} : vector<16x64xf32> -> vector<16x64xf32>
    %205 = arith.mulf %191, %204 : vector<16x64xf32>
    %206 = arith.mulf %195, %204 : vector<16x64xf32>
    %207 = arith.mulf %199, %204 : vector<16x64xf32>
    %208 = arith.mulf %203, %204 : vector<16x64xf32>
    %209 = tpu.concatenate %205, %206, %207, %208 in 1 : vector<16x64xf32>, vector<16x64xf32>, vector<16x64xf32>, vector<16x64xf32> -> vector<16x256xf32>
    %c0_7 = arith.constant 0 : index
    %c0_8 = arith.constant 0 : index
    %210 = vector.load %arg3[%c0_7, %c0_8] : memref<16x256xf32, #tpu.memory_space<vmem>>, vector<16x256xf32>
    tpu.vector_store %arg3[%c0_7, %c0_8], %209 {strides = array<i32>} : memref<16x256xf32, #tpu.memory_space<vmem>>, vector<16x256xf32>,
    return
  }
  func.func @transform_0(%arg0: i32) -> (i32, i32) {
    %c0_i32 = arith.constant 0 : i32
    %c0_i32_0 = arith.constant 0 : i32
    return %arg0, %c0_i32 : i32, i32
  }
  func.func @transform_1(%arg0: i32) -> (i32, i32) {
    %c0_i32 = arith.constant 0 : i32
    %c0_i32_0 = arith.constant 0 : i32
    return %arg0, %c0_i32 : i32, i32
  }
  func.func @transform_2(%arg0: i32) -> (i32, i32) {
    %c0_i32 = arith.constant 0 : i32
    %c0_i32_0 = arith.constant 0 : i32
    return %arg0, %c0_i32 : i32, i32
  }
}

</mosaic_0001>

<bundles_post_ra>
// kernel: raft_spline_forward.28
= control target key start
LH: loop header
LB: loop body
LE: loop exit
PB: predicated region body
PF: predicated region fallthrough
CT: control target
= control target key end

     0   :  { %s532_s9 = smov 0   ;;  %s534_s10 = smov 0   ;;  %s568_s0 = inlined_call_operand.vmem [shape: bf16[4,16,32], index: 0, kind: input, shape index: {}]   ;;  %s569_s1 = inlined_call_operand.vmem [shape: bf16[4,32,16], index: 1, kind: input, shape index: {}]   ;;  %s570_s2 = inlined_call_operand.vmem [shape: bf16[4,16,16], index: 2, kind: output, shape index: {}]  }
   0x1   :  { %s536_s11 = smov 0  }
   0x2 LB: > { %s31_s12 = sadd.s32 1, %s509_s10  ;;  %p431_p0 = scmp.ge.s32.totalorder %s513_s11, 1  ;;  %s513_s11 = sphi %s536_s11, %s12_s11   ;;  %s509_s10 = sphi %s534_s10, %s572_s10   ;;  %s505_s9 = sphi %s532_s9, %s571_s9  }
   0x3   : > { %p33_p1 = scmp.ge.s32.totalorder %s31_s12, 4  ;;  %p157_p2 = scmp.lt.s32.totalorder %s513_s11, 5 }
   0x5   : > { %s574_s12 = smov (%p33_p1, %s31_s12), 0  ;;  %p158_p3 = pnand %p431_p0, %p157_p2 }
   0x6   : > { %p199_p4 = scmp.lt.s32.totalorder (!%p158_p3), %s505_s9, 3 }
   0x7   : > { %161 = sbr.rel (%p158_p3) target bundleno = 223 (0xdf), region = 28 }
   0xc   : > { %v515_v0 = vmov 0.0   ;;  %vm516_vm0 = vmmov 0   ;;  %s576_s9 = smov (!%p199_p4, %s505_s9), 3  ;;  %vm253_vm1 = vcmask 261120   ;;  %vm306_vm2 = vcmask 125952  }
   0xd   : > { %454 = vmatprep.subr.bf16.mxu0 %v515_v0  ;;  %458 = vmatprep.mubr.msk.bf16.mxu0 %vm516_vm0, %v515_v0  ;;  %s447_s13 = sshll.u32 %s576_s9, 4  ;;  %s446_s14 = sshll.u32 %s576_s9, 3 }
   0xe   : > { %s215_s17 = scalar_lea.vmem %s569_s1, %s447_s13  ;;  %s206_s20 = scalar_lea.vmem %s568_s0, %s446_s14 }
   0xf   : > { %v488_v1 = vld [vmem:[%s215_s17 + $0x8] sm:$0xff]   ;;  %v489_v2 = vld [vmem:[%s215_s17] sm:$0xff]   ;;  %s227_s23 = scalar_lea.vmem %s570_s2, %s446_s14 }
  0x10   : > { %455 = vmatpush3.bf16.msra.mxu0 %v488_v1  ;;  %v490_v3 = vld [vmem:[%s206_s20] sm:$0xff]  }
  0x11   : > { %456 = vmatprep.subr.bf16.mxu0 %v515_v0 }
  0x14   : > { %457 = vmatpush3.bf16.msra.mxu0 %v489_v2 }
  0x17   : > { %459 = vmatmul.mubr.msk.bf16.vlgmr.msra.gmra.mxu0 %vm253_vm1, %v490_v3 }
  0xd7   : > { %v291_v4 = vpop.f32.mrf.mxu0 }
  0xd8   : > { %v449_v5 = vpack.c.bf16 %v291_v4, %v291_v4 }
  0xd9   : > { %v460_v6 = vpop.f32.mrf.mxu0 }
  0xda   : > { %307 = vst.msk [vmem:[%s227_s23] sm:$0xf] %vm306_vm2, %v449_v5 }
  0xdb   : > { %v294_v7 = vpop.f32.mrf.mxu0 }
  0xdc   : > { %v450_v8 = vpack.c.bf16 %v294_v7, %v294_v7 }
  0xdd   : > { %v461_v9 = vpop.f32.mrf.mxu0 }
  0xde   : > { %308 = vst.msk [vmem:[%s227_s23 + $0x4] sm:$0xf] %vm306_vm2, %v450_v8 }
  0xdf PF: > { %s12_s11 = sadd.s32 1, %s513_s11   ;;  %s571_s9 = smov %s509_s10 }
  0xe0   : > { %p9_p5 = scmp.ge.s32.totalorder %s12_s11, 6   ;;  %s572_s10 = smov %s574_s12 }
  0xe2   :  { %11 = sbr.rel (!%p9_p5) target bundleno = 2 (0x2), region = 61 }

// kernel: raft_spline_forward.27
= control target key start
LH: loop header
LB: loop body
LE: loop exit
PB: predicated region body
PF: predicated region fallthrough
CT: control target
= control target key end

     0   :  { %s620_s12 = smov 0   ;;  %s709_s0 = inlined_call_operand.vmem [shape: bf16[96,256], index: 0, kind: input, shape index: {}]   ;;  %s710_s1 = inlined_call_operand.vmem [shape: bf16[256,32], index: 1, kind: input, shape index: {}]   ;;  %s711_s2 = inlined_call_operand.vmem [shape: f32[1,32], index: 2, kind: input, shape index: {}]   ;;  %s712_s3 = inlined_call_operand.vmem [shape: f32[96,32], index: 3, kind: output, shape index: {}]  }
   0x1 LB: > { %s475_s13 = sadd.s32 4294967295, %s598_s12   ;;  %p479_p0 = scmp.ge.s32.totalorder %s598_s12, 1  ;;  %s598_s12 = sphi %s620_s12, %s13_s12  }
   0x2   : > { %p139_p1 = scmp.lt.s32.totalorder %s598_s12, 3 }
   0x4   : > { %p140_p2 = pnand %p479_p0, %p139_p1 }
   0x5   : > { %s164_s16 = smul.u32 (!%p140_p2), 6, %s475_s13 }
   0x6   : > { %143 = sbr.rel (%p140_p2) target bundleno = 258 (0x102), region = 32 }
   0x7   : > { %p165_p3 = scmp.lt.s32.totalorder (!%p140_p2), %s164_s16, 11 }
   0xb   : > { %v567_v0 = vld [vmem:[%s710_s1 + $0x78] sm:$0xff]   ;;  %v569_v2 = vld [vmem:[%s710_s1 + $0x70] sm:$0xff]   ;;  %v571_v4 = vld [vmem:[%s710_s1 + $0x68] sm:$0xff]   ;;  %s714_s16 = smov (!%p165_p3, %s164_s16), 11  ;;  %vm412_vm0 = vcmask 261120  }
   0xc   : > { %v568_v1 = vld [vmem:[%s710_s1 + $0x38] sm:$0xff]   ;;  %543 = vmatprep.subr.bf16.mxu1 %v567_v0  ;;  %509 = vmatprep.subr.bf16.mxu0 %v567_v0  ;;  %v570_v3 = vld [vmem:[%s710_s1 + $0x30] sm:$0xff]   ;;  %v572_v5 = vld [vmem:[%s710_s1 + $0x28] sm:$0xff]   ;;  %s508_s4 = sshll.u32 %s714_s16, 3 }
   0xd   : > { %551 = vmatpush3.bf16.msra.mxu1 %v568_v1  ;;  %510 = vmatpush3.bf16.msra.mxu0 %v568_v1  ;;  %v573_v6 = vld [vmem:[%s710_s1 + $0x60] sm:$0xff]   ;;  %v575_v8 = vld [vmem:[%s710_s1 + $0x58] sm:$0xff]   ;;  %s663_s9 = scalar_lea.vmem %s709_s0, %s508_s4  ;;  %v577_v10 = vld [vmem:[%s710_s1 + $0x50] sm:$0xff]   ;;  %s175_s30 = scalar_lea.vmem %s712_s3, %s508_s4 }
   0xe   : > { %544 = vmatprep.subr.bf16.mxu1 %v569_v2  ;;  %511 = vmatprep.subr.bf16.mxu0 %v569_v2  ;;  %v574_v7 = vld [vmem:[%s710_s1 + $0x20] sm:$0xff]   ;;  %v576_v9 = vld [vmem:[%s710_s1 + $0x18] sm:$0xff]   ;;  %v578_v13 = vld [vmem:[%s710_s1 + $0x10] sm:$0xff]  }
   0xf   : > { %v585_v11 = vld [vmem:[%s663_s9 + $0x14] ss:$8 sps:$4 sm:$0xff]   ;;  %v588_v12 = vld [vmem:[%s663_s9 + $0x4] ss:$8 sps:$4 sm:$0xff]   ;;  %v583_v18 = vld [vmem:[%s663_s9 + $0x10] ss:$8 sps:$4 sm:$0xff]  }
  0x10   : > { %v579_v14 = vld [vmem:[%s710_s1 + $0x48] sm:$0xff]   ;;  %389 = vmatprep.mubr.bf16.mxu1 %v585_v11  ;;  %381 = vmatprep.mubr.bf16.mxu0 %v588_v12  ;;  %v581_v16 = vld [vmem:[%s710_s1 + $0x40] sm:$0xff]  }
  0x11   : > { %552 = vmatpush3.bf16.msra.mxu1 %v570_v3  ;;  %512 = vmatpush3.bf16.msra.mxu0 %v570_v3  ;;  %v580_v15 = vld [vmem:[%s710_s1 + $0x8] sm:$0xff]   ;;  %v582_v17 = vld [vmem:[%s710_s1] sm:$0xff]  }
  0x12   : > { %545 = vmatprep.subr.bf16.mxu1 %v571_v4  ;;  %513 = vmatprep.subr.bf16.mxu0 %v571_v4  ;;  %v586_v19 = vld [vmem:[%s663_s9] ss:$8 sps:$4 sm:$0xff]   ;;  %v589_v20 = vld [vmem:[%s663_s9 + $0x24] ss:$8 sps:$4 sm:$0xff]  }
  0x13   : > { %v591_v21 = vld [vmem:[%s663_s9 + $0x20] ss:$8 sps:$4 sm:$0xff]  }
  0x14   : > { %v483_v24 = vld [vmem:[%s711_s2] ss:$0 sm:$0xff] }
  0x15   : > { %553 = vmatpush3.bf16.msra.mxu1 %v572_v5  ;;  %514 = vmatpush3.bf16.msra.mxu0 %v572_v5 }
  0x16   : > { %546 = vmatprep.subr.bf16.mxu1 %v573_v6  ;;  %515 = vmatprep.subr.bf16.mxu0 %v573_v6 }
  0x19   : > { %554 = vmatpush3.bf16.msra.mxu1 %v574_v7  ;;  %516 = vmatpush3.bf16.msra.mxu0 %v574_v7 }
  0x1a   : > { %547 = vmatprep.subr.bf16.mxu1 %v575_v8  ;;  %517 = vmatprep.subr.bf16.mxu0 %v575_v8 }
  0x1d   : > { %555 = vmatpush3.bf16.msra.mxu1 %v576_v9  ;;  %518 = vmatpush3.bf16.msra.mxu0 %v576_v9 }
  0x1e   : > { %548 = vmatprep.subr.bf16.mxu1 %v577_v10  ;;  %519 = vmatprep.subr.bf16.mxu0 %v577_v10 }
  0x21   : > { %556 = vmatpush3.bf16.msra.mxu1 %v578_v13  ;;  %520 = vmatpush3.bf16.msra.mxu0 %v578_v13 }
  0x22   : > { %549 = vmatprep.subr.bf16.mxu1 %v579_v14  ;;  %521 = vmatprep.subr.bf16.mxu0 %v579_v14 }
  0x25   : > { %557 = vmatpush3.bf16.msra.mxu1 %v580_v15  ;;  %522 = vmatpush3.bf16.msra.mxu0 %v580_v15 }
  0x26   : > { %550 = vmatprep.subr.bf16.mxu1 %v581_v16  ;;  %523 = vmatprep.subr.bf16.mxu0 %v581_v16 }
  0x29   : > { %558 = vmatpush3.bf16.msra.mxu1 %v582_v17  ;;  %524 = vmatpush3.bf16.msra.mxu0 %v582_v17 }
  0x2c   : > { %390 = vmatmul.mubr.bf16.vlgmr.msra.gmra.mxu1 %v583_v18  ;;  %382 = vmatmul.mubr.bf16.vlgmr.msra.gmra.mxu0 %v586_v19 }
  0x2d   : > { %397 = vmatprep.mubr.bf16.mxu1 %v589_v20 }
  0x34   : > { %398 = vmatmul.mubr.bf16.gmra.mxu1 %v591_v21 }
  0xec   : > { %v531_v22 = vpop.f32.mrf.mxu1  ;;  %v525_v23 = vpop.f32.mrf.mxu0 }
  0xee   : > { %v532_v25 = vpop.f32.mrf.mxu1  ;;  %v526_v26 = vpop.f32.mrf.mxu0 }
  0xef   : > { %v533_v27 = vadd.f32 %v532_v25, %v531_v22  ;;  %v527_v28 = vadd.f32 %v526_v26, %v525_v23 }
  0xf0   : > { %v534_v29 = vpop.f32.mrf.mxu1  ;;  %v528_v30 = vpop.f32.mrf.mxu0 }
  0xf1   : > { %v392_v31 = vadd.f32 %v533_v27, %v483_v24  ;;  %v384_v32 = vadd.f32 %v527_v28, %v483_v24 }
  0xf2   : > { %v535_v33 = vpop.f32.mrf.mxu1  ;;  %v529_v34 = vpop.f32.mrf.mxu0 }
  0xf3   : > { %v408_v35 = vmax.f32 %v392_v31, 0.0  ;;  %v406_v36 = vmax.f32 %v384_v32, 0.0  ;;  %v536_v37 = vadd.f32 %v535_v33, %v534_v29  ;;  %v530_v38 = vadd.f32 %v529_v34, %v528_v30 }
  0xf4   : > { %v537_v39 = vpop.f32.mrf.mxu1 }
  0xf5   : > { %415 = vst.msk [vmem:[%s175_s30 + $0x10] sm:$0xff] %vm412_vm0, %v408_v35  ;;  %413 = vst.msk [vmem:[%s175_s30] sm:$0xff] %vm412_vm0, %v406_v36  ;;  %v395_v40 = vadd.f32 %v536_v37, %v483_v24  ;;  %v387_v41 = vadd.f32 %v530_v38, %v483_v24 }
  0xf6   : > { %v538_v42 = vpop.f32.mrf.mxu1 }
  0xf7   : > { %v409_v43 = vmax.f32 %v395_v40, 0.0  ;;  %v407_v44 = vmax.f32 %v387_v41, 0.0  ;;  %v539_v45 = vadd.f32 %v538_v42, %v537_v39 }
  0xf8   : > { %v540_v46 = vpop.f32.mrf.mxu1 }
  0xf9   : > { %416 = vst.msk [vmem:[%s175_s30 + $0x18] sm:$0xff] %vm412_vm0, %v409_v43  ;;  %414 = vst.msk [vmem:[%s175_s30 + $0x8] sm:$0xff] %vm412_vm0, %v407_v44  ;;  %v400_v47 = vadd.f32 %v539_v45, %v483_v24 }
  0xfa   : > { %v541_v48 = vpop.f32.mrf.mxu1 }
  0xfb   : > { %v410_v49 = vmax.f32 %v400_v47, 0.0  ;;  %v542_v50 = vadd.f32 %v541_v48, %v540_v46 }
  0xfd   : > { %417 = vst.msk [vmem:[%s175_s30 + $0x20] sm:$0xff] %vm412_vm0, %v410_v49  ;;  %v403_v51 = vadd.f32 %v542_v50, %v483_v24 }
  0xff   : > { %v411_v52 = vmax.f32 %v403_v51, 0.0 }
 0x101   : > { %418 = vst.msk [vmem:[%s175_s30 + $0x28] sm:$0xff] %vm412_vm0, %v411_v52 }
 0x102 PF: > { %s13_s12 = sadd.s32 1, %s598_s12  }
 0x103   : > { %p10_p4 = scmp.ge.s32.totalorder %s13_s12, 4  }
 0x105   :  { %12 = sbr.rel (!%p10_p4) target bundleno = 1 (0x1), region = 62 }

// kernel: raft_spline_forward.29
= control target key start
LH: loop header
LB: loop body
LE: loop exit
PB: predicated region body
PF: predicated region fallthrough
CT: control target
= control target key end

     0   :  { %s771_s12 = smov 0   ;;  %s920_s0 = inlined_call_operand.vmem [shape: bf16[32,320], index: 0, kind: input, shape index: {}]   ;;  %s921_s1 = inlined_call_operand.vmem [shape: bf16[320,256], index: 1, kind: input, shape index: {}]   ;;  %s922_s2 = inlined_call_operand.vmem [shape: f32[1,256], index: 2, kind: input, shape index: {}]   ;;  %s923_s3 = inlined_call_operand.vmem [shape: f32[32,256], index: 3, kind: output, shape index: {}]  }
   0x1 LB: > { %s607_s13 = sadd.s32 4294967295, %s748_s12   ;;  %p611_p0 = scmp.ge.s32.totalorder %s748_s12, 1  ;;  %s748_s12 = sphi %s771_s12, %s13_s12  }
   0x2   : > { %p139_p1 = scmp.lt.s32.totalorder %s748_s12, 3 }
   0x4   : > { %p140_p2 = pnand %p611_p0, %p139_p1 }
   0x5   : > { %s612_s28 = sshll.u32 (!%p140_p2), %s607_s13, 1 }
   0x6   : > { %143 = sbr.rel (%p140_p2) target bundleno = 292 (0x124), region = 32  ;;  %p166_p3 = scmp.lt.s32.totalorder (!%p140_p2), %s612_s28, 3 }
   0xb   : > { %v674_v0 = vld [vmem:[%s921_s1 + $0x74] ss:$8 sps:$4 sm:$0xff]   ;;  %v676_v1 = vld [vmem:[%s921_s1 + $0x70] ss:$8 sps:$4 sm:$0xff]   ;;  %v750_v2 = vmov 0   ;;  %s925_s28 = smov (!%p166_p3, %s612_s28), 3  ;;  %v226_v44 = vlaneseq }
   0xc   : > { %530 = vmatprep.mubr.bf16.mxu1 %v750_v2  ;;  %455 = vmatprep.subr.bf16.mxu0 %v674_v0  ;;  %v677_v3 = vld [vmem:[%s921_s1 + $0x64] ss:$8 sps:$4 sm:$0xff]   ;;  %v679_v4 = vld [vmem:[%s921_s1 + $0x60] ss:$8 sps:$4 sm:$0xff]   ;;  %v680_v5 = vld [vmem:[%s921_s1 + $0x54] ss:$8 sps:$4 sm:$0xff]  }
   0xd   : > { %456 = vmatpush1.bf16.msra.mxu0 %v676_v1  ;;  %v682_v6 = vld [vmem:[%s921_s1 + $0x50] ss:$8 sps:$4 sm:$0xff]   ;;  %v683_v7 = vld [vmem:[%s921_s1 + $0x44] ss:$8 sps:$4 sm:$0xff]   ;;  %v685_v8 = vld [vmem:[%s921_s1 + $0x40] ss:$8 sps:$4 sm:$0xff]  }
   0xe   : > { %457 = vmatprep.subr.bf16.mxu0 %v677_v3  ;;  %v686_v9 = vld [vmem:[%s921_s1 + $0x34] ss:$8 sps:$4 sm:$0xff]   ;;  %v688_v10 = vld [vmem:[%s921_s1 + $0x30] ss:$8 sps:$4 sm:$0xff]   ;;  %v689_v11 = vld [vmem:[%s921_s1 + $0x24] ss:$8 sps:$4 sm:$0xff]  }
   0xf   : > { %v709_v12 = vld [vmem:[%s921_s1 + $0x134] ss:$8 sps:$4 sm:$0xff]   ;;  %v712_v13 = vld [vmem:[%s921_s1 + $0x130] ss:$8 sps:$4 sm:$0xff]   ;;  %v691_v14 = vld [vmem:[%s921_s1 + $0x20] ss:$8 sps:$4 sm:$0xff]  }
  0x10   : > { %506 = vmatprep.subr.bf16.mxu1 %v709_v12  ;;  %v715_v15 = vld [vmem:[%s921_s1 + $0x124] ss:$8 sps:$4 sm:$0xff]   ;;  %v718_v16 = vld [vmem:[%s921_s1 + $0x120] ss:$8 sps:$4 sm:$0xff]   ;;  %v692_v17 = vld [vmem:[%s921_s1 + $0x14] ss:$8 sps:$4 sm:$0xff]  }
  0x11   : > { %458 = vmatpush1.bf16.msra.mxu0 %v679_v4  ;;  %507 = vmatpush1.bf16.msra.mxu1 %v712_v13  ;;  %v721_v18 = vld [vmem:[%s921_s1 + $0x114] ss:$8 sps:$4 sm:$0xff]   ;;  %s664_s25 = smul.u32 12, %s925_s28  ;;  %v694_v19 = vld [vmem:[%s921_s1 + $0x10] ss:$8 sps:$4 sm:$0xff]   ;;  %vm451_vm0 = vcmask 523264  }
  0x12   : > { %459 = vmatprep.subr.bf16.mxu0 %v680_v5  ;;  %508 = vmatprep.subr.bf16.mxu1 %v715_v15  ;;  %v724_v20 = vld [vmem:[%s921_s1 + $0x110] ss:$8 sps:$4 sm:$0xff]   ;;  %v695_v21 = vld [vmem:[%s921_s1 + $0x4] ss:$8 sps:$4 sm:$0xff]   ;;  %v697_v23 = vld [vmem:[%s921_s1] ss:$8 sps:$4 sm:$0xff]  }
  0x13   : > { %v727_v22 = vld [vmem:[%s921_s1 + $0x104] ss:$8 sps:$4 sm:$0xff]   ;;  %s851_s10 = scalar_lea.vmem %s920_s0, %s664_s25  ;;  %v730_v24 = vld [vmem:[%s921_s1 + $0x100] ss:$8 sps:$4 sm:$0xff]   ;;  %v698_v25 = vld [vmem:[%s921_s1 + $0xf4] ss:$8 sps:$4 sm:$0xff]  }
  0x14   : > { %v737_v26 = vld [vmem:[%s851_s10 + $0x4] ss:$12 sps:$4 sm:$0xff]   ;;  %v733_v27 = vld [vmem:[%s851_s10 + $0x8] ss:$12 sps:$4 sm:$0xff]   ;;  %v735_v43 = vld [vmem:[%s851_s10] ss:$12 sps:$4 sm:$0xff]  }
  0x15   : > { %460 = vmatpush1.bf16.msra.mxu0 %v682_v6  ;;  %509 = vmatpush1.bf16.msra.mxu1 %v718_v16  ;;  %v700_v28 = vld [vmem:[%s921_s1 + $0xf0] ss:$8 sps:$4 sm:$0xff]   ;;  %v701_v29 = vld [vmem:[%s921_s1 + $0xe4] ss:$8 sps:$4 sm:$0xff]   ;;  %v703_v30 = vld [vmem:[%s921_s1 + $0xe0] ss:$8 sps:$4 sm:$0xff]  }
  0x16   : > { %461 = vmatprep.subr.bf16.mxu0 %v683_v7  ;;  %510 = vmatprep.subr.bf16.mxu1 %v721_v18  ;;  %v704_v31 = vld [vmem:[%s921_s1 + $0xd4] ss:$8 sps:$4 sm:$0xff]   ;;  %v706_v32 = vld [vmem:[%s921_s1 + $0xd0] ss:$8 sps:$4 sm:$0xff]   ;;  %v707_v33 = vld [vmem:[%s921_s1 + $0xc4] ss:$8 sps:$4 sm:$0xff]  }
  0x17   : > { %487 = vmatprep.mubr.bf16.mxu0 %v737_v26  ;;  %v711_v34 = vld [vmem:[%s921_s1 + $0xc0] ss:$8 sps:$4 sm:$0xff]   ;;  %v713_v35 = vld [vmem:[%s921_s1 + $0xb4] ss:$8 sps:$4 sm:$0xff]   ;;  %v717_v36 = vld [vmem:[%s921_s1 + $0xb0] ss:$8 sps:$4 sm:$0xff]  }
  0x18   : > { %v719_v37 = vld [vmem:[%s921_s1 + $0xa4] ss:$8 sps:$4 sm:$0xff]   ;;  %v723_v38 = vld [vmem:[%s921_s1 + $0xa0] ss:$8 sps:$4 sm:$0xff]   ;;  %v725_v39 = vld [vmem:[%s921_s1 + $0x94] ss:$8 sps:$4 sm:$0xff]  }
  0x19   : > { %462 = vmatpush1.bf16.msra.mxu0 %v685_v8  ;;  %511 = vmatpush1.bf16.msra.mxu1 %v724_v20  ;;  %v729_v40 = vld [vmem:[%s921_s1 + $0x90] ss:$8 sps:$4 sm:$0xff]   ;;  %v731_v41 = vld [vmem:[%s921_s1 + $0x84] ss:$8 sps:$4 sm:$0xff]   ;;  %v734_v42 = vld [vmem:[%s921_s1 + $0x80] ss:$8 sps:$4 sm:$0xff]  }
  0x1a   : > { %463 = vmatprep.subr.bf16.mxu0 %v686_v9  ;;  %512 = vmatprep.subr.bf16.mxu1 %v727_v22  ;;  %v227_v45 = vshrl.u32 %v226_v44, 7  ;;  %v224_v47 = vld [vmem:[%s922_s2] sm:$0x3]  ;;  %s663_s10 = sshll.u32 %s925_s28, 4 }
  0x1b   : > { %s177_s29 = scalar_lea.vmem %s923_s3, %s663_s10 }
  0x1c   : > { %v228_v46 = vsub.s32 0, %v227_v45  ;;  %v232_v48 = vsub.s32 1, %v227_v45 }
  0x1d   : > { %464 = vmatpush1.bf16.msra.mxu0 %v688_v10  ;;  %513 = vmatpush1.bf16.msra.mxu1 %v730_v24 }
  0x1e   : > { %465 = vmatprep.subr.bf16.mxu0 %v689_v11  ;;  %v229_v50 = vrot.slane %v224_v47, %v228_v46  ;;  %v233_v51 = vrot.slane %v224_v47, %v232_v48 }
  0x20   : > { %660 = vmatmul.mubr.msk.bf16.vlgmr.msra.gmra.mxu1 %vm451_vm0, %v733_v27 }
  0x21   : > { %466 = vmatpush1.bf16.msra.mxu0 %v691_v14 }
  0x22   : > { %467 = vmatprep.subr.bf16.mxu0 %v692_v17 }
  0x25   : > { %468 = vmatpush1.bf16.msra.mxu0 %v694_v19 }
  0x26   : > { %469 = vmatprep.subr.bf16.mxu0 %v695_v21 }
  0x29   : > { %470 = vmatpush1.bf16.msra.mxu0 %v697_v23 }
  0x2a   : > { %471 = vmatprep.subr.bf16.mxu0 %v698_v25 }
  0x2d   : > { %472 = vmatpush2.bf16.msra.mxu0 %v700_v28 }
  0x2e   : > { %473 = vmatprep.subr.bf16.mxu0 %v701_v29 }
  0x31   : > { %474 = vmatpush2.bf16.msra.mxu0 %v703_v30 }
  0x32   : > { %475 = vmatprep.subr.bf16.mxu0 %v704_v31 }
  0x35   : > { %476 = vmatpush2.bf16.msra.mxu0 %v706_v32 }
  0x36   : > { %477 = vmatprep.subr.bf16.mxu0 %v707_v33 }
  0x39   : > { %478 = vmatpush2.bf16.msra.mxu0 %v711_v34 }
  0x3a   : > { %479 = vmatprep.subr.bf16.mxu0 %v713_v35 }
  0x3d   : > { %480 = vmatpush2.bf16.msra.mxu0 %v717_v36 }
  0x3e   : > { %481 = vmatprep.subr.bf16.mxu0 %v719_v37 }
  0x41   : > { %482 = vmatpush2.bf16.msra.mxu0 %v723_v38 }
  0x42   : > { %483 = vmatprep.subr.bf16.mxu0 %v725_v39 }
  0x45   : > { %484 = vmatpush2.bf16.msra.mxu0 %v729_v40 }
  0x46   : > { %485 = vmatprep.subr.bf16.mxu0 %v731_v41 }
  0x49   : > { %486 = vmatpush2.bf16.msra.mxu0 %v734_v42 }
  0x4c   : > { %488 = vmatmul.mubr.bf16.vlgmr.msra.gmra.mxu0 %v735_v43 }
  0xe0   : > { %v532_v49 = vpop.f32.mrf.mxu1 }
  0xe2   : > { %v534_v52 = vpop.f32.mrf.mxu1 }
  0xe4   : > { %v536_v58 = vpop.f32.mrf.mxu1 }
  0xe6   : > { %v538_v2 = vpop.f32.mrf.mxu1 }
 0x10c   : > { %v489_v53 = vpop.f32.mrf.mxu0 }
 0x10d   : > { %v490_v54 = vadd.f32 %v489_v53, %v229_v50 }
 0x10e   : > { %v491_v55 = vpop.f32.mrf.mxu0 }
 0x10f   : > { %v533_v56 = vadd.f32 %v532_v49, %v490_v54  ;;  %v492_v57 = vadd.f32 %v491_v55, %v233_v51 }
 0x110   : > { %v493_v59 = vpop.f32.mrf.mxu0 }
 0x111   : > { %738 = vtanh.f32 %v533_v56  ;;  %v535_v60 = vadd.f32 %v534_v52, %v492_v57  ;;  %v494_v61 = vadd.f32 %v493_v59, %v229_v50 }
 0x112   : > { %v495_v62 = vpop.f32.mrf.mxu0 }
 0x113   : > { %v543_v63 = vmax.f32 %v535_v60, 0.0  ;;  %v537_v0 = vadd.f32 %v536_v58, %v494_v61  ;;  %v496_v1 = vadd.f32 %v495_v62, %v233_v51 }
 0x115   : > { %546 = vst [vmem:[%s177_s29 + $0x8] sm:$0xff] %v543_v63  ;;  %740 = vtanh.f32 %v537_v0  ;;  %v539_v3 = vadd.f32 %v538_v2, %v496_v1 }
 0x117   : > { %v544_v4 = vmax.f32 %v539_v3, 0.0 }
 0x119   : > { %548 = vst [vmem:[%s177_s29 + $0x18] sm:$0xff] %v544_v4 }
 0x11e   : > { %v739_v5 = vpop.eup %738 }
 0x11f   : > { %545 = vst [vmem:[%s177_s29] sm:$0xff] %v739_v5 }
 0x122   : > { %v741_v6 = vpop.eup %740 }
 0x123   : > { %547 = vst [vmem:[%s177_s29 + $0x10] sm:$0xff] %v741_v6 }
 0x124 PF: > { %s13_s12 = sadd.s32 1, %s748_s12  }
 0x125   : > { %p10_p4 = scmp.ge.s32.totalorder %s13_s12, 4  }
 0x127   :  { %12 = sbr.rel (!%p10_p4) target bundleno = 1 (0x1), region = 62 }

// kernel: raft_spline_forward.30
= control target key start
LH: loop header
LB: loop body
LE: loop exit
PB: predicated region body
PF: predicated region fallthrough
CT: control target
= control target key end

     0   :  { %s2489_s21 = smov 0   ;;  %s3629_s0 = inlined_call_operand.vmem [shape: f32[32,256], index: 0, kind: input, shape index: {}]   ;;  %s3630_s1 = inlined_call_operand.vmem [shape: f32[32,128], index: 1, kind: input, shape index: {}]   ;;  %s3631_s2 = inlined_call_operand.vmem [shape: f32[256,128], index: 2, kind: input, shape index: {}]   ;;  %s3632_s3 = inlined_call_operand.vmem [shape: f32[1,128], index: 3, kind: input, shape index: {}]   ;;  %s3633_s4 = inlined_call_operand.vmem [shape: f32[128,128], index: 4, kind: input, shape index: {}]   ;;  %s3634_s5 = inlined_call_operand.vmem [shape: f32[1,128], index: 5, kind: input, shape index: {}]   ;;  %s3635_s6 = inlined_call_operand.vmem [shape: f32[256,384], index: 6, kind: input, shape index: {}]   ;;  %s3636_s7 = inlined_call_operand.vmem [shape: f32[128,384], index: 7, kind: input, shape index: {}]   ;;  %s3637_s8 = inlined_call_operand.vmem [shape: f32[128,256], index: 8, kind: input, shape index: {}]   ;;  %s3638_s9 = inlined_call_operand.vmem [shape: f32[1,256], index: 9, kind: input, shape index: {}]   ;;  %s3639_s10 = inlined_call_operand.vmem [shape: f32[128,128], index: 10, kind: input, shape index: {}]   ;;  %s3640_s11 = inlined_call_operand.vmem [shape: f32[1,128], index: 11, kind: input, shape index: {}]   ;;  %s3641_s12 = inlined_call_operand.vmem [shape: f32[128,128], index: 12, kind: input, shape index: {}]   ;;  %s3642_s13 = inlined_call_operand.vmem [shape: f32[1,128], index: 13, kind: input, shape index: {}]   ;;  %s3643_s14 = inlined_call_operand.vmem [shape: f32[128,640], index: 14, kind: input, shape index: {}]   ;;  %s3644_s15 = inlined_call_operand.vmem [shape: f32[1,640], index: 15, kind: input, shape index: {}]   ;;  %s3645_s16 = inlined_call_operand.vmem [shape: f32[32,768], index: 16, kind: output, shape index: {}]  }
   0x1   :  { %3646 = sst [smem:[#allocation2_spill]] %s3629_s0 }
   0x2 LB: > { %s2001_s22 = sadd.s32 4294967295, %s2401_s21   ;;  %p2005_p0 = scmp.ge.s32.totalorder %s2401_s21, 1  ;;  %s2401_s21 = sphi %s2489_s21, %s26_s21  }
   0x3   : > { %p475_p1 = scmp.lt.s32.totalorder %s2401_s21, 3 }
   0x5   : > { %p476_p2 = pnand %p2005_p0, %p475_p1 }
   0x6   : > { %s2006_s29 = sshll.u32 (!%p476_p2), %s2001_s22, 1  ;;  %s3647_s19 = sld [smem:[#allocation2_spill]] (!%p476_p2) }
   0x7   : > { %479 = sbr.rel (%p476_p2) target bundleno = 1402 (0x57a), region = 84  ;;  %p533_p3 = scmp.lt.s32.totalorder (!%p476_p2), %s2006_s29, 3 }
   0xc   : > { %v589_v0 = vld [vmem:[%s3631_s2 + $0xf8] sm:$0xff]  ;;  %v588_v2 = vld [vmem:[%s3631_s2 + $0xf0] sm:$0xff]  ;;  %v587_v4 = vld [vmem:[%s3631_s2 + $0xe8] sm:$0xff]  ;;  %s3649_s29 = smov (!%p533_p3, %s2006_s29), 3 }
   0xd   : > { %v573_v1 = vld [vmem:[%s3631_s2 + $0x78] sm:$0xff]  ;;  %2024 = vmatprep.subr.mxu0 %v589_v0  ;;  %v572_v3 = vld [vmem:[%s3631_s2 + $0x70] sm:$0xff]  ;;  %v571_v5 = vld [vmem:[%s3631_s2 + $0x68] sm:$0xff]  ;;  %s2023_s26 = sshll.u32 %s3649_s29, 4  ;;  %s2010_s30 = sshll.u32 %s3649_s29, 3 }
   0xe   : > { %2025 = vmatpush3.msra.mxu0 %v573_v1  ;;  %v586_v6 = vld [vmem:[%s3631_s2 + $0xe0] sm:$0xff]  ;;  %v585_v8 = vld [vmem:[%s3631_s2 + $0xd8] sm:$0xff]  ;;  %s2533_s20 = scalar_lea.vmem %s3647_s19, %s2023_s26  ;;  %v584_v10 = vld [vmem:[%s3631_s2 + $0xd0] sm:$0xff]  ;;  %s543_s0 = scalar_lea.vmem %s3630_s1, %s2010_s30 }
   0xf   : > { %2026 = vmatprep.subr.mxu0 %v588_v2  ;;  %v570_v7 = vld [vmem:[%s3631_s2 + $0x60] sm:$0xff]  ;;  %v569_v9 = vld [vmem:[%s3631_s2 + $0x58] sm:$0xff]  ;;  %v568_v11 = vld [vmem:[%s3631_s2 + $0x50] sm:$0xff]  ;;  %s2365_s27 = smul.u32 48, %s3649_s29 }
  0x10   : > { %2027 = vmatpush3.msra.mxu0 %v572_v3  ;;  %v583_v12 = vld [vmem:[%s3631_s2 + $0xc8] sm:$0xff]  ;;  %v582_v15 = vld [vmem:[%s3631_s2 + $0xc0] sm:$0xff]  ;;  %v689_v16 = vld [vmem:[%s3633_s4 + $0x78] sm:$0xff] }
  0x11   : > { %2028 = vmatprep.subr.mxu0 %v587_v4  ;;  %v2545_v13 = vld [vmem:[%s2533_s20 + $0x8] sm:$0xff]  ;;  %v688_v17 = vld [vmem:[%s3633_s4 + $0x70] sm:$0xff]  ;;  %v566_v18 = vld [vmem:[%s3631_s2 + $0x40] sm:$0xff]  ;;  %2190 = vmatprep.subr.mxu1 %v689_v16 }
  0x12   : > { %2029 = vmatpush3.msra.mxu0 %v571_v5  ;;  %v567_v14 = vld [vmem:[%s3631_s2 + $0x48] sm:$0xff]  ;;  %661 = vmatprep.mubr.f32.mxu0 %v2545_v13  ;;  %v581_v19 = vld [vmem:[%s3631_s2 + $0xb8] sm:$0xff]  ;;  %v580_v22 = vld [vmem:[%s3631_s2 + $0xb0] sm:$0xff] }
  0x13   : > { %2030 = vmatprep.subr.mxu0 %v586_v6  ;;  %2191 = vmatpush3.msra.mxu1 %v689_v16  ;;  %v687_v20 = vld [vmem:[%s3633_s4 + $0x68] sm:$0xff]  ;;  %v565_v21 = vld [vmem:[%s3631_s2 + $0x38] sm:$0xff]  ;;  %v686_v23 = vld [vmem:[%s3633_s4 + $0x60] sm:$0xff] }
  0x14   : > { %2031 = vmatpush3.msra.mxu0 %v570_v7  ;;  %2192 = vmatprep.subr.mxu1 %v688_v17  ;;  %v564_v24 = vld [vmem:[%s3631_s2 + $0x30] sm:$0xff]  ;;  %v579_v25 = vld [vmem:[%s3631_s2 + $0xa8] sm:$0xff]  ;;  %v685_v26 = vld [vmem:[%s3633_s4 + $0x58] sm:$0xff] }
  0x15   : > { %2032 = vmatprep.subr.mxu0 %v585_v8  ;;  %2193 = vmatpush3.msra.mxu1 %v688_v17  ;;  %v563_v27 = vld [vmem:[%s3631_s2 + $0x28] sm:$0xff]  ;;  %v578_v28 = vld [vmem:[%s3631_s2 + $0xa0] sm:$0xff]  ;;  %v684_v29 = vld [vmem:[%s3633_s4 + $0x50] sm:$0xff] }
  0x16   : > { %2033 = vmatpush3.msra.mxu0 %v569_v9  ;;  %2194 = vmatprep.subr.mxu1 %v687_v20  ;;  %v562_v30 = vld [vmem:[%s3631_s2 + $0x20] sm:$0xff]  ;;  %v577_v31 = vld [vmem:[%s3631_s2 + $0x98] sm:$0xff]  ;;  %v683_v32 = vld [vmem:[%s3633_s4 + $0x48] sm:$0xff] }
  0x17   : > { %2034 = vmatprep.subr.mxu0 %v584_v10  ;;  %2195 = vmatpush3.msra.mxu1 %v687_v20  ;;  %v561_v33 = vld [vmem:[%s3631_s2 + $0x18] sm:$0xff]  ;;  %v576_v34 = vld [vmem:[%s3631_s2 + $0x90] sm:$0xff]  ;;  %v682_v35 = vld [vmem:[%s3633_s4 + $0x40] sm:$0xff] }
  0x18   : > { %2035 = vmatpush3.msra.mxu0 %v568_v11  ;;  %2196 = vmatprep.subr.mxu1 %v686_v23  ;;  %v560_v36 = vld [vmem:[%s3631_s2 + $0x10] sm:$0xff]  ;;  %v575_v37 = vld [vmem:[%s3631_s2 + $0x88] sm:$0xff]  ;;  %v681_v38 = vld [vmem:[%s3633_s4 + $0x38] sm:$0xff] }
  0x19   : > { %2036 = vmatprep.subr.mxu0 %v583_v12  ;;  %2197 = vmatpush3.msra.mxu1 %v686_v23  ;;  %v559_v39 = vld [vmem:[%s3631_s2 + $0x8] sm:$0xff]  ;;  %v574_v40 = vld [vmem:[%s3631_s2 + $0x80] sm:$0xff]  ;;  %v680_v41 = vld [vmem:[%s3633_s4 + $0x30] sm:$0xff] }
  0x1a   : > { %2037 = vmatpush3.msra.mxu0 %v567_v14  ;;  %2198 = vmatprep.subr.mxu1 %v685_v26  ;;  %v558_v42 = vld [vmem:[%s3631_s2] sm:$0xff]  ;;  %v2639_v44 = vld [vmem:[%s2533_s20 + $0x18] sm:$0xff]  ;;  %v2644_v45 = vld [vmem:[%s2533_s20 + $0x10] sm:$0xff] }
  0x1b   : > { %2038 = vmatprep.subr.mxu0 %v582_v15  ;;  %2199 = vmatpush3.msra.mxu1 %v685_v26  ;;  %v2636_v43 = vld [vmem:[%s2533_s20] sm:$0xff]  ;;  %v679_v46 = vld [vmem:[%s3633_s4 + $0x28] sm:$0xff]  ;;  %v677_v48 = vld [vmem:[%s3633_s4 + $0x18] sm:$0xff] }
  0x1c   : > { %2039 = vmatpush3.msra.mxu0 %v566_v18  ;;  %2200 = vmatprep.subr.mxu1 %v684_v29  ;;  %v678_v47 = vld [vmem:[%s3633_s4 + $0x20] sm:$0xff]  ;;  %v676_v49 = vld [vmem:[%s3633_s4 + $0x10] sm:$0xff]  ;;  %v675_v50 = vld [vmem:[%s3633_s4 + $0x8] sm:$0xff] }
  0x1d   : > { %2040 = vmatprep.subr.mxu0 %v581_v19  ;;  %2201 = vmatpush3.msra.mxu1 %v684_v29  ;;  %v674_v51 = vld [vmem:[%s3633_s4] sm:$0xff]  ;;  %v916_v52 = vld [vmem:[%s3636_s7 + $0x170] sm:$0xff]  ;;  %v915_v53 = vld [vmem:[%s3636_s7 + $0x168] sm:$0xff] }
  0x1e   : > { %2041 = vmatpush3.msra.mxu0 %v565_v21  ;;  %2202 = vmatprep.subr.mxu1 %v683_v32  ;;  %v2674_v54 = vld [vmem:[%s3636_s7 + $0x178] sm:$0xff]  ;;  %v912_v56 = vld [vmem:[%s3636_s7 + $0x150] sm:$0xff]  ;;  %v910_v57 = vld [vmem:[%s3636_s7 + $0x140] sm:$0xff] }
  0x1f   : > { %2042 = vmatprep.subr.mxu0 %v580_v22  ;;  %2203 = vmatpush3.msra.mxu1 %v683_v32  ;;  %v913_v55 = vld [vmem:[%s3636_s7 + $0x158] sm:$0xff]  ;;  %v907_v59 = vld [vmem:[%s3636_s7 + $0x128] sm:$0xff]  ;;  %v906_v60 = vld [vmem:[%s3636_s7 + $0x120] sm:$0xff] }
  0x20   : > { %2043 = vmatpush3.msra.mxu0 %v564_v24  ;;  %2204 = vmatprep.subr.mxu1 %v682_v35  ;;  %v909_v58 = vld [vmem:[%s3636_s7 + $0x138] sm:$0xff]  ;;  %v904_v61 = vld [vmem:[%s3636_s7 + $0x110] sm:$0xff]  ;;  %v903_v62 = vld [vmem:[%s3636_s7 + $0x108] sm:$0xff] }
  0x21   : > { %2044 = vmatprep.subr.mxu0 %v579_v25  ;;  %2205 = vmatpush3.msra.mxu1 %v682_v35  ;;  %v901_v63 = vld [vmem:[%s3636_s7 + $0xf8] sm:$0xff]  ;;  %v900_v0 = vld [vmem:[%s3636_s7 + $0xf0] sm:$0xff]  ;;  %v898_v1 = vld [vmem:[%s3636_s7 + $0xe0] sm:$0xff] }
  0x22   : > { %2045 = vmatpush3.msra.mxu0 %v563_v27  ;;  %2206 = vmatprep.subr.mxu1 %v681_v38  ;;  %v897_v2 = vld [vmem:[%s3636_s7 + $0xd8] sm:$0xff]  ;;  %v895_v3 = vld [vmem:[%s3636_s7 + $0xc8] sm:$0xff]  ;;  %v894_v4 = vld [vmem:[%s3636_s7 + $0xc0] sm:$0xff] }
  0x23   : > { %2046 = vmatprep.subr.mxu0 %v578_v28  ;;  %2207 = vmatpush3.msra.mxu1 %v681_v38  ;;  %v892_v5 = vld [vmem:[%s3636_s7 + $0xb0] sm:$0xff]  ;;  %v891_v6 = vld [vmem:[%s3636_s7 + $0xa8] sm:$0xff]  ;;  %v889_v7 = vld [vmem:[%s3636_s7 + $0x98] sm:$0xff] }
  0x24   : > { %2047 = vmatpush3.msra.mxu0 %v562_v30  ;;  %2208 = vmatprep.subr.mxu1 %v680_v41  ;;  %v888_v8 = vld [vmem:[%s3636_s7 + $0x90] sm:$0xff]  ;;  %v886_v9 = vld [vmem:[%s3636_s7 + $0x80] sm:$0xff]  ;;  %v885_v10 = vld [vmem:[%s3636_s7 + $0x78] sm:$0xff] }
  0x25   : > { %2048 = vmatprep.subr.mxu0 %v577_v31  ;;  %2209 = vmatpush3.msra.mxu1 %v680_v41  ;;  %v883_v11 = vld [vmem:[%s3636_s7 + $0x68] sm:$0xff]  ;;  %v882_v12 = vld [vmem:[%s3636_s7 + $0x60] sm:$0xff]  ;;  %v880_v14 = vld [vmem:[%s3636_s7 + $0x50] sm:$0xff] }
  0x26   : > { %2049 = vmatpush3.msra.mxu0 %v561_v33  ;;  %2210 = vmatprep.subr.mxu1 %v679_v46  ;;  %v879_v15 = vld [vmem:[%s3636_s7 + $0x48] sm:$0xff]  ;;  %v2013_v18 = vld [vmem:[%s3632_s3] ss:$0 sm:$0xff]  ;;  %v908_v29 = vld [vmem:[%s3636_s7 + $0x130] sm:$0xff] }
  0x27   : > { %2050 = vmatprep.subr.mxu0 %v576_v34  ;;  %2211 = vmatpush3.msra.mxu1 %v679_v46  ;;  %v914_v27 = vld [vmem:[%s3636_s7 + $0x160] sm:$0xff]  ;;  %v911_v28 = vld [vmem:[%s3636_s7 + $0x148] sm:$0xff]  ;;  %v905_v30 = vld [vmem:[%s3636_s7 + $0x118] sm:$0xff] }
  0x28   : > { %2051 = vmatpush3.msra.mxu0 %v560_v36  ;;  %2212 = vmatprep.subr.mxu1 %v678_v47  ;;  %v902_v31 = vld [vmem:[%s3636_s7 + $0x100] sm:$0xff]  ;;  %v899_v32 = vld [vmem:[%s3636_s7 + $0xe8] sm:$0xff]  ;;  %v896_v33 = vld [vmem:[%s3636_s7 + $0xd0] sm:$0xff] }
  0x29   : > { %2052 = vmatprep.subr.mxu0 %v575_v37  ;;  %2213 = vmatpush3.msra.mxu1 %v678_v47  ;;  %v893_v34 = vld [vmem:[%s3636_s7 + $0xb8] sm:$0xff]  ;;  %v890_v35 = vld [vmem:[%s3636_s7 + $0xa0] sm:$0xff]  ;;  %v887_v36 = vld [vmem:[%s3636_s7 + $0x88] sm:$0xff] }
  0x2a   : > { %2053 = vmatpush3.msra.mxu0 %v559_v39  ;;  %2214 = vmatprep.subr.mxu1 %v677_v48  ;;  %v884_v37 = vld [vmem:[%s3636_s7 + $0x70] sm:$0xff]  ;;  %v881_v38 = vld [vmem:[%s3636_s7 + $0x58] sm:$0xff]  ;;  %v878_v41 = vld [vmem:[%s3636_s7 + $0x40] sm:$0xff] }
  0x2b   : > { %2054 = vmatprep.subr.mxu0 %v574_v40  ;;  %2215 = vmatpush3.msra.mxu1 %v677_v48  ;;  %v877_v39 = vld [vmem:[%s3636_s7 + $0x38] sm:$0xff]  ;;  %v876_v40 = vld [vmem:[%s3636_s7 + $0x30] sm:$0xff]  ;;  %v875_v47 = vld [vmem:[%s3636_s7 + $0x28] sm:$0xff] }
  0x2c   : > { %2055 = vmatpush3.msra.mxu0 %v558_v42  ;;  %2216 = vmatprep.subr.mxu1 %v676_v49  ;;  %v874_v42 = vld [vmem:[%s3636_s7 + $0x20] sm:$0xff]  ;;  %v873_v46 = vld [vmem:[%s3636_s7 + $0x18] sm:$0xff]  ;;  %v871_v48 = vld [vmem:[%s3636_s7 + $0x8] sm:$0xff] }
  0x2d   : > { %662 = vmatmul.mubr.f32.vlgmr.msra.gmra.mxu0 %v2636_v43  ;;  %2217 = vmatpush3.msra.mxu1 %v676_v49  ;;  %v870_v49 = vld [vmem:[%s3636_s7] sm:$0xff] }
  0x2e   : > { %666 = vmatprep.mubr.f32.mxu0 %v2639_v44  ;;  %2218 = vmatprep.subr.mxu1 %v675_v50 }
  0x2f   : > { %2219 = vmatpush3.msra.mxu1 %v675_v50  ;;  %918 = vmatprep.subr.mxu0 %v916_v52  ;;  %v872_v50 = vld [vmem:[%s3636_s7 + $0x10] sm:$0xff]  ;;  %v2403_v52 = vmov 0.0  }
  0x30   : > { %2220 = vmatprep.subr.mxu1 %v674_v51  ;;  %919 = vmatpush1.msra.mxu0 %v915_v53  ;;  %v869_v53 = vld [vmem:[%s3635_s6 + $0x2f8] sm:$0xff] }
  0x31   : > { %667 = vmatmul.mubr.f32.gmra.mxu0 %v2644_v45  ;;  %2221 = vmatpush3.msra.mxu1 %v674_v51  ;;  %v820_v51 = vld [vmem:[%s3635_s6 + $0x170] sm:$0xff] }
  0x32   : > { %2225 = vmatprep.subr.mxu1 %v2674_v54  ;;  %920 = vmatprep.subr.mxu0 %v913_v55 }
  0x33   : > { %921 = vmatpush1.msra.mxu0 %v912_v56  ;;  %982 = vmatprep.mubr.f32.mxu0 %v2403_v52 }
  0x34   : > { %922 = vmatprep.subr.mxu0 %v910_v57 }
  0x35   : > { %923 = vmatpush1.msra.mxu0 %v909_v58 }
  0x36   : > { %924 = vmatprep.subr.mxu0 %v907_v59 }
  0x37   : > { %925 = vmatpush1.msra.mxu0 %v906_v60  ;;  %v819_v60 = vld [vmem:[%s3635_s6 + $0x168] sm:$0xff] }
  0x38   : > { %926 = vmatprep.subr.mxu0 %v904_v61 }
  0x39   : > { %927 = vmatpush1.msra.mxu0 %v903_v62  ;;  %v817_v62 = vld [vmem:[%s3635_s6 + $0x158] sm:$0xff] }
  0x3a   : > { %928 = vmatprep.subr.mxu0 %v901_v63  ;;  %v821_v63 = vld [vmem:[%s3635_s6 + $0x178] sm:$0xff] }
  0x3b   : > { %929 = vmatpush1.msra.mxu0 %v900_v0  ;;  %v816_v0 = vld [vmem:[%s3635_s6 + $0x150] sm:$0xff] }
  0x3c   : > { %930 = vmatprep.subr.mxu0 %v898_v1  ;;  %v866_v1 = vld [vmem:[%s3635_s6 + $0x2e0] sm:$0xff] }
  0x3d   : > { %931 = vmatpush1.msra.mxu0 %v897_v2  ;;  %v814_v2 = vld [vmem:[%s3635_s6 + $0x140] sm:$0xff] }
  0x3e   : > { %932 = vmatprep.subr.mxu0 %v895_v3  ;;  %v818_v3 = vld [vmem:[%s3635_s6 + $0x160] sm:$0xff] }
  0x3f   : > { %933 = vmatpush1.msra.mxu0 %v894_v4  ;;  %v813_v4 = vld [vmem:[%s3635_s6 + $0x138] sm:$0xff] }
  0x40   : > { %934 = vmatprep.subr.mxu0 %v892_v5  ;;  %v863_v5 = vld [vmem:[%s3635_s6 + $0x2c8] sm:$0xff] }
  0x41   : > { %935 = vmatpush1.msra.mxu0 %v891_v6  ;;  %v811_v6 = vld [vmem:[%s3635_s6 + $0x128] sm:$0xff] }
  0x42   : > { %936 = vmatprep.subr.mxu0 %v889_v7  ;;  %v815_v7 = vld [vmem:[%s3635_s6 + $0x148] sm:$0xff] }
  0x43   : > { %937 = vmatpush1.msra.mxu0 %v888_v8  ;;  %v810_v8 = vld [vmem:[%s3635_s6 + $0x120] sm:$0xff] }
  0x44   : > { %938 = vmatprep.subr.mxu0 %v886_v9  ;;  %v860_v9 = vld [vmem:[%s3635_s6 + $0x2b0] sm:$0xff] }
  0x45   : > { %939 = vmatpush1.msra.mxu0 %v885_v10  ;;  %v808_v10 = vld [vmem:[%s3635_s6 + $0x110] sm:$0xff] }
  0x46   : > { %940 = vmatprep.subr.mxu0 %v883_v11  ;;  %v812_v11 = vld [vmem:[%s3635_s6 + $0x130] sm:$0xff] }
  0x47   : > { %941 = vmatpush1.msra.mxu0 %v882_v12  ;;  %v807_v12 = vld [vmem:[%s3635_s6 + $0x108] sm:$0xff] }
  0x48   : > { %942 = vmatprep.subr.mxu0 %v880_v14  ;;  %v857_v14 = vld [vmem:[%s3635_s6 + $0x298] sm:$0xff] }
  0x49   : > { %943 = vmatpush1.msra.mxu0 %v879_v15  ;;  %v805_v15 = vld [vmem:[%s3635_s6 + $0xf8] sm:$0xff] }
  0x4a   : > { %944 = vmatprep.subr.mxu0 %v877_v39  ;;  %v787_v39 = vld [vmem:[%s3635_s6 + $0x68] sm:$0xff] }
  0x4b   : > { %945 = vmatpush1.msra.mxu0 %v876_v40  ;;  %v791_v40 = vld [vmem:[%s3635_s6 + $0x88] sm:$0xff] }
  0x4c   : > { %946 = vmatprep.subr.mxu0 %v874_v42  ;;  %v836_v42 = vld [vmem:[%s3635_s6 + $0x1f0] sm:$0xff] }
  0x4d   : > { %947 = vmatpush1.msra.mxu0 %v873_v46  ;;  %v784_v46 = vld [vmem:[%s3635_s6 + $0x50] sm:$0xff] }
  0x4e   : > { %948 = vmatprep.subr.mxu0 %v871_v48  ;;  %v783_v48 = vld [vmem:[%s3635_s6 + $0x48] sm:$0xff] }
  0x4f   : > { %949 = vmatpush1.msra.mxu0 %v870_v49  ;;  %v833_v49 = vld [vmem:[%s3635_s6 + $0x1d8] sm:$0xff] }
  0x50   : > { %1070 = vmatprep.subr.mxu0 %v820_v51  ;;  %v785_v51 = vld [vmem:[%s3635_s6 + $0x58] sm:$0xff] }
  0xed   : > { %v2056_v16 = vpop.f32.mrf.mxu0 }
  0xef   : > { %v2057_v17 = vpop.f32.mrf.mxu0 }
  0xf0   : > { %v2058_v19 = vadd.f32 %v2057_v17, %v2056_v16  ;;  %v809_v16 = vld [vmem:[%s3635_s6 + $0x118] sm:$0xff]  ;;  %v804_v17 = vld [vmem:[%s3635_s6 + $0xf0] sm:$0xff] }
  0xf1   : > { %v2059_v20 = vpop.f32.mrf.mxu0 }
  0xf2   : > { %v664_v21 = vadd.f32 %v2058_v19, %v2013_v18  ;;  %v802_v19 = vld [vmem:[%s3635_s6 + $0xe0] sm:$0xff] }
  0xf3   : > { %v2060_v22 = vpop.f32.mrf.mxu0 }
  0xf4   : > { %v2061_v23 = vadd.f32 %v2060_v22, %v2059_v20  ;;  %v672_v24 = vmax.f32 %v664_v21, 0.0  ;;  %v806_v20 = vld [vmem:[%s3635_s6 + $0x100] sm:$0xff]  ;;  %v801_v21 = vld [vmem:[%s3635_s6 + $0xd8] sm:$0xff]  ;;  %v851_v22 = vld [vmem:[%s3635_s6 + $0x268] sm:$0xff] }
  0xf6   : > { %v669_v25 = vadd.f32 %v2061_v23, %v2013_v18  ;;  %2222 = vmatprep.mubr.f32.mxu1 %v672_v24  ;;  %v854_v18 = vld [vmem:[%s3635_s6 + $0x280] sm:$0xff]  ;;  %v799_v23 = vld [vmem:[%s3635_s6 + $0xc8] sm:$0xff] }
  0xf7   : > { %v803_v24 = vld [vmem:[%s3635_s6 + $0xe8] sm:$0xff] }
  0xf8   : > { %v673_v26 = vmax.f32 %v669_v25, 0.0  ;;  %v798_v25 = vld [vmem:[%s3635_s6 + $0xc0] sm:$0xff] }
  0xfa   : > { %2223 = vmatmul.mubr.f32.vlgmr.msra.gmra.mxu1 %v673_v26  ;;  %v848_v26 = vld [vmem:[%s3635_s6 + $0x250] sm:$0xff] }
  0xfb   : > { %2226 = vmatpush3.msra.mxu1 %v2674_v54  ;;  %v2014_v54 = vld [vmem:[%s3634_s5] ss:$0 sm:$0xff] }
  0xfc   : > { %2227 = vmatprep.subr.mxu1 %v914_v27 }
  0xfd   : > { %2228 = vmatpush3.msra.mxu1 %v914_v27  ;;  %v796_v27 = vld [vmem:[%s3635_s6 + $0xb0] sm:$0xff] }
  0xfe   : > { %2229 = vmatprep.subr.mxu1 %v911_v28 }
  0xff   : > { %2230 = vmatpush3.msra.mxu1 %v911_v28  ;;  %v800_v28 = vld [vmem:[%s3635_s6 + $0xd0] sm:$0xff] }
 0x100   : > { %2231 = vmatprep.subr.mxu1 %v908_v29 }
 0x101   : > { %2232 = vmatpush3.msra.mxu1 %v908_v29  ;;  %v795_v29 = vld [vmem:[%s3635_s6 + $0xa8] sm:$0xff] }
 0x102   : > { %2233 = vmatprep.subr.mxu1 %v905_v30 }
 0x103   : > { %2234 = vmatpush3.msra.mxu1 %v905_v30  ;;  %v845_v30 = vld [vmem:[%s3635_s6 + $0x238] sm:$0xff] }
 0x104   : > { %2235 = vmatprep.subr.mxu1 %v902_v31 }
 0x105   : > { %2236 = vmatpush3.msra.mxu1 %v902_v31  ;;  %v793_v31 = vld [vmem:[%s3635_s6 + $0x98] sm:$0xff] }
 0x106   : > { %2237 = vmatprep.subr.mxu1 %v899_v32 }
 0x107   : > { %2238 = vmatpush3.msra.mxu1 %v899_v32  ;;  %v797_v32 = vld [vmem:[%s3635_s6 + $0xb8] sm:$0xff] }
 0x108   : > { %2239 = vmatprep.subr.mxu1 %v896_v33 }
 0x109   : > { %2240 = vmatpush3.msra.mxu1 %v896_v33  ;;  %v792_v33 = vld [vmem:[%s3635_s6 + $0x90] sm:$0xff] }
 0x10a   : > { %2241 = vmatprep.subr.mxu1 %v893_v34 }
 0x10b   : > { %2242 = vmatpush3.msra.mxu1 %v893_v34  ;;  %v842_v34 = vld [vmem:[%s3635_s6 + $0x220] sm:$0xff] }
 0x10c   : > { %2243 = vmatprep.subr.mxu1 %v890_v35 }
 0x10d   : > { %2244 = vmatpush3.msra.mxu1 %v890_v35  ;;  %v790_v35 = vld [vmem:[%s3635_s6 + $0x80] sm:$0xff] }
 0x10e   : > { %2245 = vmatprep.subr.mxu1 %v887_v36 }
 0x10f   : > { %2246 = vmatpush3.msra.mxu1 %v887_v36  ;;  %v794_v36 = vld [vmem:[%s3635_s6 + $0xa0] sm:$0xff] }
 0x110   : > { %2247 = vmatprep.subr.mxu1 %v884_v37 }
 0x111   : > { %2248 = vmatpush3.msra.mxu1 %v884_v37  ;;  %v789_v37 = vld [vmem:[%s3635_s6 + $0x78] sm:$0xff] }
 0x112   : > { %2249 = vmatprep.subr.mxu1 %v881_v38 }
 0x113   : > { %2250 = vmatpush3.msra.mxu1 %v881_v38  ;;  %v839_v38 = vld [vmem:[%s3635_s6 + $0x208] sm:$0xff] }
 0x114   : > { %2251 = vmatprep.subr.mxu1 %v878_v41 }
 0x115   : > { %2252 = vmatpush3.msra.mxu1 %v878_v41  ;;  %v786_v41 = vld [vmem:[%s3635_s6 + $0x60] sm:$0xff] }
 0x116   : > { %2253 = vmatprep.subr.mxu1 %v875_v47 }
 0x117   : > { %2254 = vmatpush3.msra.mxu1 %v875_v47  ;;  %v788_v47 = vld [vmem:[%s3635_s6 + $0x70] sm:$0xff] }
 0x118   : > { %2255 = vmatprep.subr.mxu1 %v872_v50 }
 0x119   : > { %2256 = vmatpush3.msra.mxu1 %v872_v50  ;;  %v781_v50 = vld [vmem:[%s3635_s6 + $0x38] sm:$0xff] }
 0x11a   : > { %2098 = vmatprep.subr.mxu1 %v869_v53  ;;  %v780_v53 = vld [vmem:[%s3635_s6 + $0x30] sm:$0xff] }
 0x1ba   : > { %v2224_v55 = vpop.f32.mrf.mxu1 }
 0x1bb   : > { %v769_v56 = vadd.f32 %v2224_v55, %v2014_v54  ;;  %v778_v55 = vld [vmem:[%s3635_s6 + $0x20] sm:$0xff] }
 0x1bc   : > { %v763_v57 = vpop.f32.mrf.mxu1 }
 0x1bd   : > { %v764_v58 = vadd.f32 %v2014_v54, %v763_v57  ;;  %v773_v61 = vmax.f32 %v769_v56, 0.0  ;;  %v830_v54 = vld [vmem:[%s3635_s6 + $0x1c0] sm:$0xff]  ;;  %v777_v57 = vld [vmem:[%s3635_s6 + $0x18] sm:$0xff] }
 0x1be   : > { %v782_v56 = vld [vmem:[%s3635_s6 + $0x40] sm:$0xff] }
 0x1bf   : > { %v772_v59 = vmax.f32 %v764_v58, 0.0  ;;  %v827_v58 = vld [vmem:[%s3635_s6 + $0x1a8] sm:$0xff] }
 0x1c1   : > { %983 = vmatmul.mubr.f32.vlgmr.msra.gmra.mxu0 %v772_v59  ;;  %2257 = vmatprep.mubr.f32.mxu1 %v772_v59  ;;  %v775_v59 = vld [vmem:[%s3635_s6 + $0x8] sm:$0xff] }
 0x1c2   : > { %1071 = vmatpush1.msra.mxu0 %v819_v60  ;;  %2258 = vmatmul.mubr.f32.vlgmr.msra.gmra.mxu1 %v773_v61  ;;  %v779_v60 = vld [vmem:[%s3635_s6 + $0x28] sm:$0xff] }
 0x1c3   : > { %1072 = vmatprep.subr.mxu0 %v817_v62  ;;  %2099 = vmatpush3.msra.mxu1 %v821_v63  ;;  %v824_v62 = vld [vmem:[%s3635_s6 + $0x190] sm:$0xff] }
 0x1c4   : > { %1073 = vmatpush1.msra.mxu0 %v816_v0  ;;  %2100 = vmatprep.subr.mxu1 %v866_v1  ;;  %v868_v63 = vld [vmem:[%s3635_s6 + $0x2f0] sm:$0xff]  ;;  %v867_v1 = vld [vmem:[%s3635_s6 + $0x2e8] sm:$0xff] }
 0x1c5   : > { %988 = vmatprep.mubr.f32.mxu0 %v2403_v52  ;;  %1074 = vmatprep.subr.mxu0 %v814_v2  ;;  %v776_v0 = vld [vmem:[%s3635_s6 + $0x10] sm:$0xff]  ;;  %v1253_v2 = vld [vmem:[%s3637_s8 + $0xf8] sm:$0xff] }
 0x1c6   : > { %2101 = vmatpush3.msra.mxu1 %v818_v3  ;;  %989 = vmatmul.mubr.f32.gmra.mxu0 %v773_v61  ;;  %v774_v61 = vld [vmem:[%s3635_s6] sm:$0xff]  ;;  %v865_v3 = vld [vmem:[%s3635_s6 + $0x2d8] sm:$0xff] }
 0x1c7   : > { %1075 = vmatpush1.msra.mxu0 %v813_v4  ;;  %2102 = vmatprep.subr.mxu1 %v863_v5  ;;  %v1252_v4 = vld [vmem:[%s3637_s8 + $0xf0] sm:$0xff] }
 0x1c8   : > { %1076 = vmatprep.subr.mxu0 %v811_v6  ;;  %2103 = vmatpush3.msra.mxu1 %v815_v7  ;;  %v864_v5 = vld [vmem:[%s3635_s6 + $0x2d0] sm:$0xff]  ;;  %v1251_v6 = vld [vmem:[%s3637_s8 + $0xe8] sm:$0xff]  ;;  %v862_v7 = vld [vmem:[%s3635_s6 + $0x2c0] sm:$0xff] }
 0x1c9   : > { %1077 = vmatpush1.msra.mxu0 %v810_v8  ;;  %2104 = vmatprep.subr.mxu1 %v860_v9  ;;  %v1250_v8 = vld [vmem:[%s3637_s8 + $0xe0] sm:$0xff]  ;;  %v861_v9 = vld [vmem:[%s3635_s6 + $0x2b8] sm:$0xff] }
 0x1ca   : > { %1078 = vmatprep.subr.mxu0 %v808_v10  ;;  %2105 = vmatpush3.msra.mxu1 %v812_v11  ;;  %v1249_v10 = vld [vmem:[%s3637_s8 + $0xd8] sm:$0xff]  ;;  %v859_v11 = vld [vmem:[%s3635_s6 + $0x2a8] sm:$0xff] }
 0x1cb   : > { %1079 = vmatpush1.msra.mxu0 %v807_v12  ;;  %2106 = vmatprep.subr.mxu1 %v857_v14  ;;  %v1248_v12 = vld [vmem:[%s3637_s8 + $0xd0] sm:$0xff]  ;;  %v858_v14 = vld [vmem:[%s3635_s6 + $0x2a0] sm:$0xff] }
 0x1cc   : > { %1080 = vmatprep.subr.mxu0 %v805_v15  ;;  %2107 = vmatpush3.msra.mxu1 %v809_v16  ;;  %v1247_v15 = vld [vmem:[%s3637_s8 + $0xc8] sm:$0xff]  ;;  %v856_v16 = vld [vmem:[%s3635_s6 + $0x290] sm:$0xff] }
 0x1cd   : > { %1081 = vmatpush1.msra.mxu0 %v804_v17  ;;  %2108 = vmatprep.subr.mxu1 %v854_v18  ;;  %v1246_v17 = vld [vmem:[%s3637_s8 + $0xc0] sm:$0xff]  ;;  %v855_v18 = vld [vmem:[%s3635_s6 + $0x288] sm:$0xff] }
 0x1ce   : > { %1082 = vmatprep.subr.mxu0 %v802_v19  ;;  %2109 = vmatpush3.msra.mxu1 %v806_v20  ;;  %v1245_v19 = vld [vmem:[%s3637_s8 + $0xb8] sm:$0xff] }
 0x1cf   : > { %1083 = vmatpush1.msra.mxu0 %v801_v21  ;;  %2110 = vmatprep.subr.mxu1 %v851_v22  ;;  %v853_v20 = vld [vmem:[%s3635_s6 + $0x278] sm:$0xff]  ;;  %v1244_v21 = vld [vmem:[%s3637_s8 + $0xb0] sm:$0xff] }
 0x1d0   : > { %1084 = vmatprep.subr.mxu0 %v799_v23  ;;  %2111 = vmatpush3.msra.mxu1 %v803_v24  ;;  %v852_v22 = vld [vmem:[%s3635_s6 + $0x270] sm:$0xff]  ;;  %v1243_v23 = vld [vmem:[%s3637_s8 + $0xa8] sm:$0xff]  ;;  %v850_v24 = vld [vmem:[%s3635_s6 + $0x260] sm:$0xff] }
 0x1d1   : > { %1085 = vmatpush1.msra.mxu0 %v798_v25  ;;  %2112 = vmatprep.subr.mxu1 %v848_v26  ;;  %v1242_v25 = vld [vmem:[%s3637_s8 + $0xa0] sm:$0xff]  ;;  %v849_v26 = vld [vmem:[%s3635_s6 + $0x258] sm:$0xff] }
 0x1d2   : > { %1086 = vmatprep.subr.mxu0 %v796_v27  ;;  %2113 = vmatpush3.msra.mxu1 %v800_v28  ;;  %v1241_v27 = vld [vmem:[%s3637_s8 + $0x98] sm:$0xff]  ;;  %v847_v28 = vld [vmem:[%s3635_s6 + $0x248] sm:$0xff] }
 0x1d3   : > { %1087 = vmatpush1.msra.mxu0 %v795_v29  ;;  %2114 = vmatprep.subr.mxu1 %v845_v30  ;;  %v1240_v29 = vld [vmem:[%s3637_s8 + $0x90] sm:$0xff]  ;;  %v846_v30 = vld [vmem:[%s3635_s6 + $0x240] sm:$0xff] }
 0x1d4   : > { %1088 = vmatprep.subr.mxu0 %v793_v31  ;;  %2115 = vmatpush3.msra.mxu1 %v797_v32  ;;  %v1239_v31 = vld [vmem:[%s3637_s8 + $0x88] sm:$0xff]  ;;  %v844_v32 = vld [vmem:[%s3635_s6 + $0x230] sm:$0xff] }
 0x1d5   : > { %1089 = vmatpush1.msra.mxu0 %v792_v33  ;;  %2116 = vmatprep.subr.mxu1 %v842_v34  ;;  %v1238_v33 = vld [vmem:[%s3637_s8 + $0x80] sm:$0xff]  ;;  %v843_v34 = vld [vmem:[%s3635_s6 + $0x228] sm:$0xff] }
 0x1d6   : > { %1090 = vmatprep.subr.mxu0 %v790_v35  ;;  %2117 = vmatpush3.msra.mxu1 %v794_v36  ;;  %v1237_v35 = vld [vmem:[%s3637_s8 + $0x78] sm:$0xff] }
 0x1d7   : > { %1091 = vmatpush1.msra.mxu0 %v789_v37  ;;  %2118 = vmatprep.subr.mxu1 %v839_v38  ;;  %v841_v36 = vld [vmem:[%s3635_s6 + $0x218] sm:$0xff]  ;;  %v1236_v37 = vld [vmem:[%s3637_s8 + $0x70] sm:$0xff] }
 0x1d8   : > { %1092 = vmatprep.subr.mxu0 %v787_v39  ;;  %2119 = vmatpush3.msra.mxu1 %v791_v40  ;;  %v840_v38 = vld [vmem:[%s3635_s6 + $0x210] sm:$0xff]  ;;  %v1235_v39 = vld [vmem:[%s3637_s8 + $0x68] sm:$0xff]  ;;  %v838_v40 = vld [vmem:[%s3635_s6 + $0x200] sm:$0xff] }
 0x1d9   : > { %1093 = vmatpush1.msra.mxu0 %v786_v41  ;;  %2120 = vmatprep.subr.mxu1 %v836_v42  ;;  %v1234_v41 = vld [vmem:[%s3637_s8 + $0x60] sm:$0xff]  ;;  %v837_v42 = vld [vmem:[%s3635_s6 + $0x1f8] sm:$0xff] }
 0x1da   : > { %1094 = vmatprep.subr.mxu0 %v784_v46  ;;  %2121 = vmatpush3.msra.mxu1 %v788_v47  ;;  %v1233_v46 = vld [vmem:[%s3637_s8 + $0x58] sm:$0xff]  ;;  %v835_v47 = vld [vmem:[%s3635_s6 + $0x1e8] sm:$0xff] }
 0x1db   : > { %1095 = vmatpush1.msra.mxu0 %v783_v48  ;;  %2122 = vmatprep.subr.mxu1 %v833_v49  ;;  %v1232_v48 = vld [vmem:[%s3637_s8 + $0x50] sm:$0xff]  ;;  %v834_v49 = vld [vmem:[%s3635_s6 + $0x1e0] sm:$0xff] }
 0x1dc   : > { %1096 = vmatprep.subr.mxu0 %v781_v50  ;;  %2123 = vmatpush3.msra.mxu1 %v785_v51  ;;  %v1231_v50 = vld [vmem:[%s3637_s8 + $0x48] sm:$0xff]  ;;  %v832_v51 = vld [vmem:[%s3635_s6 + $0x1d0] sm:$0xff] }
 0x1dd   : > { %1097 = vmatpush1.msra.mxu0 %v780_v53  ;;  %2124 = vmatprep.subr.mxu1 %v830_v54  ;;  %v1230_v53 = vld [vmem:[%s3637_s8 + $0x40] sm:$0xff]  ;;  %v831_v54 = vld [vmem:[%s3635_s6 + $0x1c8] sm:$0xff] }
 0x1de   : > { %1098 = vmatprep.subr.mxu0 %v778_v55  ;;  %2125 = vmatpush3.msra.mxu1 %v782_v56  ;;  %v1229_v55 = vld [vmem:[%s3637_s8 + $0x38] sm:$0xff] }
 0x1df   : > { %1099 = vmatpush1.msra.mxu0 %v777_v57  ;;  %2126 = vmatprep.subr.mxu1 %v827_v58  ;;  %v829_v56 = vld [vmem:[%s3635_s6 + $0x1b8] sm:$0xff]  ;;  %v1228_v57 = vld [vmem:[%s3637_s8 + $0x30] sm:$0xff] }
 0x1e0   : > { %1100 = vmatprep.subr.mxu0 %v775_v59  ;;  %2127 = vmatpush3.msra.mxu1 %v779_v60  ;;  %v828_v58 = vld [vmem:[%s3635_s6 + $0x1b0] sm:$0xff]  ;;  %v1227_v59 = vld [vmem:[%s3637_s8 + $0x28] sm:$0xff]  ;;  %v826_v60 = vld [vmem:[%s3635_s6 + $0x1a0] sm:$0xff] }
 0x1e1   : > { %1101 = vmatpush1.msra.mxu0 %v774_v61  ;;  %2128 = vmatprep.subr.mxu1 %v824_v62  ;;  %v1226_v61 = vld [vmem:[%s3637_s8 + $0x20] sm:$0xff]  ;;  %v825_v62 = vld [vmem:[%s3635_s6 + $0x198] sm:$0xff] }
 0x1e2   : > { %1102 = vmatprep.subr.mxu0 %v868_v63  ;;  %2129 = vmatpush3.msra.mxu1 %v776_v0  ;;  %v1225_v63 = vld [vmem:[%s3637_s8 + $0x18] sm:$0xff]  ;;  %v823_v0 = vld [vmem:[%s3635_s6 + $0x188] sm:$0xff] }
 0x1e3   : > { %1211 = vmatprep.mubr.f32.mxu1 %v2545_v13  ;;  %1103 = vmatpush2.msra.mxu0 %v867_v1  ;;  %v1224_v1 = vld [vmem:[%s3637_s8 + $0x10] sm:$0xff] }
 0x1e4   : > { %1212 = vmatmul.mubr.f32.vlgmr.msra.gmra.mxu1 %v2636_v43  ;;  %1254 = vmatprep.subr.mxu1 %v1253_v2  ;;  %v822_v2 = vld [vmem:[%s3635_s6 + $0x180] sm:$0xff] }
 0x1e5   : > { %1104 = vmatprep.subr.mxu0 %v865_v3  ;;  %1255 = vmatpush1.msra.mxu1 %v1252_v4  ;;  %v1223_v3 = vld [vmem:[%s3637_s8 + $0x8] sm:$0xff]  ;;  %v1222_v4 = vld [vmem:[%s3637_s8] sm:$0xff] }
 0x1e6   : > { %1105 = vmatpush2.msra.mxu0 %v864_v5  ;;  %1256 = vmatprep.subr.mxu1 %v1251_v6  ;;  %v3214_v5 = vld [vmem:[%s543_s0] sm:$0xff]  ;;  %v3221_v6 = vld [vmem:[%s543_s0 + $0x8] sm:$0xff]  ;;  %s3437_s0 = scalar_lea.vmem %s3645_s16, %s2365_s27 }
 0x1e7   : > { %1106 = vmatprep.subr.mxu0 %v862_v7  ;;  %1216 = vmatprep.mubr.f32.mxu1 %v2639_v44  ;;  %v1384_v7 = vld [vmem:[%s3639_s10 + $0x58] sm:$0xff] }
 0x1e8   : > { %1257 = vmatpush1.msra.mxu1 %v1250_v8  ;;  %1107 = vmatpush2.msra.mxu0 %v861_v9  ;;  %v1383_v8 = vld [vmem:[%s3639_s10 + $0x50] sm:$0xff]  ;;  %v1382_v9 = vld [vmem:[%s3639_s10 + $0x48] sm:$0xff] }
 0x1e9   : > { %1217 = vmatmul.mubr.f32.gmra.mxu1 %v2644_v45  ;;  %1258 = vmatprep.subr.mxu1 %v1249_v10  ;;  %v1381_v10 = vld [vmem:[%s3639_s10 + $0x40] sm:$0xff] }
 0x1ea   : > { %1108 = vmatprep.subr.mxu0 %v859_v11  ;;  %1259 = vmatpush1.msra.mxu1 %v1248_v12  ;;  %v1380_v11 = vld [vmem:[%s3639_s10 + $0x38] sm:$0xff]  ;;  %v1379_v12 = vld [vmem:[%s3639_s10 + $0x30] sm:$0xff] }
 0x1eb   : > { %1109 = vmatpush2.msra.mxu0 %v858_v14  ;;  %1260 = vmatprep.subr.mxu1 %v1247_v15  ;;  %v1378_v14 = vld [vmem:[%s3639_s10 + $0x28] sm:$0xff]  ;;  %v1377_v15 = vld [vmem:[%s3639_s10 + $0x20] sm:$0xff] }
 0x1ec   : > { %1110 = vmatprep.subr.mxu0 %v856_v16  ;;  %1261 = vmatpush1.msra.mxu1 %v1246_v17  ;;  %v1376_v16 = vld [vmem:[%s3639_s10 + $0x18] sm:$0xff]  ;;  %v1375_v17 = vld [vmem:[%s3639_s10 + $0x10] sm:$0xff] }
 0x1ed   : > { %1111 = vmatpush2.msra.mxu0 %v855_v18  ;;  %1262 = vmatprep.subr.mxu1 %v1245_v19  ;;  %v1374_v18 = vld [vmem:[%s3639_s10 + $0x8] sm:$0xff]  ;;  %v1373_v19 = vld [vmem:[%s3639_s10] sm:$0xff] }
 0x1ee   : > { %1112 = vmatprep.subr.mxu0 %v853_v20  ;;  %1263 = vmatpush1.msra.mxu1 %v1244_v21  ;;  %v1498_v20 = vld [vmem:[%s3641_s12 + $0x78] sm:$0xff]  ;;  %v1497_v21 = vld [vmem:[%s3641_s12 + $0x70] sm:$0xff] }
 0x1ef   : > { %1113 = vmatpush2.msra.mxu0 %v852_v22  ;;  %1264 = vmatprep.subr.mxu1 %v1243_v23  ;;  %v1496_v22 = vld [vmem:[%s3641_s12 + $0x68] sm:$0xff] }
 0x1f0   : > { %1114 = vmatprep.subr.mxu0 %v850_v24  ;;  %1265 = vmatpush1.msra.mxu1 %v1242_v25 }
 0x1f1   : > { %1115 = vmatpush2.msra.mxu0 %v849_v26  ;;  %1266 = vmatprep.subr.mxu1 %v1241_v27 }
 0x1f2   : > { %1116 = vmatprep.subr.mxu0 %v847_v28  ;;  %1267 = vmatpush1.msra.mxu1 %v1240_v29 }
 0x1f3   : > { %1117 = vmatpush2.msra.mxu0 %v846_v30  ;;  %1268 = vmatprep.subr.mxu1 %v1239_v31 }
 0x1f4   : > { %1118 = vmatprep.subr.mxu0 %v844_v32  ;;  %1269 = vmatpush1.msra.mxu1 %v1238_v33 }
 0x1f5   : > { %1119 = vmatpush2.msra.mxu0 %v843_v34  ;;  %1270 = vmatprep.subr.mxu1 %v1237_v35  ;;  %v1333_v34 = vlaneseq }
 0x1f6   : > { %1120 = vmatprep.subr.mxu0 %v841_v36  ;;  %1271 = vmatpush1.msra.mxu1 %v1236_v37 }
 0x1f7   : > { %1121 = vmatpush2.msra.mxu0 %v840_v38  ;;  %1272 = vmatprep.subr.mxu1 %v1235_v39  ;;  %v3286_v36 = vshrl.u32 %v1333_v34, 7  ;;  %v1648_v34 = vld [vmem:[%s3643_s14 + $0x208] sm:$0xff] }
 0x1f8   : > { %1122 = vmatprep.subr.mxu0 %v838_v40  ;;  %1273 = vmatpush1.msra.mxu1 %v1234_v41  ;;  %v1331_v40 = vld [vmem:[%s3638_s9] sm:$0x3] }
 0x1f9   : > { %1123 = vmatpush2.msra.mxu0 %v837_v42  ;;  %1274 = vmatprep.subr.mxu1 %v1233_v46  ;;  %v1335_v38 = vsub.s32 0, %v3286_v36  ;;  %v1339_v41 = vsub.s32 1, %v3286_v36 }
 0x1fa   : > { %1124 = vmatprep.subr.mxu0 %v835_v47  ;;  %1275 = vmatpush1.msra.mxu1 %v1232_v48 }
 0x1fb   : > { %1125 = vmatpush2.msra.mxu0 %v834_v49  ;;  %1276 = vmatprep.subr.mxu1 %v1231_v50  ;;  %v1336_v47 = vrot.slane %v1331_v40, %v1335_v38 }
 0x1fc   : > { %1126 = vmatprep.subr.mxu0 %v832_v51  ;;  %1277 = vmatpush1.msra.mxu1 %v1230_v53  ;;  %v1340_v53 = vrot.slane %v1331_v40, %v1339_v41  ;;  %v1638_v40 = vld [vmem:[%s3643_s14 + $0x1b8] sm:$0xff] }
 0x1fd   : > { %1127 = vmatpush2.msra.mxu0 %v831_v54  ;;  %1278 = vmatprep.subr.mxu1 %v1229_v55 }
 0x1fe   : > { %1128 = vmatprep.subr.mxu0 %v829_v56  ;;  %1279 = vmatpush1.msra.mxu1 %v1228_v57 }
 0x1ff   : > { %1129 = vmatpush2.msra.mxu0 %v828_v58  ;;  %1280 = vmatprep.subr.mxu1 %v1227_v59 }
 0x200   : > { %1130 = vmatprep.subr.mxu0 %v826_v60  ;;  %1281 = vmatpush1.msra.mxu1 %v1226_v61 }
 0x201   : > { %1131 = vmatpush2.msra.mxu0 %v825_v62  ;;  %1282 = vmatprep.subr.mxu1 %v1225_v63 }
 0x202   : > { %1132 = vmatprep.subr.mxu0 %v823_v0  ;;  %1283 = vmatpush1.msra.mxu1 %v1224_v1 }
 0x203   : > { %1133 = vmatpush2.msra.mxu0 %v822_v2  ;;  %1134 = vmatprep.mubr.f32.mxu0 %v2545_v13  ;;  %v1388_v13 = vld [vmem:[%s3639_s10 + $0x78] sm:$0xff] }
 0x204   : > { %1284 = vmatprep.subr.mxu1 %v1223_v3  ;;  %1135 = vmatmul.mubr.f32.vlgmr.msra.gmra.mxu0 %v2636_v43  ;;  %v1387_v43 = vld [vmem:[%s3639_s10 + $0x70] sm:$0xff] }
 0x205   : > { %1285 = vmatpush1.msra.mxu1 %v1222_v4  ;;  %1318 = vmatprep.mubr.f32.mxu1 %v2403_v52 }
 0x206   : > { %1319 = vmatmul.mubr.f32.vlgmr.msra.gmra.mxu1 %v3214_v5  ;;  %1140 = vmatprep.mubr.f32.mxu0 %v2639_v44  ;;  %v1386_v44 = vld [vmem:[%s3639_s10 + $0x68] sm:$0xff] }
 0x207   : > { %1324 = vmatprep.mubr.f32.mxu1 %v2403_v52  ;;  %2260 = vmatprep.subr.mxu0 %v1388_v13 }
 0x208   : > { %1141 = vmatmul.mubr.f32.gmra.mxu0 %v2644_v45  ;;  %v1385_v45 = vld [vmem:[%s3639_s10 + $0x60] sm:$0xff]  ;;  %2295 = vmatprep.subr.mxu1 %v1498_v20 }
 0x209   : > { %2261 = vmatpush3.msra.mxu0 %v1388_v13  ;;  %2296 = vmatpush3.msra.mxu1 %v1498_v20  ;;  %v1488_v20 = vld [vmem:[%s3641_s12 + $0x28] sm:$0xff] }
 0x20a   : > { %1325 = vmatmul.mubr.f32.gmra.mxu1 %v3221_v6  ;;  %2262 = vmatprep.subr.mxu0 %v1387_v43 }
 0x20b   : > { %2263 = vmatpush3.msra.mxu0 %v1387_v43  ;;  %2297 = vmatprep.subr.mxu1 %v1497_v21 }
 0x20c   : > { %2264 = vmatprep.subr.mxu0 %v1386_v44  ;;  %2298 = vmatpush3.msra.mxu1 %v1497_v21  ;;  %v1487_v21 = vld [vmem:[%s3641_s12 + $0x20] sm:$0xff] }
 0x20d   : > { %2265 = vmatpush3.msra.mxu0 %v1386_v44  ;;  %2299 = vmatprep.subr.mxu1 %v1496_v22 }
 0x20e   : > { %2266 = vmatprep.subr.mxu0 %v1385_v45  ;;  %2300 = vmatpush3.msra.mxu1 %v1496_v22  ;;  %v1486_v22 = vld [vmem:[%s3641_s12 + $0x18] sm:$0xff] }
 0x20f   : > { %2267 = vmatpush3.msra.mxu0 %v1385_v45 }
 0x210   : > { %2268 = vmatprep.subr.mxu0 %v1384_v7 }
 0x211   : > { %2269 = vmatpush3.msra.mxu0 %v1384_v7 }
 0x212   : > { %2270 = vmatprep.subr.mxu0 %v1383_v8 }
 0x213   : > { %2271 = vmatpush3.msra.mxu0 %v1383_v8 }
 0x214   : > { %2272 = vmatprep.subr.mxu0 %v1382_v9 }
 0x215   : > { %2273 = vmatpush3.msra.mxu0 %v1382_v9 }
 0x216   : > { %2274 = vmatprep.subr.mxu0 %v1381_v10 }
 0x217   : > { %2275 = vmatpush3.msra.mxu0 %v1381_v10 }
 0x218   : > { %2276 = vmatprep.subr.mxu0 %v1380_v11 }
 0x219   : > { %2277 = vmatpush3.msra.mxu0 %v1380_v11 }
 0x21a   : > { %2278 = vmatprep.subr.mxu0 %v1379_v12 }
 0x21b   : > { %2279 = vmatpush3.msra.mxu0 %v1379_v12  ;;  %v1495_v12 = vld [vmem:[%s3641_s12 + $0x60] sm:$0xff] }
 0x21c   : > { %2280 = vmatprep.subr.mxu0 %v1378_v14  ;;  %2301 = vmatprep.subr.mxu1 %v1495_v12 }
 0x21d   : > { %2281 = vmatpush3.msra.mxu0 %v1378_v14  ;;  %2302 = vmatpush3.msra.mxu1 %v1495_v12  ;;  %v1494_v14 = vld [vmem:[%s3641_s12 + $0x58] sm:$0xff] }
 0x21e   : > { %2282 = vmatprep.subr.mxu0 %v1377_v15  ;;  %2303 = vmatprep.subr.mxu1 %v1494_v14 }
 0x21f   : > { %2283 = vmatpush3.msra.mxu0 %v1377_v15  ;;  %2304 = vmatpush3.msra.mxu1 %v1494_v14  ;;  %v1493_v15 = vld [vmem:[%s3641_s12 + $0x50] sm:$0xff] }
 0x220   : > { %2284 = vmatprep.subr.mxu0 %v1376_v16  ;;  %2305 = vmatprep.subr.mxu1 %v1493_v15 }
 0x221   : > { %2285 = vmatpush3.msra.mxu0 %v1376_v16  ;;  %2306 = vmatpush3.msra.mxu1 %v1493_v15  ;;  %v1492_v16 = vld [vmem:[%s3641_s12 + $0x48] sm:$0xff] }
 0x222   : > { %2286 = vmatprep.subr.mxu0 %v1375_v17  ;;  %2307 = vmatprep.subr.mxu1 %v1492_v16 }
 0x223   : > { %2287 = vmatpush3.msra.mxu0 %v1375_v17  ;;  %v1491_v17 = vld [vmem:[%s3641_s12 + $0x40] sm:$0xff]  ;;  %2308 = vmatpush3.msra.mxu1 %v1492_v16 }
 0x224   : > { %2288 = vmatprep.subr.mxu0 %v1374_v18  ;;  %2309 = vmatprep.subr.mxu1 %v1491_v17 }
 0x225   : > { %2289 = vmatpush3.msra.mxu0 %v1374_v18  ;;  %v1490_v18 = vld [vmem:[%s3641_s12 + $0x38] sm:$0xff]  ;;  %2310 = vmatpush3.msra.mxu1 %v1491_v17 }
 0x226   : > { %2290 = vmatprep.subr.mxu0 %v1373_v19  ;;  %2311 = vmatprep.subr.mxu1 %v1490_v18 }
 0x227   : > { %2291 = vmatpush3.msra.mxu0 %v1373_v19  ;;  %v1489_v19 = vld [vmem:[%s3641_s12 + $0x30] sm:$0xff]  ;;  %2312 = vmatpush3.msra.mxu1 %v1490_v18 }
 0x228   : > { %2313 = vmatprep.subr.mxu1 %v1489_v19 }
 0x229   : > { %2314 = vmatpush3.msra.mxu1 %v1489_v19 }
 0x22a   : > { %2315 = vmatprep.subr.mxu1 %v1488_v20 }
 0x22b   : > { %2316 = vmatpush3.msra.mxu1 %v1488_v20  ;;  %v1660_v20 = vld [vmem:[%s3643_s14 + $0x268] sm:$0xff] }
 0x22c   : > { %2317 = vmatprep.subr.mxu1 %v1487_v21 }
 0x22d   : > { %2318 = vmatpush3.msra.mxu1 %v1487_v21  ;;  %v1651_v21 = vld [vmem:[%s3643_s14 + $0x220] sm:$0xff] }
 0x22e   : > { %2319 = vmatprep.subr.mxu1 %v1486_v22 }
 0x22f   : > { %2320 = vmatpush3.msra.mxu1 %v1486_v22  ;;  %v1650_v22 = vld [vmem:[%s3643_s14 + $0x218] sm:$0xff] }
 0x281   : > { %v984_v33 = vpop.f32.mrf.mxu0 }
 0x282   : > { %v2259_v23 = vpop.f32.mrf.mxu1 }
 0x283   : > { %v986_v35 = vpop.f32.mrf.mxu0 }
 0x284   : > { %v1061_v24 = vpop.f32.mrf.mxu1 }
 0x286   : > { %v990_v37 = vpop.f32.mrf.mxu0 }
 0x288   : > { %v992_v39 = vpop.f32.mrf.mxu0 }
 0x2a4   : > { %v2130_v25 = vpop.f32.mrf.mxu1 }
 0x2a6   : > { %v2131_v26 = vpop.f32.mrf.mxu1 }
 0x2a7   : > { %v2132_v27 = vadd.f32 %v2131_v26, %v2130_v25  ;;  %v1483_v25 = vld [vmem:[%s3641_s12] sm:$0xff] }
 0x2a8   : > { %v1659_v26 = vld [vmem:[%s3643_s14 + $0x260] sm:$0xff] }
 0x2a9   : > { %v2133_v28 = vpop.f32.mrf.mxu1  ;;  %v3282_v29 = vadd.f32 %v2132_v27, %v1061_v24  ;;  %v1484_v24 = vld [vmem:[%s3641_s12 + $0x8] sm:$0xff]  ;;  %v1658_v27 = vld [vmem:[%s3643_s14 + $0x258] sm:$0xff]  ;;  %1690 = vmatprep.subr.mxu0 %v1659_v26 }
 0x2aa   : > { %v1640_v26 = vld [vmem:[%s3643_s14 + $0x1c8] sm:$0xff] }
 0x2ab   : > { %v2134_v30 = vpop.f32.mrf.mxu1 }
 0x2ac   : > { %v2135_v31 = vadd.f32 %v2134_v30, %v2133_v28  ;;  %v1661_v28 = vld [vmem:[%s3643_s14 + $0x270] sm:$0xff]  ;;  %v1654_v30 = vld [vmem:[%s3643_s14 + $0x238] sm:$0xff] }
 0x2ae   : > { %v3284_v32 = vadd.f32 %v2259_v23, %v2135_v31  ;;  %v1485_v23 = vld [vmem:[%s3641_s12 + $0x10] sm:$0xff] }
 0x2af   : > { %2321 = vmatprep.subr.mxu1 %v1485_v23  ;;  %v1653_v31 = vld [vmem:[%s3643_s14 + $0x230] sm:$0xff] }
 0x2b0   : > { %2322 = vmatpush3.msra.mxu1 %v1485_v23  ;;  %v1646_v23 = vld [vmem:[%s3643_s14 + $0x1f8] sm:$0xff] }
 0x2b1   : > { %2323 = vmatprep.subr.mxu1 %v1484_v24 }
 0x2b2   : > { %2324 = vmatpush3.msra.mxu1 %v1484_v24  ;;  %v1645_v24 = vld [vmem:[%s3643_s14 + $0x1f0] sm:$0xff] }
 0x2b3   : > { %2325 = vmatprep.subr.mxu1 %v1483_v25 }
 0x2b4   : > { %2326 = vmatpush3.msra.mxu1 %v1483_v25  ;;  %v1641_v25 = vld [vmem:[%s3643_s14 + $0x1d0] sm:$0xff] }
 0x2b5   : > { %1767 = vmatprep.subr.mxu1 %v1661_v28  ;;  %v1635_v28 = vld [vmem:[%s3643_s14 + $0x1a0] sm:$0xff] }
 0x2c4   : > { %v1136_v42 = vpop.f32.mrf.mxu0 }
 0x2c5   : > { %v1137_v46 = vadd.f32 %v1136_v42, %v984_v33  ;;  %v1649_v33 = vld [vmem:[%s3643_s14 + $0x210] sm:$0xff]  ;;  %v1634_v42 = vld [vmem:[%s3643_s14 + $0x198] sm:$0xff] }
 0x2c6   : > { %v1320_v48 = vpop.f32.mrf.mxu1  ;;  %v1138_v49 = vpop.f32.mrf.mxu0 }
 0x2c7   : > { %v1321_v50 = vadd.f32 %v1320_v48, %v1137_v46  ;;  %v1139_v51 = vadd.f32 %v1138_v49, %v986_v35  ;;  %v1644_v35 = vld [vmem:[%s3643_s14 + $0x1e8] sm:$0xff]  ;;  %v1633_v46 = vld [vmem:[%s3643_s14 + $0x190] sm:$0xff] }
 0x2c8   : > { %v1322_v54 = vpop.f32.mrf.mxu1  ;;  %v1142_v55 = vpop.f32.mrf.mxu0  ;;  %v1628_v48 = vld [vmem:[%s3643_s14 + $0x168] sm:$0xff] }
 0x2c9   : > { %v3297_v56 = vadd.f32 %v1336_v47, %v1321_v50  ;;  %v1323_v57 = vadd.f32 %v1322_v54, %v1139_v51  ;;  %v1143_v58 = vadd.f32 %v1142_v55, %v990_v37  ;;  %v1643_v37 = vld [vmem:[%s3643_s14 + $0x1e0] sm:$0xff]  ;;  %v1624_v49 = vld [vmem:[%s3643_s14 + $0x148] sm:$0xff]  ;;  %v1614_v54 = vld [vmem:[%s3643_s14 + $0xf8] sm:$0xff] }
 0x2ca   : > { %v1326_v59 = vpop.f32.mrf.mxu1  ;;  %v1144_v60 = vpop.f32.mrf.mxu0  ;;  %v1623_v50 = vld [vmem:[%s3643_s14 + $0x140] sm:$0xff]  ;;  %v1613_v55 = vld [vmem:[%s3643_s14 + $0xf0] sm:$0xff] }
 0x2cb   : > { %v1344_v61 = vadd.f32 %v1340_v53, %v1323_v57  ;;  %v1327_v62 = vadd.f32 %v1326_v59, %v1143_v58  ;;  %v1145_v63 = vadd.f32 %v1144_v60, %v992_v39  ;;  %v1639_v39 = vld [vmem:[%s3643_s14 + $0x1c0] sm:$0xff]  ;;  %v1609_v57 = vld [vmem:[%s3643_s14 + $0xd0] sm:$0xff]  ;;  %v1608_v58 = vld [vmem:[%s3643_s14 + $0xc8] sm:$0xff] }
 0x2cc   : > { %v1328_v0 = vpop.f32.mrf.mxu1  ;;  %v1619_v51 = vld [vmem:[%s3643_s14 + $0x120] sm:$0xff]  ;;  %v1604_v59 = vld [vmem:[%s3643_s14 + $0xa8] sm:$0xff] }
 0x2cd   : > { %v2016_v1 = vmul.f32 -1.442695, %v1344_v61  ;;  %v3299_v2 = vadd.f32 %v1336_v47, %v1327_v62  ;;  %v1329_v3 = vadd.f32 %v1328_v0, %v1145_v63  ;;  %v1629_v47 = vld [vmem:[%s3643_s14 + $0x170] sm:$0xff]  ;;  %v1603_v60 = vld [vmem:[%s3643_s14 + $0xa0] sm:$0xff]  ;;  %v1598_v62 = vld [vmem:[%s3643_s14 + $0x78] sm:$0xff] }
 0x2ce   : > { %v1599_v61 = vld [vmem:[%s3643_s14 + $0x80] sm:$0xff]  ;;  %v2015_v0 = vmul.f32 -1.442695, %v3297_v56 }
 0x2cf   : > { %2375 = vpow2.f32 %v2016_v1  ;;  %v1346_v4 = vadd.f32 %v1340_v53, %v1329_v3  ;;  %v1618_v53 = vld [vmem:[%s3643_s14 + $0x118] sm:$0xff]  ;;  %v2017_v63 = vmul.f32 -1.442695, %v3299_v2 }
 0x2d1   : > { %v2018_v13 = vmul.f32 -1.442695, %v1346_v4 }
 0x2d3   : > { %2377 = vpow2.f32 %v2018_v13 }
 0x2dc   : > { %v2376_v43 = vpop.eup %2375 }
 0x2dd   : > { %v1360_v44 = vadd.f32 1.0, %v2376_v43 }
 0x2df   : > { %2379 = vrcp.f32 %v1360_v44  ;;  %v2019_v44 = vld [vmem:[%s3640_s11] ss:$0 sm:$0xff] }
 0x2e0   : > { %v2378_v45 = vpop.eup %2377 }
 0x2e1   : > { %v1362_v7 = vadd.f32 1.0, %v2378_v45 }
 0x2e3   : > { %2381 = vrcp.f32 %v1362_v7 }
 0x2e4   : > { %2383 = vpow2.f32 %v2017_v63  ;;  %v1586_v63 = vld [vmem:[%s3643_s14 + $0x18] sm:$0xff] }
 0x2e5   : > { %2385 = vpow2.f32 %v2015_v0  ;;  %v1585_v0 = vld [vmem:[%s3643_s14 + $0x10] sm:$0xff] }
 0x2ec   : > { %v2380_v8 = vpop.eup %2379 }
 0x2ed   : > { %v1371_v9 = vmul.f32 %v2380_v8, %v3214_v5 }
 0x2ef   : > { %2292 = vmatprep.mubr.f32.mxu0 %v1371_v9 }
 0x2f0   : > { %v2382_v10 = vpop.eup %2381 }
 0x2f1   : > { %v1372_v11 = vmul.f32 %v2382_v10, %v3221_v6  ;;  %v2384_v1 = vpop.eup %2383 }
 0x2f2   : > { %v2386_v3 = vpop.eup %2385  ;;  %v1361_v4 = vadd.f32 1.0, %v2384_v1  ;;  %v1662_v1 = vld [vmem:[%s3643_s14 + $0x278] sm:$0xff] }
 0x2f3   : > { %2293 = vmatmul.mubr.f32.vlgmr.msra.gmra.mxu0 %v1372_v11  ;;  %v1359_v13 = vadd.f32 1.0, %v2386_v3 }
 0x2f4   : > { %1754 = vmatprep.mubr.f32.mxu0 %v2403_v52  ;;  %1691 = vmatpush1.msra.mxu0 %v1658_v27  ;;  %2387 = vrcp.f32 %v1361_v4  ;;  %v1636_v27 = vld [vmem:[%s3643_s14 + $0x1a8] sm:$0xff]  ;;  %v2020_v4 = vld [vmem:[%s3642_s13] ss:$0 sm:$0xff] }
 0x2f5   : > { %1692 = vmatprep.subr.mxu0 %v1654_v30  ;;  %2389 = vrcp.f32 %v1359_v13  ;;  %v1631_v30 = vld [vmem:[%s3643_s14 + $0x180] sm:$0xff] }
 0x2f6   : > { %1693 = vmatpush1.msra.mxu0 %v1653_v31  ;;  %v1630_v31 = vld [vmem:[%s3643_s14 + $0x178] sm:$0xff] }
 0x2f7   : > { %1694 = vmatprep.subr.mxu0 %v1649_v33  ;;  %v1626_v33 = vld [vmem:[%s3643_s14 + $0x158] sm:$0xff] }
 0x2f8   : > { %1695 = vmatpush1.msra.mxu0 %v1648_v34  ;;  %v1625_v34 = vld [vmem:[%s3643_s14 + $0x150] sm:$0xff] }
 0x2f9   : > { %1696 = vmatprep.subr.mxu0 %v1644_v35  ;;  %v1621_v35 = vld [vmem:[%s3643_s14 + $0x130] sm:$0xff] }
 0x2fa   : > { %1697 = vmatpush1.msra.mxu0 %v1643_v37  ;;  %v1620_v37 = vld [vmem:[%s3643_s14 + $0x128] sm:$0xff] }
 0x2fb   : > { %1698 = vmatprep.subr.mxu0 %v1639_v39  ;;  %v1616_v39 = vld [vmem:[%s3643_s14 + $0x108] sm:$0xff] }
 0x2fc   : > { %1699 = vmatpush1.msra.mxu0 %v1638_v40  ;;  %v1615_v40 = vld [vmem:[%s3643_s14 + $0x100] sm:$0xff] }
 0x2fd   : > { %1700 = vmatprep.subr.mxu0 %v1634_v42  ;;  %v1611_v42 = vld [vmem:[%s3643_s14 + $0xe0] sm:$0xff] }
 0x2fe   : > { %1701 = vmatpush1.msra.mxu0 %v1633_v46  ;;  %v1610_v46 = vld [vmem:[%s3643_s14 + $0xd8] sm:$0xff] }
 0x2ff   : > { %1702 = vmatprep.subr.mxu0 %v1629_v47  ;;  %v1606_v47 = vld [vmem:[%s3643_s14 + $0xb8] sm:$0xff] }
 0x300   : > { %1703 = vmatpush1.msra.mxu0 %v1628_v48  ;;  %v1605_v48 = vld [vmem:[%s3643_s14 + $0xb0] sm:$0xff] }
 0x301   : > { %1704 = vmatprep.subr.mxu0 %v1624_v49  ;;  %v2388_v9 = vpop.eup %2387  ;;  %v1601_v49 = vld [vmem:[%s3643_s14 + $0x90] sm:$0xff] }
 0x302   : > { %1705 = vmatpush1.msra.mxu0 %v1623_v50  ;;  %v2390_v10 = vpop.eup %2389  ;;  %v1476_v11 = vsub.f32 1.0, %v2388_v9  ;;  %v1594_v50 = vld [vmem:[%s3643_s14 + $0x58] sm:$0xff] }
 0x303   : > { %1706 = vmatprep.subr.mxu0 %v1619_v51  ;;  %v1475_v12 = vsub.f32 1.0, %v2390_v10  ;;  %v1600_v51 = vld [vmem:[%s3643_s14 + $0x88] sm:$0xff] }
 0x304   : > { %1707 = vmatpush1.msra.mxu0 %v1618_v53  ;;  %v1478_v15 = vmul.f32 %v1476_v11, %v3221_v6  ;;  %v1655_v6 = vld [vmem:[%s3643_s14 + $0x240] sm:$0xff]  ;;  %v1593_v53 = vld [vmem:[%s3643_s14 + $0x50] sm:$0xff] }
 0x305   : > { %1708 = vmatprep.subr.mxu0 %v1614_v54  ;;  %v1477_v18 = vmul.f32 %v1475_v12, %v3214_v5  ;;  %v1656_v5 = vld [vmem:[%s3643_s14 + $0x248] sm:$0xff]  ;;  %v1627_v11 = vld [vmem:[%s3643_s14 + $0x160] sm:$0xff]  ;;  %v1622_v12 = vld [vmem:[%s3643_s14 + $0x138] sm:$0xff] }
 0x306   : > { %1709 = vmatpush1.msra.mxu0 %v1613_v55  ;;  %v1596_v54 = vld [vmem:[%s3643_s14 + $0x68] sm:$0xff]  ;;  %v1589_v55 = vld [vmem:[%s3643_s14 + $0x30] sm:$0xff] }
 0x307   : > { %1710 = vmatprep.subr.mxu0 %v1609_v57  ;;  %v1595_v57 = vld [vmem:[%s3643_s14 + $0x60] sm:$0xff] }
 0x308   : > { %1711 = vmatpush1.msra.mxu0 %v1608_v58  ;;  %v1588_v58 = vld [vmem:[%s3643_s14 + $0x28] sm:$0xff] }
 0x309   : > { %1712 = vmatprep.subr.mxu0 %v1604_v59  ;;  %v1591_v59 = vld [vmem:[%s3643_s14 + $0x40] sm:$0xff] }
 0x30a   : > { %1713 = vmatpush1.msra.mxu0 %v1603_v60  ;;  %v1584_v60 = vld [vmem:[%s3643_s14 + $0x8] sm:$0xff] }
 0x30b   : > { %1714 = vmatprep.subr.mxu0 %v1599_v61  ;;  %v1590_v61 = vld [vmem:[%s3643_s14 + $0x38] sm:$0xff] }
 0x30c   : > { %1715 = vmatpush1.msra.mxu0 %v1598_v62  ;;  %v1583_v62 = vld [vmem:[%s3643_s14] sm:$0xff] }
 0x30d   : > { %1716 = vmatprep.subr.mxu0 %v1594_v50 }
 0x30e   : > { %1717 = vmatpush1.msra.mxu0 %v1593_v53 }
 0x30f   : > { %1718 = vmatprep.subr.mxu0 %v1589_v55 }
 0x310   : > { %1719 = vmatpush1.msra.mxu0 %v1588_v58 }
 0x311   : > { %1720 = vmatprep.subr.mxu0 %v1584_v60 }
 0x312   : > { %1721 = vmatpush1.msra.mxu0 %v1583_v62 }
 0x313   : > { %2330 = vmatprep.subr.mxu0 %v1662_v1 }
 0x3b3   : > { %v2294_v43 = vpop.f32.mrf.mxu0 }
 0x3b4   : > { %v1461_v45 = vadd.f32 %v2294_v43, %v3284_v32 }
 0x3b5   : > { %v1455_v7 = vpop.f32.mrf.mxu0 }
 0x3b6   : > { %v1472_v2 = vadd.f32 %v2019_v44, %v1461_v45  ;;  %v1456_v56 = vadd.f32 %v1455_v7, %v3282_v29  ;;  %v1657_v7 = vld [vmem:[%s3643_s14 + $0x250] sm:$0xff] }
 0x3b8   : > { %2391 = vtanh.f32 %v1472_v2  ;;  %v1471_v8 = vadd.f32 %v2019_v44, %v1456_v56  ;;  %v1652_v2 = vld [vmem:[%s3643_s14 + $0x228] sm:$0xff] }
 0x3ba   : > { %2393 = vtanh.f32 %v1471_v8  ;;  %v1647_v8 = vld [vmem:[%s3643_s14 + $0x200] sm:$0xff] }
 0x3c5   : > { %v2392_v14 = vpop.eup %2391 }
 0x3c6   : > { %v1480_v16 = vmul.f32 %v2392_v14, %v2388_v9  ;;  %v1642_v9 = vld [vmem:[%s3643_s14 + $0x1d8] sm:$0xff]  ;;  %v1617_v14 = vld [vmem:[%s3643_s14 + $0x110] sm:$0xff] }
 0x3c7   : > { %v2394_v17 = vpop.eup %2393 }
 0x3c8   : > { %v1479_v32 = vmul.f32 %v2394_v17, %v2390_v10  ;;  %v1482_v19 = vadd.f32 %v1480_v16, %v1478_v15  ;;  %v1632_v10 = vld [vmem:[%s3643_s14 + $0x188] sm:$0xff]  ;;  %v1607_v16 = vld [vmem:[%s3643_s14 + $0xc0] sm:$0xff]  ;;  %v1602_v17 = vld [vmem:[%s3643_s14 + $0x98] sm:$0xff] }
 0x3c9   : > { %v1612_v15 = vld [vmem:[%s3643_s14 + $0xe8] sm:$0xff] }
 0x3ca   : > { %v1481_v29 = vadd.f32 %v1479_v32, %v1477_v18  ;;  %1930 = vst [vmem:[%s3437_s0 + $0x58] sm:$0xff] %v1482_v19  ;;  %v1597_v18 = vld [vmem:[%s3643_s14 + $0x70] sm:$0xff]  ;;  %v1592_v32 = vld [vmem:[%s3643_s14 + $0x48] sm:$0xff] }
 0x3cc   : > { %2327 = vmatprep.mubr.f32.mxu1 %v1481_v29  ;;  %1929 = vst [vmem:[%s3437_s0 + $0x28] sm:$0xff] %v1481_v29  ;;  %v1675_v29 = vsub.s32 2, %v3286_v36 }
 0x3cd   : > { %2328 = vmatmul.mubr.f32.vlgmr.msra.gmra.mxu1 %v1482_v19  ;;  %v1587_v19 = vld [vmem:[%s3643_s14 + $0x20] sm:$0xff] }
 0x3ce   : > { %1768 = vmatpush1.msra.mxu1 %v1660_v20  ;;  %1831 = vmatprep.mubr.f32.mxu1 %v2403_v52  ;;  %v1663_v20 = vld [vmem:[%s3644_s15] sm:$0x1f] }
 0x3cf   : > { %1769 = vmatprep.subr.mxu1 %v1656_v5  ;;  %v1679_v5 = vsub.s32 3, %v3286_v36 }
 0x3d0   : > { %1770 = vmatpush1.msra.mxu1 %v1655_v6  ;;  %v1668_v6 = vrot.slane %v1663_v20, %v1335_v38 }
 0x3d1   : > { %1771 = vmatprep.subr.mxu1 %v1651_v21  ;;  %v1676_v21 = vrot.slane %v1663_v20, %v1675_v29 }
 0x3d2   : > { %1772 = vmatpush1.msra.mxu1 %v1650_v22  ;;  %v1672_v22 = vrot.slane %v1663_v20, %v1339_v41 }
 0x3d3   : > { %1773 = vmatprep.subr.mxu1 %v1646_v23  ;;  %v1680_v23 = vrot.slane %v1663_v20, %v1679_v5 }
 0x3d4   : > { %1774 = vmatpush1.msra.mxu1 %v1645_v24 }
 0x3d5   : > { %1775 = vmatprep.subr.mxu1 %v1641_v25 }
 0x3d6   : > { %1776 = vmatpush1.msra.mxu1 %v1640_v26 }
 0x3d7   : > { %1777 = vmatprep.subr.mxu1 %v1636_v27 }
 0x3d8   : > { %1778 = vmatpush1.msra.mxu1 %v1635_v28 }
 0x3d9   : > { %1779 = vmatprep.subr.mxu1 %v1631_v30 }
 0x3da   : > { %1780 = vmatpush1.msra.mxu1 %v1630_v31 }
 0x3db   : > { %1781 = vmatprep.subr.mxu1 %v1626_v33 }
 0x3dc   : > { %1782 = vmatpush1.msra.mxu1 %v1625_v34 }
 0x3dd   : > { %1783 = vmatprep.subr.mxu1 %v1621_v35 }
 0x3de   : > { %1784 = vmatpush1.msra.mxu1 %v1620_v37 }
 0x3df   : > { %1785 = vmatprep.subr.mxu1 %v1616_v39 }
 0x3e0   : > { %1786 = vmatpush1.msra.mxu1 %v1615_v40 }
 0x3e1   : > { %1787 = vmatprep.subr.mxu1 %v1611_v42 }
 0x3e2   : > { %1788 = vmatpush1.msra.mxu1 %v1610_v46  ;;  %v1683_v46 = vsub.s32 4, %v3286_v36 }
 0x3e3   : > { %1789 = vmatprep.subr.mxu1 %v1606_v47 }
 0x3e4   : > { %1790 = vmatpush1.msra.mxu1 %v1605_v48  ;;  %v1684_v47 = vrot.slane %v1663_v20, %v1683_v46 }
 0x3e5   : > { %1791 = vmatprep.subr.mxu1 %v1601_v49 }
 0x3e6   : > { %1792 = vmatpush1.msra.mxu1 %v1600_v51 }
 0x3e7   : > { %1793 = vmatprep.subr.mxu1 %v1596_v54 }
 0x3e8   : > { %1794 = vmatpush1.msra.mxu1 %v1595_v57 }
 0x3e9   : > { %1795 = vmatprep.subr.mxu1 %v1591_v59 }
 0x3ea   : > { %1796 = vmatpush1.msra.mxu1 %v1590_v61 }
 0x3eb   : > { %1797 = vmatprep.subr.mxu1 %v1586_v63 }
 0x3ec   : > { %1798 = vmatpush1.msra.mxu1 %v1585_v0 }
 0x48d   : > { %v2329_v3 = vpop.f32.mrf.mxu1 }
 0x48e   : > { %v1578_v44 = vadd.f32 %v2329_v3, %v2020_v4 }
 0x48f   : > { %v1572_v13 = vpop.f32.mrf.mxu1 }
 0x490   : > { %v1573_v43 = vadd.f32 %v2020_v4, %v1572_v13  ;;  %v1582_v56 = vmax.f32 %v1578_v44, 0.0 }
 0x492   : > { %v1581_v45 = vmax.f32 %v1573_v43, 0.0 }
 0x494   : > { %1755 = vmatmul.mubr.f32.vlgmr.msra.gmra.mxu0 %v1581_v45  ;;  %1832 = vmatmul.mubr.f32.vlgmr.msra.gmra.mxu1 %v1581_v45 }
 0x495   : > { %2331 = vmatpush3.msra.mxu0 %v1662_v1  ;;  %1760 = vmatprep.mubr.f32.mxu0 %v2403_v52 }
 0x496   : > { %2332 = vmatprep.subr.mxu0 %v1657_v7  ;;  %1837 = vmatprep.mubr.f32.mxu1 %v2403_v52  ;;  %v1637_v52 = vld [vmem:[%s3643_s14 + $0x1b0] sm:$0xff] }
 0x497   : > { %2333 = vmatpush3.msra.mxu0 %v1657_v7 }
 0x498   : > { %2334 = vmatprep.subr.mxu0 %v1652_v2  ;;  %1761 = vmatmul.mubr.f32.gmra.mxu0 %v1582_v56 }
 0x499   : > { %1838 = vmatmul.mubr.f32.gmra.mxu1 %v1582_v56  ;;  %2335 = vmatpush3.msra.mxu0 %v1652_v2 }
 0x49a   : > { %2336 = vmatprep.subr.mxu0 %v1647_v8  ;;  %2362 = vmatprep.mubr.f32.mxu0 %v1581_v45 }
 0x49b   : > { %2337 = vmatpush3.msra.mxu0 %v1647_v8 }
 0x49c   : > { %2338 = vmatprep.subr.mxu0 %v1642_v9 }
 0x49d   : > { %2339 = vmatpush3.msra.mxu0 %v1642_v9 }
 0x49e   : > { %2340 = vmatprep.subr.mxu0 %v1637_v52 }
 0x49f   : > { %2341 = vmatpush3.msra.mxu0 %v1637_v52 }
 0x4a0   : > { %2342 = vmatprep.subr.mxu0 %v1632_v10 }
 0x4a1   : > { %2343 = vmatpush3.msra.mxu0 %v1632_v10 }
 0x4a2   : > { %2344 = vmatprep.subr.mxu0 %v1627_v11 }
 0x4a3   : > { %2345 = vmatpush3.msra.mxu0 %v1627_v11 }
 0x4a4   : > { %2346 = vmatprep.subr.mxu0 %v1622_v12 }
 0x4a5   : > { %2347 = vmatpush3.msra.mxu0 %v1622_v12 }
 0x4a6   : > { %2348 = vmatprep.subr.mxu0 %v1617_v14 }
 0x4a7   : > { %2349 = vmatpush3.msra.mxu0 %v1617_v14 }
 0x4a8   : > { %2350 = vmatprep.subr.mxu0 %v1612_v15 }
 0x4a9   : > { %2351 = vmatpush3.msra.mxu0 %v1612_v15 }
 0x4aa   : > { %2352 = vmatprep.subr.mxu0 %v1607_v16 }
 0x4ab   : > { %2353 = vmatpush3.msra.mxu0 %v1607_v16 }
 0x4ac   : > { %2354 = vmatprep.subr.mxu0 %v1602_v17 }
 0x4ad   : > { %2355 = vmatpush3.msra.mxu0 %v1602_v17 }
 0x4ae   : > { %2356 = vmatprep.subr.mxu0 %v1597_v18 }
 0x4af   : > { %2357 = vmatpush3.msra.mxu0 %v1597_v18 }
 0x4b0   : > { %2358 = vmatprep.subr.mxu0 %v1592_v32 }
 0x4b1   : > { %2359 = vmatpush3.msra.mxu0 %v1592_v32 }
 0x4b2   : > { %2360 = vmatprep.subr.mxu0 %v1587_v19 }
 0x4b3   : > { %2361 = vmatpush3.msra.mxu0 %v1587_v19 }
 0x4b4   : > { %2363 = vmatmul.mubr.f32.vlgmr.msra.gmra.mxu0 %v1582_v56 }
 0x554   : > { %v1756_v24 = vpop.f32.mrf.mxu0  ;;  %v1833_v25 = vpop.f32.mrf.mxu1 }
 0x555   : > { %v1757_v26 = vadd.f32 %v1756_v24, %v1668_v6  ;;  %v1834_v27 = vadd.f32 %v1833_v25, %v1676_v21 }
 0x556   : > { %v1758_v28 = vpop.f32.mrf.mxu0  ;;  %v1835_v30 = vpop.f32.mrf.mxu1 }
 0x557   : > { %1919 = vst [vmem:[%s3437_s0] sm:$0xff] %v1757_v26  ;;  %1921 = vst [vmem:[%s3437_s0 + $0x10] sm:$0xff] %v1834_v27  ;;  %v1759_v31 = vadd.f32 %v1758_v28, %v1672_v22  ;;  %v1836_v38 = vadd.f32 %v1835_v30, %v1680_v23 }
 0x558   : > { %v1762_v33 = vpop.f32.mrf.mxu0 }
 0x559   : > { %1920 = vst [vmem:[%s3437_s0 + $0x8] sm:$0xff] %v1759_v31  ;;  %1922 = vst [vmem:[%s3437_s0 + $0x18] sm:$0xff] %v1836_v38  ;;  %v1763_v34 = vadd.f32 %v1762_v33, %v1668_v6  ;;  %v1839_v41 = vpop.f32.mrf.mxu1 }
 0x55a   : > { %v1840_v35 = vadd.f32 %v1839_v41, %v1676_v21  ;;  %v1764_v37 = vpop.f32.mrf.mxu0 }
 0x55b   : > { %1924 = vst [vmem:[%s3437_s0 + $0x30] sm:$0xff] %v1763_v34  ;;  %v1765_v39 = vadd.f32 %v1764_v37, %v1672_v22  ;;  %v1841_v40 = vpop.f32.mrf.mxu1 }
 0x55c   : > { %1926 = vst [vmem:[%s3437_s0 + $0x40] sm:$0xff] %v1840_v35  ;;  %v1842_v42 = vadd.f32 %v1841_v40, %v1680_v23 }
 0x55d   : > { %1925 = vst [vmem:[%s3437_s0 + $0x38] sm:$0xff] %v1765_v39 }
 0x55e   : > { %1927 = vst [vmem:[%s3437_s0 + $0x48] sm:$0xff] %v1842_v42 }
 0x574   : > { %v2364_v48 = vpop.f32.mrf.mxu0 }
 0x575   : > { %v1916_v51 = vadd.f32 %v2364_v48, %v1684_v47 }
 0x576   : > { %v1910_v49 = vpop.f32.mrf.mxu0 }
 0x577   : > { %v1911_v50 = vadd.f32 %v1910_v49, %v1684_v47  ;;  %1928 = vst [vmem:[%s3437_s0 + $0x50] sm:$0xff] %v1916_v51 }
 0x579   : > { %1923 = vst [vmem:[%s3437_s0 + $0x20] sm:$0xff] %v1911_v50 }
 0x57a PF: > { %s26_s21 = sadd.s32 1, %s2401_s21  }
 0x57b   : > { %p23_p4 = scmp.ge.s32.totalorder %s26_s21, 4  }
 0x57d   :  { %25 = sbr.rel (!%p23_p4) target bundleno = 2 (0x2), region = 117 }

// kernel: raft_spline_forward.53
= control target key start
LH: loop header
LB: loop body
LE: loop exit
PB: predicated region body
PF: predicated region fallthrough
CT: control target
= control target key end

     0   :  { %s1241_s9 = smov 0   ;;  %s1817_s0 = inlined_call_operand.vmem [shape: f32[32,576], index: 0, kind: input, shape index: {}]   ;;  %s1818_s1 = inlined_call_operand.vmem [shape: f32[32,36], index: 1, kind: input, shape index: {}]   ;;  %s1819_s2 = inlined_call_operand.vmem [shape: f32[32,256], index: 2, kind: output, shape index: {}]  }
   0x1 LB: > { %s1013_s10 = sadd.s32 4294967295, %s1187_s9   ;;  %p1017_p0 = scmp.ge.s32.totalorder %s1187_s9, 1  ;;  %s1187_s9 = sphi %s1241_s9, %s12_s9  }
   0x2   : > { %p125_p1 = scmp.lt.s32.totalorder %s1187_s9, 3 }
   0x4   : > { %p126_p2 = pnand %p1017_p0, %p125_p1 }
   0x6   : > { %129 = sbr.rel (%p126_p2) target bundleno = 613 (0x265), region = 28 }
   0xb   : > { %s1018_s11 = sshll.u32 %s1013_s10, 1  ;;  %v1189_v0 = vmov 0   ;;  %s1190_s16 = smov 64   ;;  %v1191_v11 = vmov 1   ;;  %v1192_v12 = vmov 2   ;;  %v1193_v13 = vmov 3  }
   0xc   : > { %p155_p3 = scmp.lt.s32.totalorder %s1018_s11, 3  ;;  %1075 = vset.pattern.permute.xlu1 %v1189_v0  ;;  %1074 = vset.pattern.permute.xlu0 %v1189_v0  ;;  %v1194_v14 = vmov 4   ;;  %v1195_v15 = vmov 5   ;;  %v1196_v16 = vmov 6   ;;  %v1197_v17 = vmov 7  }
   0xd   : > { %v1198_v18 = vmov 8   ;;  %v1199_v19 = vmov 10   ;;  %v1200_v20 = vmov 11   ;;  %v1201_v21 = vmov 9  }
   0xe   : > { %s1845_s11 = smov (!%p155_p3, %s1018_s11), 3  ;;  %v1202_v22 = vmov 12   ;;  %v1203_v23 = vmov 13   ;;  %v1204_v24 = vmov 14   ;;  %v1205_v25 = vmov 15  }
   0xf   : > { %s1028_s12 = smul.u32 40, %s1845_s11  ;;  %s1021_s17 = sshll.u32 %s1845_s11, 3  ;;  %v1206_v26 = vmov 16   ;;  %v1207_v27 = vmov 17   ;;  %v1208_v28 = vmov 21   ;;  %v1209_v57 = vmov 23  }
  0x10   : > { %s165_s20 = scalar_lea.vmem %s1818_s1, %s1021_s17  ;;  %v1210_v60 = vmov 29   ;;  %v1211_v61 = vmov 31   ;;  %v1212_v0 = vmov 18   ;;  %s1027_s21 = sshll.u32 %s1845_s11, 4  ;;  %vm934_vm0 = vcmask 523264  }
  0x11   : > { %s1255_s15 = scalar_lea.vmem %s1817_s0, %s1028_s12  ;;  %v1301_v9 = vld [vmem:[%s165_s20] sm:$0xff]  ;;  %v1303_v10 = vld [vmem:[%s165_s20 + $0x8] sm:$0xff]  ;;  %s172_s24 = scalar_lea.vmem %s1819_s2, %s1027_s21 }
  0x12   : > { %v1258_v1 = vld [vmem:[%s1255_s15 + $0x8] sm:$0xff]  ;;  %v1261_v2 = vld [vmem:[%s1255_s15] sm:$0xff]  ;;  %v1268_v3 = vld [vmem:[%s1255_s15 + $0x30] sm:$0xff] }
  0x13   : > { %200 = vrot.lane.b32.xlu1 %v1258_v1, %s1190_s16  ;;  %188 = vrot.lane.b32.xlu0 %v1261_v2, %s1190_s16  ;;  %v1271_v4 = vld [vmem:[%s1255_s15 + $0x28] sm:$0xff]  ;;  %v1278_v5 = vld [vmem:[%s1255_s15 + $0x38] sm:$0xff] }
  0x14   : > { %v1281_v6 = vld [vmem:[%s1255_s15 + $0x10] sm:$0xff]  ;;  %v1289_v7 = vld [vmem:[%s1255_s15 + $0x40] sm:$0xff]  ;;  %v1292_v8 = vld [vmem:[%s1255_s15 + $0x18] sm:$0xff] }
  0x15   : > { %v1348_v45 = vld [vmem:[%s1255_s15 + $0x20] sm:$0xff]  ;;  %v1355_v52 = vld [vmem:[%s1255_s15 + $0x48] sm:$0xff] }
  0x17   : > { %202 = vrot.lane.b32.xlu1 %v1268_v3, %s1190_s16  ;;  %190 = vrot.lane.b32.xlu0 %v1271_v4, %s1190_s16 }
  0x1b   : > { %214 = vrot.lane.b32.xlu1 %v1278_v5, %s1190_s16  ;;  %212 = vrot.lane.b32.xlu0 %v1281_v6, %s1190_s16 }
  0x1f   : > { %226 = vrot.lane.b32.xlu1 %v1289_v7, %s1190_s16  ;;  %224 = vrot.lane.b32.xlu0 %v1292_v8, %s1190_s16 }
  0x23   : > { %249 = vperm.xlu1 %1075, %v1303_v10   ;;  %244 = vperm.xlu0 %1074, %v1301_v9  }
  0x27   : > { %1076 = vset.pattern.permute.xlu1 %v1191_v11  ;;  %1077 = vset.pattern.permute.xlu0 %v1191_v11 }
  0x28   : > { %257 = vperm.xlu1 %1076, %v1301_v9   ;;  %261 = vperm.xlu0 %1077, %v1303_v10  }
  0x2c   : > { %1078 = vset.pattern.permute.xlu1 %v1192_v12  ;;  %1079 = vset.pattern.permute.xlu0 %v1193_v13  ;;  %v1213_v12 = vmov 19  }
  0x2d   : > { %269 = vperm.xlu1 %1078, %v1301_v9   ;;  %281 = vperm.xlu0 %1079, %v1301_v9  }
  0x31   : > { %273 = vperm.xlu1 %1078, %v1303_v10   ;;  %1082 = vset.pattern.permute.xlu0 %v1194_v14 }
  0x32   : > { %321 = vperm.xlu0 %1082, %v1303_v10  }
  0x35   : > { %1080 = vset.pattern.permute.xlu1 %v1193_v13 }
  0x36   : > { %285 = vperm.xlu1 %1080, %v1303_v10   ;;  %1083 = vset.pattern.permute.xlu0 %v1195_v15 }
  0x37   : > { %337 = vperm.xlu0 %1083, %v1301_v9  }
  0x3a   : > { %1081 = vset.pattern.permute.xlu1 %v1194_v14  ;;  %v1214_v14 = vmov 20  }
  0x3b   : > { %317 = vperm.xlu1 %1081, %v1301_v9   ;;  %1086 = vset.pattern.permute.xlu0 %v1196_v16 }
  0x3c   : > { %361 = vperm.xlu0 %1086, %v1303_v10  }
  0x3f   : > { %1084 = vset.pattern.permute.xlu1 %v1195_v15 }
  0x40   : > { %341 = vperm.xlu1 %1084, %v1303_v10   ;;  %1087 = vset.pattern.permute.xlu0 %v1197_v17 }
  0x41   : > { %377 = vperm.xlu0 %1087, %v1301_v9  }
  0x44   : > { %1085 = vset.pattern.permute.xlu1 %v1196_v16 }
  0x45   : > { %357 = vperm.xlu1 %1085, %v1301_v9   ;;  %1090 = vset.pattern.permute.xlu0 %v1198_v18 }
  0x46   : > { %409 = vperm.xlu0 %1090, %v1303_v10  }
  0x49   : > { %1088 = vset.pattern.permute.xlu1 %v1197_v17  ;;  %v1215_v17 = vmov 22  }
  0x4a   : > { %381 = vperm.xlu1 %1088, %v1303_v10   ;;  %1092 = vset.pattern.permute.xlu0 %v1199_v19 }
  0x4b   : > { %429 = vperm.xlu0 %1092, %v1301_v9  }
  0x4e   : > { %1089 = vset.pattern.permute.xlu1 %v1198_v18 }
  0x4f   : > { %405 = vperm.xlu1 %1089, %v1301_v9   ;;  %1095 = vset.pattern.permute.xlu0 %v1200_v20 }
  0x50   : > { %445 = vperm.xlu0 %1095, %v1303_v10  }
  0x53   : > { %1091 = vset.pattern.permute.xlu1 %v1201_v21 }
  0x54   : > { %417 = vperm.xlu1 %1091, %v1301_v9   ;;  %1096 = vset.pattern.permute.xlu0 %v1202_v22 }
  0x55   : > { %469 = vperm.xlu0 %1096, %v1301_v9  }
  0x58   : > { %421 = vperm.xlu1 %1091, %v1303_v10  }
  0x59   : > { %1099 = vset.pattern.permute.xlu0 %v1203_v23 }
  0x5a   : > { %493 = vperm.xlu0 %1099, %v1303_v10  }
  0x5c   : > { %1093 = vset.pattern.permute.xlu1 %v1199_v19 }
  0x5d   : > { %433 = vperm.xlu1 %1093, %v1303_v10  }
  0x5e   : > { %1100 = vset.pattern.permute.xlu0 %v1204_v24 }
  0x5f   : > { %509 = vperm.xlu0 %1100, %v1301_v9  }
  0x61   : > { %1094 = vset.pattern.permute.xlu1 %v1200_v20  ;;  %v1216_v20 = vmov 25  }
  0x62   : > { %441 = vperm.xlu1 %1094, %v1301_v9  }
  0x63   : > { %1103 = vset.pattern.permute.xlu0 %v1205_v25 }
  0x64   : > { %533 = vperm.xlu0 %1103, %v1303_v10  }
  0x66   : > { %1097 = vset.pattern.permute.xlu1 %v1202_v22 }
  0x67   : > { %473 = vperm.xlu1 %1097, %v1303_v10  }
  0x68   : > { %1104 = vset.pattern.permute.xlu0 %v1206_v26 }
  0x69   : > { %557 = vperm.xlu0 %1104, %v1301_v9  }
  0x6b   : > { %1098 = vset.pattern.permute.xlu1 %v1203_v23  ;;  %v1217_v23 = vmov 27  }
  0x6c   : > { %489 = vperm.xlu1 %1098, %v1301_v9  }
  0x6d   : > { %1107 = vset.pattern.permute.xlu0 %v1207_v27 }
  0x70   : > { %1101 = vset.pattern.permute.xlu1 %v1204_v24 }
  0x71   : > { %513 = vperm.xlu1 %1101, %v1303_v10  }
  0x75   : > { %1102 = vset.pattern.permute.xlu1 %v1205_v25 }
  0x76   : > { %529 = vperm.xlu1 %1102, %v1301_v9  }
  0x7a   : > { %1105 = vset.pattern.permute.xlu1 %v1206_v26  ;;  %v1218_v26 = vmov 28  }
  0x7b   : > { %561 = vperm.xlu1 %1105, %v1303_v10  }
  0x7f   : > { %1106 = vset.pattern.permute.xlu1 %v1207_v27 }
  0x80   : > { %569 = vperm.xlu1 %1106, %v1301_v9  }
  0x84   : > { %1108 = vset.pattern.permute.xlu1 %v1208_v28 }
  0x85   : > { %v189_v29 = vpop.permute.xlu0 %188  ;;  %v201_v30 = vpop.permute.xlu1 %200 }
  0x86   : > { %v194_v31 = vmax.f32 %v1261_v2, %v189_v29  ;;  %v1821_v29 = vmov 35  }
  0x88   : > { %v196_v32 = vmax.f32 %v194_v31, %v1258_v1  ;;  %v1220_v31 = vmov 33  }
  0x89   : > { %v191_v33 = vpop.permute.xlu0 %190  ;;  %v203_v34 = vpop.permute.xlu1 %202 }
  0x8a   : > { %v206_v35 = vmax.f32 %v196_v32, %v201_v30  ;;  %v195_v36 = vmax.f32 %v1271_v4, %v191_v33  ;;  %v1221_v33 = vmov 30  }
  0x8c   : > { %v197_v37 = vmax.f32 %v195_v36, %v1268_v3  ;;  %v208_v38 = vmax.f32 %v206_v35, %v1281_v6 }
  0x8d   : > { %v213_v39 = vpop.permute.xlu0 %212  ;;  %v215_v42 = vpop.permute.xlu1 %214 }
  0x8e   : > { %v207_v40 = vmax.f32 %v197_v37, %v203_v34  ;;  %v218_v41 = vmax.f32 %v208_v38, %v213_v39  ;;  %v1820_v34 = vmov 26  }
  0x90   : > { %v209_v43 = vmax.f32 %v207_v40, %v1278_v5  ;;  %v220_v44 = vmax.f32 %v218_v41, %v1292_v8 }
  0x91   : > { %v225_v46 = vpop.permute.xlu0 %224  ;;  %v227_v50 = vpop.permute.xlu1 %226 }
  0x92   : > { %v219_v47 = vmax.f32 %v209_v43, %v215_v42  ;;  %v230_v48 = vmax.f32 %v220_v44, %v225_v46 }
  0x94   : > { %v1351_v49 = vmax.f32 %v230_v48, %v1348_v45  ;;  %v221_v51 = vmax.f32 %v219_v47, %v1289_v7  ;;  %v1223_v48 = vmov 24  }
  0x96   : > { %294 = vrot.lane.b32.xlu1 %v1351_v49, %s1190_s16  ;;  %v231_v54 = vmax.f32 %v221_v51, %v227_v50 }
  0x98   : > { %v1362_v55 = vmax.f32 %v231_v54, %v1355_v52 }
  0x9a   : > { %641 = vperm.xlu1 %1108, %v1301_v9   ;;  %296 = vrot.lane.b32.xlu0 %v1362_v55, %s1190_s16 }
  0x9e   : > { %1109 = vset.pattern.permute.xlu1 %v1209_v57  ;;  %v1369_v58 = vpop.permute.xlu1 %249  ;;  %573 = vperm.xlu0 %1107, %v1303_v10   ;;  %v1393_v15 = vpop.permute.xlu0 %244 }
  0x9f   : > { %681 = vperm.xlu1 %1109, %v1301_v9  }
  0xa2   : > { %1110 = vset.pattern.permute.xlu0 %v1208_v28 }
  0xa3   : > { %685 = vperm.xlu1 %1109, %v1303_v10   ;;  %v1374_v59 = vpop.permute.xlu1 %257  ;;  %645 = vperm.xlu0 %1110, %v1303_v10   ;;  %v1399_v18 = vpop.permute.xlu0 %261 }
  0xa4   : > { %1822 = vst [vmem:[#allocation2_spill] sm:$0xff] %v1374_v59 }
  0xa7   : > { %1111 = vset.pattern.permute.xlu1 %v1210_v60  ;;  %1112 = vset.pattern.permute.xlu0 %v1211_v61 }
  0xa8   : > { %v1377_v62 = vpop.permute.xlu1 %269  ;;  %793 = vperm.xlu1 %1111, %v1301_v9   ;;  %833 = vperm.xlu0 %1112, %v1301_v9   ;;  %v1405_v21 = vpop.permute.xlu0 %281 }
  0xac   : > { %v1381_v63 = vpop.permute.xlu1 %273  ;;  %797 = vperm.xlu1 %1111, %v1303_v10   ;;  %1114 = vset.pattern.permute.xlu0 %v1212_v0 }
  0xad   : > { %581 = vperm.xlu0 %1114, %v1301_v9   ;;  %v1411_v24 = vpop.permute.xlu0 %321 }
  0xb0   : > { %1113 = vset.pattern.permute.xlu1 %v1211_v61 }
  0xb1   : > { %837 = vperm.xlu1 %1113, %v1303_v10   ;;  %v1386_v11 = vpop.permute.xlu1 %285  ;;  %1117 = vset.pattern.permute.xlu0 %v1213_v12 }
  0xb2   : > { %1823 = vst [vmem:[#allocation3_spill] sm:$0xff] %v1386_v11  ;;  %597 = vperm.xlu0 %1117, %v1303_v10   ;;  %v1417_v27 = vpop.permute.xlu0 %337 }
  0xb5   : > { %1115 = vset.pattern.permute.xlu1 %v1212_v0 }
  0xb6   : > { %585 = vperm.xlu1 %1115, %v1303_v10   ;;  %v1390_v13 = vpop.permute.xlu1 %317  ;;  %1118 = vset.pattern.permute.xlu0 %v1214_v14 }
  0xb7   : > { %621 = vperm.xlu0 %1118, %v1301_v9   ;;  %v1425_v30 = vpop.permute.xlu0 %361 }
  0xba   : > { %1116 = vset.pattern.permute.xlu1 %v1213_v12 }
  0xbb   : > { %593 = vperm.xlu1 %1116, %v1301_v9   ;;  %v1396_v16 = vpop.permute.xlu1 %341  ;;  %1119 = vset.pattern.permute.xlu0 %v1215_v17 }
  0xbc   : > { %661 = vperm.xlu0 %1119, %v1301_v9   ;;  %v1432_v35 = vpop.permute.xlu0 %377 }
  0xbf   : > { %1120 = vset.pattern.permute.xlu1 %v1214_v14 }
  0xc0   : > { %625 = vperm.xlu1 %1120, %v1303_v10   ;;  %v1402_v19 = vpop.permute.xlu1 %357  ;;  %1122 = vset.pattern.permute.xlu0 %v1216_v20 }
  0xc1   : > { %721 = vperm.xlu0 %1122, %v1301_v9   ;;  %v1437_v37 = vpop.permute.xlu0 %409 }
  0xc4   : > { %1121 = vset.pattern.permute.xlu1 %v1215_v17 }
  0xc5   : > { %665 = vperm.xlu1 %1121, %v1303_v10   ;;  %v1408_v22 = vpop.permute.xlu1 %381  ;;  %1125 = vset.pattern.permute.xlu0 %v1217_v23 }
  0xc6   : > { %749 = vperm.xlu0 %1125, %v1303_v10   ;;  %v1445_v40 = vpop.permute.xlu0 %429 }
  0xc9   : > { %1123 = vset.pattern.permute.xlu1 %v1217_v23 }
  0xca   : > { %v1413_v25 = vpop.permute.xlu1 %405  ;;  %745 = vperm.xlu1 %1123, %v1301_v9   ;;  %1128 = vset.pattern.permute.xlu0 %v1218_v26 }
  0xcb   : > { %777 = vperm.xlu0 %1128, %v1303_v10   ;;  %v1450_v42 = vpop.permute.xlu0 %445 }
  0xcc   : > { %1826 = vst [vmem:[#allocation6_spill] sm:$0xff] %v1450_v42 }
  0xce   : > { %1124 = vset.pattern.permute.xlu1 %v1216_v20 }
  0xcf   : > { %725 = vperm.xlu1 %1124, %v1303_v10   ;;  %v1420_v28 = vpop.permute.xlu1 %417  ;;  %1130 = vset.pattern.permute.xlu0 %v1821_v29 }
  0xd0   : > { %1824 = vst [vmem:[#allocation4_spill] sm:$0xff] %v1420_v28  ;;  %897 = vperm.xlu0 %1130, %v1301_v9   ;;  %v1452_v43 = vpop.permute.xlu0 %469 }
  0xd3   : > { %1126 = vset.pattern.permute.xlu1 %v1218_v26  ;;  %v1427_v32 = vpop.permute.xlu1 %421 }
  0xd4   : > { %773 = vperm.xlu1 %1126, %v1301_v9   ;;  %1131 = vset.pattern.permute.xlu0 %v1220_v31 }
  0xd5   : > { %877 = vperm.xlu0 %1131, %v1303_v10   ;;  %v1456_v46 = vpop.permute.xlu0 %493 }
  0xd8   : > { %1127 = vset.pattern.permute.xlu1 %v1221_v33  ;;  %v1434_v36 = vpop.permute.xlu1 %433 }
  0xd9   : > { %813 = vperm.xlu1 %1127, %v1301_v9   ;;  %1134 = vset.pattern.permute.xlu0 %v1820_v34 }
  0xda   : > { %v510_v50 = vpop.permute.xlu0 %509 }
  0xdd   : > { %817 = vperm.xlu1 %1127, %v1303_v10   ;;  %v1439_v38 = vpop.permute.xlu1 %441 }
  0xde   : > { %1825 = vst [vmem:[#allocation5_spill] sm:$0xff] %v1439_v38 }
  0xdf   : > { %v534_v54 = vpop.permute.xlu0 %533 }
  0xe1   : > { %1129 = vset.pattern.permute.xlu1 %v1220_v31 }
  0xe2   : > { %873 = vperm.xlu1 %1129, %v1301_v9   ;;  %v1442_v39 = vpop.permute.xlu1 %473 }
  0xe4   : > { %v1464_v61 = vpop.permute.xlu0 %557 }
  0xe6   : > { %1132 = vset.pattern.permute.xlu1 %v1821_v29 }
  0xe7   : > { %901 = vperm.xlu1 %1132, %v1303_v10   ;;  %v1448_v41 = vpop.permute.xlu1 %489 }
  0xeb   : > { %1133 = vset.pattern.permute.xlu1 %v1223_v48 }
  0xec   : > { %v1454_v44 = vpop.permute.xlu1 %513 }
  0xf1   : > { %v1458_v47 = vpop.permute.xlu1 %529 }
  0xf6   : > { %v1460_v51 = vpop.permute.xlu1 %561 }
  0xf7   : > { %1827 = vst [vmem:[#allocation7_spill] sm:$0xff] %v1460_v51 }
  0xfb   : > { %v1462_v57 = vpop.permute.xlu1 %569 }
  0xfc   : > { %1828 = vst [vmem:[#allocation8_spill] sm:$0xff] %v1462_v57 }
 0x108   : > { %v295_v60 = vpop.permute.xlu1 %294 }
 0x109   : > { %v300_v0 = vsub.f32 %v1261_v2, %v295_v60  ;;  %v452_v12 = vsub.f32 %v1258_v1, %v295_v60  ;;  %v604_v48 = vsub.f32 %v1281_v6, %v295_v60 }
 0x10b   : > { %v302_v14 = vmul.f32 1.442695, %v300_v0  ;;  %v454_v17 = vmul.f32 1.442695, %v452_v12  ;;  %v606_v53 = vmul.f32 1.442695, %v604_v48 }
 0x10c   : > { %v297_v20 = vpop.permute.xlu0 %296 }
 0x10d   : > { %1141 = vpow2.f32 %v302_v14  ;;  %v301_v23 = vsub.f32 %v1271_v4, %v297_v20  ;;  %v453_v26 = vsub.f32 %v1268_v3, %v297_v20  ;;  %v757_v56 = vsub.f32 %v1289_v7, %v297_v20 }
 0x10e   : > { %1143 = vpow2.f32 %v454_v17  ;;  %v605_v34 = vsub.f32 %v1278_v5, %v297_v20  ;;  %v756_v14 = vsub.f32 %v1292_v8, %v295_v60 }
 0x10f   : > { %v304_v31 = vmul.f32 1.442695, %v301_v23  ;;  %v456_v33 = vmul.f32 1.442695, %v453_v26  ;;  %v760_v12 = vmul.f32 1.442695, %v757_v56 }
 0x110   : > { %v608_v17 = vmul.f32 1.442695, %v605_v34  ;;  %v758_v56 = vmul.f32 1.442695, %v756_v14 }
 0x111   : > { %1145 = vpow2.f32 %v304_v31 }
 0x112   : > { %1147 = vpow2.f32 %v456_v33 }
 0x113   : > { %1149 = vpow2.f32 %v606_v53 }
 0x114   : > { %1151 = vpow2.f32 %v760_v12 }
 0x115   : > { %v1473_v0 = vpop.permute.xlu1 %641  ;;  %1153 = vpow2.f32 %v608_v17 }
 0x116   : > { %1155 = vpow2.f32 %v758_v56 }
 0x119   : > { %v1478_v23 = vpop.permute.xlu0 %573 }
 0x11a   : > { %v1476_v29 = vpop.eup %1141  ;;  %v1480_v26 = vpop.permute.xlu1 %681 }
 0x11b   : > { %v1482_v31 = vpop.eup %1143  ;;  %308 = vrot.lane.b32.xlu1 %v1476_v29, %s1190_s16 }
 0x11c   : > { %v1487_v20 = vmul.f32 %v1482_v31, %v510_v50 }
 0x11e   : > { %v686_v53 = vpop.permute.xlu1 %685  ;;  %v1146_v60 = vpop.eup %1145 }
 0x11f   : > { %v1489_v34 = vpop.permute.xlu0 %645  ;;  %460 = vrot.lane.b32.xlu1 %v1482_v31, %s1190_s16  ;;  %v1493_v33 = vpop.eup %1147  ;;  %310 = vrot.lane.b32.xlu0 %v1146_v60, %s1190_s16  ;;  %v345_v50 = vmul.f32 %v1146_v60, %v1396_v16  ;;  %v385_v51 = vmul.f32 %v1146_v60, %v1408_v22 }
 0x120   : > { %v1497_v48 = vmul.f32 %v1493_v33, %v534_v54  ;;  %v1505_v17 = vpop.eup %1149 }
 0x121   : > { %v1508_v57 = vpop.eup %1151 }
 0x122   : > { %v1518_v28 = vpop.eup %1153 }
 0x123   : > { %v1500_v12 = vpop.permute.xlu1 %793  ;;  %462 = vrot.lane.b32.xlu1 %v1493_v33, %s1190_s16  ;;  %350 = vrot.lane.b32.xlu0 %v345_v50, %s1190_s16  ;;  %v834_v14 = vpop.permute.xlu0 %833  ;;  %v477_v50 = vmul.f32 %v1493_v33, %v1442_v39  ;;  %v689_v39 = vmul.f32 %v1518_v28, %v686_v53  ;;  %v325_v53 = vmul.f32 %v1146_v60, %v1411_v24 }
 0x124   : > { %v1525_v59 = vpop.eup %1155 }
 0x127   : > { %v798_v56 = vpop.permute.xlu1 %797  ;;  %612 = vrot.lane.b32.xlu1 %v1505_v17, %s1190_s16  ;;  %390 = vrot.lane.b32.xlu0 %v385_v51, %s1190_s16  ;;  %v517_v51 = vmul.f32 %v1493_v33, %v1454_v44  ;;  %v324_v44 = vmul.f32 %v1476_v29, %v1390_v13  ;;  %v344_v13 = vmul.f32 %v1476_v29, %v1417_v27 }
 0x128   : > { %v1513_v16 = vmul.f32 %v1508_v57, %v798_v56  ;;  %v1516_v54 = vpop.permute.xlu0 %581 }
 0x129   : > { %1829 = vst [vmem:[#allocation9_spill] sm:$0xff] %v1516_v54 }
 0x12b   : > { %614 = vrot.lane.b32.xlu1 %v1518_v28, %s1190_s16  ;;  %482 = vrot.lane.b32.xlu0 %v477_v50, %s1190_s16 }
 0x12c   : > { %v838_v22 = vpop.permute.xlu1 %837 }
 0x12d   : > { %v1527_v42 = vpop.permute.xlu0 %597 }
 0x12e   : > { %1830 = vst [vmem:[#allocation10_spill] sm:$0xff] %v1527_v42  ;;  %v840_v42 = vmul.f32 %v1525_v59, %v834_v14 }
 0x12f   : > { %764 = vrot.lane.b32.xlu1 %v1525_v59, %s1190_s16  ;;  %522 = vrot.lane.b32.xlu0 %v517_v51, %s1190_s16  ;;  %v841_v51 = vmul.f32 %v1508_v57, %v838_v22  ;;  %v364_v22 = vmul.f32 %v1476_v29, %v1402_v19  ;;  %v384_v19 = vmul.f32 %v1476_v29, %v1432_v35  ;;  %v1831_v35 = vmov 35  }
 0x130   : > { %v496_v29 = vmul.f32 %v1482_v31, %v1448_v41  ;;  %v536_v41 = vmul.f32 %v1482_v31, %v1458_v47  ;;  %v800_v47 = vmul.f32 %v1525_v59, %v1500_v12 }
 0x131   : > { %v1534_v56 = vpop.permute.xlu1 %585 }
 0x132   : > { %v622_v54 = vpop.permute.xlu0 %621 }
 0x133   : > { %766 = vrot.lane.b32.xlu1 %v1508_v57, %s1190_s16  ;;  %v1540_v50 = vmul.f32 %v1505_v17, %v622_v54  ;;  %694 = vrot.lane.b32.xlu0 %v689_v39, %s1190_s16 }
 0x136   : > { %v1546_v38 = vpop.permute.xlu1 %593 }
 0x137   : > { %328 = vrot.lane.b32.xlu1 %v324_v44, %s1190_s16  ;;  %844 = vrot.lane.b32.xlu0 %v840_v42, %s1190_s16  ;;  %v662_v14 = vpop.permute.xlu0 %661  ;;  %v365_v44 = vmul.f32 %v1146_v60, %v1425_v30  ;;  %v476_v30 = vmul.f32 %v1482_v31, %v1452_v43  ;;  %v497_v43 = vmul.f32 %v1493_v33, %v1456_v46  ;;  %v1832_v33 = vmov 26  }
 0x138   : > { %v688_v46 = vmul.f32 %v1505_v17, %v1480_v26 }
 0x13b   : > { %v626_v11 = vpop.permute.xlu1 %625  ;;  %330 = vrot.lane.b32.xlu1 %v325_v53, %s1190_s16  ;;  %846 = vrot.lane.b32.xlu0 %v841_v51, %s1190_s16  ;;  %v668_v53 = vmul.f32 %v1505_v17, %v662_v14 }
 0x13c   : > { %v1554_v54 = vmul.f32 %v1518_v28, %v626_v11  ;;  %v1224_v11 = vmov 32   ;;  %v1567_v39 = vpop.permute.xlu0 %721 }
 0x13f   : > { %348 = vrot.lane.b32.xlu1 %v344_v13, %s1190_s16  ;;  %733 = vperm.xlu0 %1134, %v1301_v9   ;;  %v1225_v13 = vmov 34  }
 0x140   : > { %v666_v42 = vpop.permute.xlu1 %665 }
 0x141   : > { %v1562_v24 = vmul.f32 %v1518_v28, %v666_v42  ;;  %v1580_v42 = vpop.permute.xlu0 %749 }
 0x143   : > { %368 = vrot.lane.b32.xlu1 %v364_v22, %s1190_s16  ;;  %1136 = vset.pattern.permute.xlu0 %v1224_v11 }
 0x144   : > { %861 = vperm.xlu0 %1136, %v1301_v9  }
 0x145   : > { %v1570_v27 = vpop.permute.xlu1 %745 }
 0x146   : > { %v778_v22 = vpop.permute.xlu0 %777 }
 0x147   : > { %370 = vrot.lane.b32.xlu1 %v365_v44, %s1190_s16  ;;  %v781_v44 = vmul.f32 %v1508_v57, %v778_v22 }
 0x148   : > { %672 = vrot.lane.b32.xlu0 %v668_v53, %s1190_s16  ;;  %v648_v53 = vmul.f32 %v1505_v17, %v1473_v0 }
 0x149   : > { %1139 = vset.pattern.permute.xlu0 %v1225_v13 }
 0x14a   : > { %v1578_v51 = vpop.permute.xlu1 %725 }
 0x14b   : > { %388 = vrot.lane.b32.xlu1 %v384_v19, %s1190_s16  ;;  %v1639_v19 = vpop.permute.xlu0 %897 }
 0x14c   : > { %889 = vperm.xlu0 %1139, %v1303_v10  }
 0x14f   : > { %v774_v60 = vpop.permute.xlu1 %773  ;;  %480 = vrot.lane.b32.xlu1 %v476_v30, %s1190_s16 }
 0x150   : > { %v780_v14 = vmul.f32 %v1525_v59, %v774_v60  ;;  %1140 = vset.pattern.permute.xlu0 %v1831_v35  ;;  %v549_v35 = vsub.f32 %v1278_v5, %v1362_v55 }
 0x152   : > { %784 = vrot.lane.b32.xlu0 %v780_v14, %s1190_s16 }
 0x153   : > { %500 = vrot.lane.b32.xlu1 %v496_v29, %s1190_s16 }
 0x154   : > { %v814_v31 = vpop.permute.xlu1 %813 }
 0x156   : > { %786 = vrot.lane.b32.xlu0 %v781_v44, %s1190_s16 }
 0x157   : > { %502 = vrot.lane.b32.xlu1 %v497_v43, %s1190_s16 }
 0x158   : > { %v818_v0 = vpop.permute.xlu1 %817 }
 0x15b   : > { %520 = vrot.lane.b32.xlu1 %v1487_v20, %s1190_s16  ;;  %v649_v20 = vmul.f32 %v1518_v28, %v1489_v34 }
 0x15d   : > { %v1621_v26 = vpop.permute.xlu1 %873 }
 0x15f   : > { %540 = vrot.lane.b32.xlu1 %v536_v41, %s1190_s16 }
 0x162   : > { %v1625_v28 = vpop.permute.xlu1 %901 }
 0x163   : > { %542 = vrot.lane.b32.xlu1 %v1497_v48, %s1190_s16  ;;  %v234_v48 = vsub.f32 %v1261_v2, %v1351_v49  ;;  %v397_v2 = vsub.f32 %v1268_v3, %v1362_v55  ;;  %v396_v3 = vsub.f32 %v1258_v1, %v1351_v49 }
 0x165   : > { %v236_v17 = vmul.f32 1.442695, %v234_v48 }
 0x167   : > { %652 = vrot.lane.b32.xlu1 %v648_v53, %s1190_s16  ;;  %1157 = vpow2.f32 %v236_v17  ;;  %v548_v53 = vsub.f32 %v1281_v6, %v1351_v49 }
 0x16b   : > { %692 = vrot.lane.b32.xlu1 %v688_v46, %s1190_s16  ;;  %v552_v46 = vmul.f32 1.442695, %v549_v35 }
 0x16f   : > { %654 = vrot.lane.b32.xlu1 %v649_v20, %s1190_s16 }
 0x173   : > { %804 = vrot.lane.b32.xlu1 %v800_v47, %s1190_s16 }
 0x174   : > { %v1663_v22 = vpop.eup %1157 }
 0x175   : > { %v276_v6 = vmul.f32 %v1663_v22, %v1377_v62 }
 0x177   : > { %806 = vrot.lane.b32.xlu1 %v1513_v16, %s1190_s16  ;;  %v235_v16 = vsub.f32 %v1271_v4, %v1362_v55  ;;  %v820_v4 = vmul.f32 %v1525_v59, %v814_v31 }
 0x17b   : > { %709 = vperm.xlu1 %1133, %v1301_v9  }
 0x17f   : > { %713 = vperm.xlu1 %1133, %v1303_v10  }
 0x183   : > { %1135 = vset.pattern.permute.xlu1 %v1832_v33 }
 0x184   : > { %737 = vperm.xlu1 %1135, %v1303_v10  }
 0x188   : > { %1137 = vset.pattern.permute.xlu1 %v1225_v13  ;;  %v400_v13 = vmul.f32 1.442695, %v397_v2 }
 0x189   : > { %885 = vperm.xlu1 %1137, %v1301_v9  }
 0x18d   : > { %v1628_v34 = vpop.permute.xlu1 %308  ;;  %632 = vrot.lane.b32.xlu1 %v1540_v50, %s1190_s16  ;;  %v238_v50 = vmul.f32 1.442695, %v235_v16 }
 0x18e   : > { %1138 = vset.pattern.permute.xlu1 %v1224_v11 }
 0x18f   : > { %1159 = vpow2.f32 %v238_v50 }
 0x190   : > { %1161 = vpow2.f32 %v400_v13 }
 0x191   : > { %v1634_v12 = vpop.permute.xlu1 %460  ;;  %865 = vperm.xlu1 %1138, %v1303_v10   ;;  %v1651_v10 = vpop.permute.xlu0 %877 }
 0x195   : > { %v1641_v9 = vpop.permute.xlu1 %462  ;;  %634 = vrot.lane.b32.xlu1 %v1554_v54, %s1190_s16  ;;  %v821_v54 = vmul.f32 %v1508_v57, %v818_v0  ;;  %v311_v60 = vpop.permute.xlu0 %310  ;;  %v252_v57 = vmul.f32 %v1663_v22, %v1393_v15  ;;  %v550_v0 = vmul.f32 1.442695, %v548_v53 }
 0x199   : > { %v1647_v11 = vpop.permute.xlu1 %612  ;;  %674 = vrot.lane.b32.xlu1 %v1562_v24, %s1190_s16  ;;  %v398_v24 = vmul.f32 1.442695, %v396_v3  ;;  %v351_v59 = vpop.permute.xlu0 %350 }
 0x19b   : > { %1163 = vpow2.f32 %v398_v24 }
 0x19c   : > { %v1671_v44 = vpop.eup %1159  ;;  %1165 = vpow2.f32 %v552_v46 }
 0x19d   : > { %v1654_v30 = vpop.permute.xlu1 %614  ;;  %824 = vrot.lane.b32.xlu1 %v820_v4, %s1190_s16  ;;  %v1673_v41 = vpop.permute.xlu0 %390  ;;  %v253_v20 = vmul.f32 %v1671_v44, %v1369_v58  ;;  %1167 = vpow2.f32 %v550_v0  ;;  %v700_v4 = vsub.f32 %v1292_v8, %v1351_v49  ;;  %v277_v13 = vmul.f32 %v1671_v44, %v1381_v63 }
 0x19e   : > { %v1679_v47 = vpop.eup %1161 }
 0x19f   : > { %v413_v5 = vmul.f32 %v1679_v47, %v1437_v37  ;;  %v437_v24 = vmul.f32 %v1679_v47, %v1434_v36  ;;  %v702_v62 = vmul.f32 1.442695, %v700_v4  ;;  %v1834_v4 = vsub.f32 %v1355_v52, %v1362_v55 }
 0x1a1   : > { %v1660_v14 = vpop.permute.xlu1 %764  ;;  %826 = vrot.lane.b32.xlu1 %v821_v54, %s1190_s16  ;;  %v483_v48 = vpop.permute.xlu0 %482  ;;  %1169 = vpow2.f32 %v702_v62 }
 0x1a5   : > { %v1665_v29 = vpop.permute.xlu1 %766  ;;  %v523_v8 = vpop.permute.xlu0 %522 }
 0x1a8   : > { %v1689_v58 = vpop.eup %1163 }
 0x1a9   : > { %v329_v1 = vpop.permute.xlu1 %328  ;;  %v436_v2 = vmul.f32 %v1689_v58, %v1445_v40  ;;  %v314_v40 = vadd.f32 %v1663_v22, %v1628_v34  ;;  %v1703_v53 = vpop.eup %1165  ;;  %v412_v63 = vmul.f32 %v1689_v58, %v1413_v25 }
 0x1aa   : > { %v334_v43 = vadd.f32 %v329_v1, %v252_v57  ;;  %v701_v57 = vsub.f32 %v1289_v7, %v1362_v55  ;;  %v315_v7 = vadd.f32 %v1671_v44, %v311_v60  ;;  %v1713_v0 = vpop.eup %1167 }
 0x1ad   : > { %v331_v31 = vpop.permute.xlu1 %330 }
 0x1ae   : > { %v335_v15 = vadd.f32 %v331_v31, %v253_v20  ;;  %v589_v20 = vmul.f32 %v1703_v53, %v1534_v56  ;;  %v704_v31 = vmul.f32 1.442695, %v701_v57  ;;  %v265_v56 = vmul.f32 %v1671_v44, %v1399_v18  ;;  %v1835_v57 = vld [vmem:[#allocation3_spill] sm:$0xff] }
 0x1af   : > { %v425_v18 = vmul.f32 %v1679_v47, %v1427_v32 }
 0x1b0   : > { %v415_v33 = vadd.f32 %v413_v5, %v335_v15  ;;  %v402_v5 = vadd.f32 %v1689_v58, %v314_v40  ;;  %v414_v15 = vadd.f32 %v412_v63, %v334_v43  ;;  %1171 = vpow2.f32 %v704_v31 }
 0x1b1   : > { %v1683_v17 = vpop.permute.xlu1 %348  ;;  %v403_v43 = vadd.f32 %v1679_v47, %v315_v7  ;;  %v289_v40 = vmul.f32 %v1671_v44, %v1835_v57 }
 0x1b2   : > { %v1685_v16 = vadd.f32 %v483_v48, %v415_v33  ;;  %v1833_v48 = vsub.f32 %v1348_v45, %v1351_v49  ;;  %v466_v60 = vadd.f32 %v1634_v12, %v402_v5  ;;  %v856_v45 = vmul.f32 1.442695, %v1834_v4 }
 0x1b3   : > { %v395_v31 = vadd.f32 %v1673_v41, %v289_v40 }
 0x1b4   : > { %v854_v25 = vmul.f32 1.442695, %v1833_v48  ;;  %v695_v48 = vpop.permute.xlu0 %694 }
 0x1b5   : > { %v369_v50 = vpop.permute.xlu1 %368 }
 0x1b6   : > { %v374_v37 = vadd.f32 %v369_v50, %v276_v6  ;;  %v564_v6 = vmul.f32 %v1713_v0, %v1464_v61  ;;  %1173 = vpow2.f32 %v854_v25  ;;  %v467_v61 = vadd.f32 %v1641_v9, %v403_v43 }
 0x1b7   : > { %1175 = vpow2.f32 %v856_v45 }
 0x1b8   : > { %v438_v54 = vadd.f32 %v436_v2, %v374_v37  ;;  %v355_v2 = vadd.f32 %v351_v59, %v265_v56  ;;  %v288_v59 = vmul.f32 %v1663_v22, %v1405_v21  ;;  %v555_v32 = vadd.f32 %v1703_v53, %v467_v61  ;;  %v1837_v21 = vld [vmem:[#allocation9_spill] sm:$0xff]  ;;  %v1839_v56 = vld [vmem:[#allocation2_spill] sm:$0xff] }
 0x1b9   : > { %v371_v3 = vpop.permute.xlu1 %370 }
 0x1ba   : > { %v375_v35 = vadd.f32 %v371_v3, %v277_v13  ;;  %v554_v13 = vadd.f32 %v1713_v0, %v466_v60  ;;  %v427_v3 = vadd.f32 %v425_v18, %v355_v2 }
 0x1bc   : > { %v439_v1 = vadd.f32 %v437_v24, %v375_v35  ;;  %v577_v24 = vmul.f32 %v1703_v53, %v1478_v23  ;;  %v618_v52 = vadd.f32 %v1647_v11, %v554_v13  ;;  %v1738_v35 = vpop.eup %1169  ;;  %v619_v23 = vadd.f32 %v1654_v30, %v555_v32  ;;  %v1842_v32 = vld [vmem:[#allocation8_spill] sm:$0xff] }
 0x1bd   : > { %v389_v46 = vpop.permute.xlu1 %388  ;;  %v1750_v5 = vpop.eup %1171  ;;  %v264_v30 = vmul.f32 %v1663_v22, %v1839_v56  ;;  %v1840_v22 = vld [vmem:[#allocation4_spill] sm:$0xff]  ;;  %v752_v57 = vmul.f32 %v1738_v35, %v1570_v27 }
 0x1be   : > { %v527_v36 = vadd.f32 %v523_v8, %v439_v1  ;;  %v394_v62 = vadd.f32 %v389_v46, %v288_v59  ;;  %v1836_v1 = vld [vmem:[#allocation5_spill] sm:$0xff]  ;;  %v706_v11 = vadd.f32 %v1738_v35, %v618_v52  ;;  %v707_v41 = vadd.f32 %v1750_v5, %v619_v23 }
 0x1bf   : > { %v448_v8 = vmul.f32 %v1689_v58, %v1836_v1  ;;  %v424_v18 = vmul.f32 %v1689_v58, %v1840_v22 }
 0x1c0   : > { %v1711_v34 = vadd.f32 %v589_v20, %v527_v36  ;;  %v588_v20 = vmul.f32 %v1713_v0, %v1837_v21  ;;  %v770_v46 = vadd.f32 %v1660_v14, %v706_v11  ;;  %v771_v43 = vadd.f32 %v1665_v29, %v707_v41 }
 0x1c1   : > { %v481_v33 = vpop.permute.xlu1 %480  ;;  %v450_v44 = vadd.f32 %v448_v8, %v394_v62  ;;  %v576_v62 = vmul.f32 %v1713_v0, %v1842_v32  ;;  %v728_v11 = vmul.f32 %v1738_v35, %v1567_v39 }
 0x1c2   : > { %v486_v50 = vadd.f32 %v481_v33, %v414_v15  ;;  %v1838_v15 = vld [vmem:[#allocation6_spill] sm:$0xff] }
 0x1c3   : > { %v449_v33 = vmul.f32 %v1679_v47, %v1838_v15  ;;  %v354_v47 = vadd.f32 %v1683_v17, %v264_v30  ;;  %v753_v17 = vmul.f32 %v1750_v5, %v1580_v42 }
 0x1c4   : > { %v1724_v37 = vadd.f32 %v564_v6, %v486_v50  ;;  %v1762_v50 = vpop.eup %1173 }
 0x1c5   : > { %v501_v49 = vpop.permute.xlu1 %500  ;;  %v451_v14 = vadd.f32 %v449_v33, %v395_v31  ;;  %v858_v60 = vadd.f32 %v1762_v50, %v770_v46  ;;  %v1767_v45 = vpop.eup %1175  ;;  %v426_v59 = vadd.f32 %v424_v18, %v354_v47  ;;  %v904_v27 = vmul.f32 %v1762_v50, %v1639_v19 }
 0x1c6   : > { %v905_v8 = vmul.f32 %v1767_v45, %v1625_v28  ;;  %v881_v19 = vmul.f32 %v1767_v45, %v1651_v10 }
 0x1c7   : > { %1177 = vrcp.f32 %v858_v60  ;;  %v506_v52 = vadd.f32 %v501_v49, %v426_v59 }
 0x1c9   : > { %v503_v12 = vpop.permute.xlu1 %502  ;;  %v578_v21 = vadd.f32 %v576_v62, %v506_v52 }
 0x1ca   : > { %v507_v55 = vadd.f32 %v503_v12, %v427_v3  ;;  %v845_v3 = vpop.permute.xlu0 %844  ;;  %v859_v12 = vadd.f32 %v1767_v45, %v771_v43 }
 0x1cc   : > { %v579_v9 = vadd.f32 %v577_v24, %v507_v55  ;;  %1179 = vrcp.f32 %v859_v12 }
 0x1cd   : > { %v521_v63 = vpop.permute.xlu1 %520 }
 0x1ce   : > { %v526_v36 = vadd.f32 %v521_v63, %v438_v54  ;;  %v600_v54 = vmul.f32 %v1713_v0, %v1546_v38  ;;  %v1841_v38 = vld [vmem:[#allocation10_spill] sm:$0xff]  ;;  %v847_v40 = vpop.permute.xlu0 %846 }
 0x1cf   : > { %v601_v61 = vmul.f32 %v1703_v53, %v1841_v38 }
 0x1d0   : > { %v1753_v7 = vadd.f32 %v588_v20, %v526_v36  ;;  %v729_v36 = vmul.f32 %v1750_v5, %v1578_v51 }
 0x1d1   : > { %v541_v25 = vpop.permute.xlu1 %540 }
 0x1d2   : > { %v546_v6 = vadd.f32 %v541_v25, %v450_v44  ;;  %v880_v25 = vmul.f32 %v1762_v50, %v1621_v26  ;;  %v734_v26 = vpop.permute.xlu0 %733 }
 0x1d4   : > { %v602_v2 = vadd.f32 %v600_v54, %v546_v6  ;;  %v1178_v33 = vpop.eup %1177 }
 0x1d5   : > { %v543_v4 = vpop.permute.xlu1 %542 }
 0x1d6   : > { %v547_v13 = vadd.f32 %v543_v4, %v451_v14  ;;  %v862_v47 = vpop.permute.xlu0 %861 }
 0x1d8   : > { %v603_v24 = vadd.f32 %v601_v61, %v547_v13 }
 0x1d9   : > { %v653_v29 = vpop.permute.xlu1 %652  ;;  %v1180_v54 = vpop.eup %1179 }
 0x1da   : > { %v699_v55 = vadd.f32 %v695_v48, %v603_v24  ;;  %v658_v23 = vadd.f32 %v653_v29, %v578_v21  ;;  %v673_v22 = vpop.permute.xlu0 %672  ;;  %v1843_v24 = vld [vmem:[#allocation7_spill] sm:$0xff]  ;;  %v740_v21 = vmul.f32 %v1738_v35, %v734_v26 }
 0x1db   : > { %v565_v29 = vmul.f32 %v1703_v53, %v1843_v24 }
 0x1dc   : > { %v755_v58 = vadd.f32 %v753_v17, %v699_v55  ;;  %v730_v28 = vadd.f32 %v728_v11, %v658_v23  ;;  %v868_v17 = vmul.f32 %v1762_v50, %v862_v47 }
 0x1dd   : > { %v693_v1 = vpop.permute.xlu1 %692  ;;  %v567_v32 = vadd.f32 %v565_v29, %v1685_v16 }
 0x1de   : > { %v851_v63 = vadd.f32 %v847_v40, %v755_v58  ;;  %v698_v20 = vadd.f32 %v693_v1, %v602_v2  ;;  %v890_v38 = vpop.permute.xlu0 %889 }
 0x1e0   : > { %v754_v42 = vadd.f32 %v752_v57, %v698_v20  ;;  %v907_v49 = vadd.f32 %v905_v8, %v851_v63 }
 0x1e1   : > { %v655_v0 = vpop.permute.xlu1 %654 }
 0x1e2   : > { %v850_v31 = vadd.f32 %v845_v3, %v754_v42  ;;  %v659_v46 = vadd.f32 %v655_v0, %v579_v9  ;;  %v917_v6 = vmul.f32 %v1180_v54, %v907_v49  ;;  %v785_v12 = vpop.permute.xlu0 %784 }
 0x1e4   : > { %v906_v44 = vadd.f32 %v904_v27, %v850_v31  ;;  %v731_v15 = vadd.f32 %v729_v36, %v659_v46 }
 0x1e5   : > { %v805_v48 = vpop.permute.xlu1 %804 }
 0x1e6   : > { %v810_v56 = vadd.f32 %v805_v48, %v730_v28  ;;  %v916_v30 = vmul.f32 %v1178_v33, %v906_v44  ;;  %v787_v8 = vpop.permute.xlu0 %786 }
 0x1e8   : > { %v882_v39 = vadd.f32 %v880_v25, %v810_v56  ;;  %928 = vrot.lane.b32.xlu1 %v916_v30, %s1190_s16 }
 0x1e9   : > { %v807_v51 = vpop.permute.xlu1 %806 }
 0x1ea   : > { %v811_v41 = vadd.f32 %v807_v51, %v731_v15  ;;  %v912_v9 = vmul.f32 %v1178_v33, %v882_v39 }
 0x1ec   : > { %v883_v14 = vadd.f32 %v881_v19, %v811_v41  ;;  %920 = vrot.lane.b32.xlu0 %v912_v9, %s1190_s16  ;;  %930 = vrot.lane.b32.xlu1 %v917_v6, %s1190_s16 }
 0x1ee   : > { %v913_v60 = vmul.f32 %v1180_v54, %v883_v14 }
 0x1f0   : > { %922 = vrot.lane.b32.xlu0 %v913_v60, %s1190_s16 }
 0x1f6   : > { %v710_v43 = vpop.permute.xlu1 %709 }
 0x1f7   : > { %v716_v61 = vmul.f32 %v1738_v35, %v710_v43  ;;  %v893_v35 = vmul.f32 %v1767_v45, %v890_v38 }
 0x1fa   : > { %v714_v2 = vpop.permute.xlu1 %713 }
 0x1fb   : > { %v717_v58 = vmul.f32 %v1750_v5, %v714_v2 }
 0x1ff   : > { %v738_v4 = vpop.permute.xlu1 %737 }
 0x200   : > { %v741_v11 = vmul.f32 %v1750_v5, %v738_v4 }
 0x204   : > { %v886_v18 = vpop.permute.xlu1 %885 }
 0x205   : > { %v892_v0 = vmul.f32 %v1762_v50, %v886_v18 }
 0x208   : > { %v633_v10 = vpop.permute.xlu1 %632 }
 0x209   : > { %v638_v13 = vadd.f32 %v633_v10, %v1724_v37  ;;  %v678_v37 = vadd.f32 %v673_v22, %v1753_v7 }
 0x20b   : > { %v718_v3 = vadd.f32 %v716_v61, %v638_v13  ;;  %v742_v16 = vadd.f32 %v740_v21, %v678_v37 }
 0x20c   : > { %v866_v59 = vpop.permute.xlu1 %865 }
 0x20d   : > { %v790_v52 = vadd.f32 %v785_v12, %v718_v3  ;;  %v869_v53 = vmul.f32 %v1767_v45, %v866_v59 }
 0x20f   : > { %v870_v55 = vadd.f32 %v868_v17, %v790_v52 }
 0x210   : > { %v635_v62 = vpop.permute.xlu1 %634 }
 0x211   : > { %v639_v57 = vadd.f32 %v635_v62, %v567_v32  ;;  %v910_v40 = vmul.f32 %v1178_v33, %v870_v55 }
 0x213   : > { %v719_v1 = vadd.f32 %v717_v58, %v639_v57 }
 0x214   : > { %v675_v63 = vpop.permute.xlu1 %674 }
 0x215   : > { %v791_v20 = vadd.f32 %v787_v8, %v719_v1  ;;  %v679_v42 = vadd.f32 %v675_v63, %v1711_v34 }
 0x217   : > { %v871_v23 = vadd.f32 %v869_v53, %v791_v20  ;;  %v743_v31 = vadd.f32 %v741_v11, %v679_v42 }
 0x218   : > { %v825_v49 = vpop.permute.xlu1 %824 }
 0x219   : > { %v830_v36 = vadd.f32 %v825_v49, %v742_v16  ;;  %v911_v27 = vmul.f32 %v1180_v54, %v871_v23 }
 0x21b   : > { %v894_v7 = vadd.f32 %v892_v0, %v830_v36 }
 0x21c   : > { %v827_v46 = vpop.permute.xlu1 %826 }
 0x21d   : > { %v914_v44 = vmul.f32 %v1178_v33, %v894_v7  ;;  %v831_v28 = vadd.f32 %v827_v46, %v743_v31 }
 0x21f   : > { %v895_v15 = vadd.f32 %v893_v35, %v831_v28 }
 0x221   : > { %v915_v48 = vmul.f32 %v1180_v54, %v895_v15 }
 0x25a   : > { %v929_v34 = vpop.permute.xlu1 %928 }
 0x25b   : > { %v937_v5 = vsel %vm934_vm0, %v914_v44, %v929_v34 }
 0x25c   : > { %940 = vst [vmem:[%s172_s24 + $0x8] sm:$0xff] %v937_v5 }
 0x25e   : > { %v931_v50 = vpop.permute.xlu1 %930  ;;  %v921_v25 = vpop.permute.xlu0 %920 }
 0x25f   : > { %v938_v56 = vsel %vm934_vm0, %v915_v48, %v931_v50  ;;  %v935_v30 = vsel %vm934_vm0, %v910_v40, %v921_v25 }
 0x260   : > { %942 = vst [vmem:[%s172_s24 + $0x18] sm:$0xff] %v938_v56  ;;  %939 = vst [vmem:[%s172_s24] sm:$0xff] %v935_v30 }
 0x262   : > { %v923_v45 = vpop.permute.xlu0 %922 }
 0x263   : > { %v936_v33 = vsel %vm934_vm0, %v911_v27, %v923_v45 }
 0x264   : > { %941 = vst [vmem:[%s172_s24 + $0x10] sm:$0xff] %v936_v33 }
 0x265 PF: > { %s12_s9 = sadd.s32 1, %s1187_s9  }
 0x266   : > { %p9_p4 = scmp.ge.s32.totalorder %s12_s9, 4  }
 0x268   :  { %11 = sbr.rel (!%p9_p4) target bundleno = 1 (0x1), region = 61 }

</bundles_post_ra>
